<compile_context>
chip_gen: v5e
topology: v5e:2x2
jax: 0.10.0
libtpu: 0.0.40
codegen_flags: <defaults>
</compile_context>

<pallas_src>
import functools

import jax
import jax.numpy as jnp
from jax import lax
from jax.experimental import pallas as pl
from jax.experimental.pallas import tpu as pltpu


def _round_up(x, m):
    return ((x + m - 1) // m) * m


# ---------------------------------------------------------------------------
# Fused kernel: encoder Block -> reparameterize -> decoder MLP
# ---------------------------------------------------------------------------
def _iwae_fused_kernel(x_ref, eps_ref,
                       ew1_ref, eb1_ref, ewh_ref, ebh_ref,
                       dw1_ref, db1_ref, dw2_ref, db2_ref,
                       latent_ref, p_ref, *, d_pad):
    """One batch tile of the whole IWAE_1 forward.

    ewh_ref holds the fused / lane-padded head weight [hidden, 2*d_pad]:
    lanes [0, d_pad) are the (zero-padded) mu head, lanes [d_pad, 2*d_pad)
    the (zero-padded) logsigma head.  Padded logsigma columns produce
    sigma = exp(0) = 1, and the matching rows of dw1 are zero, so the padding
    never leaks into the decoder.
    """
    cdtype = x_ref.dtype  # bf16 compute dtype for MXU operands

    # ---- encoder Block ----
    h = jnp.dot(x_ref[...], ew1_ref[...], preferred_element_type=jnp.float32)
    h = jnp.maximum(h + eb1_ref[...], 0.0).astype(cdtype)

    y = jnp.dot(h, ewh_ref[...], preferred_element_type=jnp.float32) + ebh_ref[...]
    lane = lax.broadcasted_iota(jnp.int32, y.shape, 1)
    # lanes < d_pad: mu  |  lanes >= d_pad: sigma = exp(logsigma)   (EUP exp)
    latent = jnp.where(lane < d_pad, y, jnp.exp(y))
    latent_ref[...] = latent.astype(latent_ref.dtype)   # single lane-dense store

    # ---- reparameterization (128-lane-aligned slices, all in VMEM) ----
    h1 = latent[:, :d_pad] + latent[:, d_pad:] * eps_ref[...]

    # ---- decoder MLP ----
    t = jnp.dot(h1.astype(cdtype), dw1_ref[...], preferred_element_type=jnp.float32)
    t = jnp.maximum(t + db1_ref[...], 0.0).astype(cdtype)
    logits = jnp.dot(t, dw2_ref[...], preferred_element_type=jnp.float32) + db2_ref[...]
    # Explicit sigmoid: exp goes to the EUP, stays in f32.
    p_ref[...] = (1.0 / (1.0 + jnp.exp(-logits))).astype(p_ref.dtype)


# ---------------------------------------------------------------------------
# Launcher (batch-tiled; weights/biases resident in VMEM, revisited per step)
# ---------------------------------------------------------------------------
def _iwae_call(x_p, eps_p, params, d_pad, tile):
    b_pad, img_dim = x_p.shape
    grid = (b_pad // tile,)

    consts = (params["enc_w1"], params["enc_b1"],
              params["enc_w_heads"], params["enc_b_heads"],
              params["dec_w1"], params["dec_b1"],
              params["dec_w2"], params["dec_b2"])

    in_specs = [pl.BlockSpec((tile, img_dim), lambda i: (i, 0)),
                pl.BlockSpec((tile, d_pad), lambda i: (i, 0))]
    # Whole (small) weights / biases: constant block index -> no re-DMA between
    # consecutive grid steps.
    in_specs += [pl.BlockSpec(c.shape, lambda i: (0, 0)) for c in consts]

    out_specs = (pl.BlockSpec((tile, 2 * d_pad), lambda i: (i, 0)),
                 pl.BlockSpec((tile, img_dim), lambda i: (i, 0)))
    out_shape = (jax.ShapeDtypeStruct((b_pad, 2 * d_pad), jnp.float32),
                 jax.ShapeDtypeStruct((b_pad, img_dim), jnp.float32))

    kernel = functools.partial(_iwae_fused_kernel, d_pad=d_pad)
    return pl.pallas_call(
        kernel,
        out_shape=out_shape,
        grid_spec=pltpu.PrefetchScalarGridSpec(
            num_scalar_prefetch=0,
            grid=grid,
            in_specs=in_specs,
            out_specs=out_specs,
        ),
        compiler_params=pltpu.CompilerParams(
            dimension_semantics=("parallel",),
            # Headroom for the 512-row tile + resident weights on v5e's 16 MiB
            # default scoped VMEM; well under v7x's 64 MiB physical per-TC.
            vmem_limit_bytes=48 * 1024 * 1024,
        ),
    )(x_p, eps_p, *consts)


# ---------------------------------------------------------------------------
# Parameter prep (done ONCE, outside the per-call jitted path)
# ---------------------------------------------------------------------------
def prepare_iwae_params(raw, compute_dtype=jnp.bfloat16):
    """Pre-transpose weights to [in, out], fuse + lane-pad the encoder heads
    (each head padded to a 128 multiple so kernel slices are lane-aligned),
    pad the decoder input weight to match, and cast matmul operands to bf16
    (biases stay f32)."""
    d = raw["enc_wmu"].shape[0]
    d_pad = _round_up(d, 128)

    def pad_lanes(w):
        return jnp.pad(w, ((0, 0), (0, d_pad - w.shape[1])))

    w_heads = jnp.concatenate(
        [pad_lanes(raw["enc_wmu"].T), pad_lanes(raw["enc_wls"].T)], axis=1)
    b_heads = jnp.concatenate(
        [jnp.pad(raw["enc_bmu"], (0, d_pad - d)),
         jnp.pad(raw["enc_bls"], (0, d_pad - d))])[None, :]

    dec_w1 = jnp.pad(raw["dec_w1"].T, ((0, d_pad - d), (0, 0)))  # [d_pad, hidden]

    return {
        "enc_w1": raw["enc_w1"].T.astype(compute_dtype),        # [img, hidden]
        "enc_b1": raw["enc_b1"][None, :].astype(jnp.float32),   # [1, hidden]
        "enc_w_heads": w_heads.astype(compute_dtype),           # [hidden, 2*d_pad]
        "enc_b_heads": b_heads.astype(jnp.float32),             # [1, 2*d_pad]
        "dec_w1": dec_w1.astype(compute_dtype),                 # [d_pad, hidden]
        "dec_b1": raw["dec_b1"][None, :].astype(jnp.float32),   # [1, hidden]
        "dec_w2": raw["dec_w2"].T.astype(compute_dtype),        # [hidden, img]
        "dec_b2": raw["dec_b2"][None, :].astype(jnp.float32),   # [1, img]
    }


# ---------------------------------------------------------------------------
# Full IWAE_1 forward: ((h1, mu, sigma, eps), p)
# ---------------------------------------------------------------------------
@functools.partial(jax.jit, static_argnames=("latent_dim", "batch_tile"))
def iwae_forward(x, params, key, *, latent_dim, batch_tile=512):
    compute_dtype = params["enc_w1"].dtype
    img_dim = params["enc_w1"].shape[0]       # dim_image_vars (784)
    d_pad = params["dec_w1"].shape[0]         # lane-padded latent dim
    d = latent_dim

    # Match torch's x.view(-1, 784).
    x = x.reshape(-1, img_dim)
    b = x.shape[0]

    # Largest tile not exceeding the (8-aligned) batch; pad B to the tile so
    # the perf-optimal tile can be used regardless of B.
    tile = _round_up(min(batch_tile, _round_up(b, 8)), 8)
    b_pad = _round_up(b, tile)
    x_p = x if b_pad == b else jnp.pad(x, ((0, b_pad - b), (0, 0)))
    x_p = x_p.astype(compute_dtype)

    # eps ~ N(0,1); only the first `d` lanes are "real", the padded lanes are
    # multiplied by zero decoder rows so they never affect the output.
    eps = jax.random.normal(key, (b_pad, d_pad), jnp.float32)

    latent, p = _iwae_call(x_p, eps, params, d_pad, tile)

    mu = latent[:b, :d]
    sigma = latent[:b, d_pad:d_pad + d]
    eps_out = eps[:b, :d]
    h1 = mu + sigma * eps_out     # identical f32 math to the in-kernel h1
    return (h1, mu, sigma, eps_out), p[:b]


# ---------------------------------------------------------------------------
# Init + pure-JAX f32 reference
# ---------------------------------------------------------------------------
def init_iwae_params(key, dim_h1, dim_image_vars, hidden_dim=400):
    """PyTorch nn.Linear-style init (uniform +-1/sqrt(fan_in))."""
    ks = jax.random.split(key, 10)

    def lin(kw, kb, fan_in, fan_out):
        bound = 1.0 / jnp.sqrt(fan_in)
        w = jax.random.uniform(kw, (fan_out, fan_in), jnp.float32, -bound, bound)
        b = jax.random.uniform(kb, (fan_out,), jnp.float32, -bound, bound)
        return w, b

    enc_w1, enc_b1 = lin(ks[0], ks[1], dim_image_vars, hidden_dim)
    enc_wmu, enc_bmu = lin(ks[2], ks[3], hidden_dim, dim_h1)
    enc_wls, enc_bls = lin(ks[4], ks[5], hidden_dim, dim_h1)
    dec_w1, dec_b1 = lin(ks[6], ks[7], dim_h1, hidden_dim)
    dec_w2, dec_b2 = lin(ks[8], ks[9], hidden_dim, dim_image_vars)
    return {"enc_w1": enc_w1, "enc_b1": enc_b1,
            "enc_wmu": enc_wmu, "enc_bmu": enc_bmu,
            "enc_wls": enc_wls, "enc_bls": enc_bls,
            "dec_w1": dec_w1, "dec_b1": dec_b1,
            "dec_w2": dec_w2, "dec_b2": dec_b2}


def _reference(x, raw, eps):
    h = jnp.maximum(x @ raw["enc_w1"].T + raw["enc_b1"], 0.0)
    mu = h @ raw["enc_wmu"].T + raw["enc_bmu"]
    sigma = jnp.exp(h @ raw["enc_wls"].T + raw["enc_bls"])
    h1 = mu + sigma * eps
    t = jnp.maximum(h1 @ raw["dec_w1"].T + raw["dec_b1"], 0.0)
    p = jax.nn.sigmoid(t @ raw["dec_w2"].T + raw["dec_b2"])
    return (h1, mu, sigma), p


if __name__ == "__main__":
    key = jax.random.PRNGKey(0)
    k_x, k_p, k_eps = jax.random.split(key, 3)

    # Small test shapes consistent with the module: the IWAE forward views the
    # input to 784 features; hidden is fixed at 400; latent dim kept small.
    dim_image_vars, dim_h1, batch = 784, 16, 20   # ragged batch exercises padding

    x = jax.random.uniform(k_x, (batch, dim_image_vars), jnp.float32)  # image-like
    raw = init_iwae_params(k_p, dim_h1, dim_image_vars)
    params = prepare_iwae_params(raw)     # one-time prep (transpose/fuse/pad/bf16)

    (h1, mu, sigma, eps), p = iwae_forward(x, params, k_eps, latent_dim=dim_h1)
    jax.block_until_ready((h1, mu, sigma, eps, p))

    # f32 reference with the same eps (loose tolerance due to bf16 operands).
    (h1_r, mu_r, sigma_r), p_r = _reference(x, raw, eps)
    assert jnp.allclose(mu, mu_r, atol=5e-2, rtol=5e-2)
    assert jnp.allclose(sigma, sigma_r, atol=5e-2, rtol=5e-2)
    assert jnp.allclose(h1, h1_r, atol=5e-2, rtol=5e-2)
    assert jnp.allclose(p, p_r, atol=5e-2, rtol=5e-2)
    print("KERNEL_OK")
</pallas_src>

<mosaic_0001>
module attributes {stable_mosaic.version = 11 : i64} {
  func.func @_iwae_fused_kernel(%arg0: i32, %arg1: memref<24x784xbf16, #tpu.memory_space<vmem>>, %arg2: memref<24x128xf32, #tpu.memory_space<vmem>>, %arg3: memref<784x400xbf16, #tpu.memory_space<vmem>>, %arg4: memref<1x400xf32, #tpu.memory_space<vmem>>, %arg5: memref<400x256xbf16, #tpu.memory_space<vmem>>, %arg6: memref<1x256xf32, #tpu.memory_space<vmem>>, %arg7: memref<128x400xbf16, #tpu.memory_space<vmem>>, %arg8: memref<1x400xf32, #tpu.memory_space<vmem>>, %arg9: memref<400x784xbf16, #tpu.memory_space<vmem>>, %arg10: memref<1x784xf32, #tpu.memory_space<vmem>>, %arg11: memref<24x256xf32, #tpu.memory_space<vmem>>, %arg12: memref<24x784xf32, #tpu.memory_space<vmem>>) attributes {dimension_semantics = [#tpu.dimension_semantics<parallel>], iteration_bounds = array<i64: 1>, scalar_prefetch = 0 : i64, scratch_operands = 0 : i64, tpu.core_type = #tpu.core_type<tc>, window_params = [{transform_indices = @transform_0, window_bounds = array<i64: 24, 784>}, {transform_indices = @transform_1, window_bounds = array<i64: 24, 128>}, {pipeline_mode = #tpu.pipeline_mode<synchronous>, transform_indices = @transform_2, window_bounds = array<i64: 784, 400>}, {pipeline_mode = #tpu.pipeline_mode<synchronous>, transform_indices = @transform_3, window_bounds = array<i64: 1, 400>}, {pipeline_mode = #tpu.pipeline_mode<synchronous>, transform_indices = @transform_4, window_bounds = array<i64: 400, 256>}, {pipeline_mode = #tpu.pipeline_mode<synchronous>, transform_indices = @transform_5, window_bounds = array<i64: 1, 256>}, {pipeline_mode = #tpu.pipeline_mode<synchronous>, transform_indices = @transform_6, window_bounds = array<i64: 128, 400>}, {pipeline_mode = #tpu.pipeline_mode<synchronous>, transform_indices = @transform_7, window_bounds = array<i64: 1, 400>}, {pipeline_mode = #tpu.pipeline_mode<synchronous>, transform_indices = @transform_8, window_bounds = array<i64: 400, 784>}, {pipeline_mode = #tpu.pipeline_mode<synchronous>, transform_indices = @transform_9, window_bounds = array<i64: 1, 784>}, {transform_indices = @transform_10, window_bounds = array<i64: 24, 256>}, {transform_indices = @transform_11, window_bounds = array<i64: 24, 784>}]} {
    %c0 = arith.constant 0 : index
    %c0_0 = arith.constant 0 : index
    %0 = vector.load %arg1[%c0, %c0_0] : memref<24x784xbf16, #tpu.memory_space<vmem>>, vector<24x784xbf16>
    %c0_1 = arith.constant 0 : index
    %c0_2 = arith.constant 0 : index
    %1 = vector.load %arg3[%c0_1, %c0_2] : memref<784x400xbf16, #tpu.memory_space<vmem>>, vector<784x400xbf16>
    %cst = arith.constant dense<0.000000e+00> : vector<24x400xf32>
    %2 = tpu.matmul %0, %1, %cst {dimension_numbers = #tpu.dot_dimension_numbers<[1], [0], [0], [1], [0, 0, 1, 1], [], []>} : vector<24x784xbf16>, vector<784x400xbf16>, vector<24x400xf32> -> vector<24x400xf32>
    %c0_3 = arith.constant 0 : index
    %c0_4 = arith.constant 0 : index
    %3 = vector.load %arg4[%c0_3, %c0_4] : memref<1x400xf32, #tpu.memory_space<vmem>>, vector<1x400xf32>
    %4 = vector.broadcast %3 : vector<1x400xf32> to vector<24x400xf32>
    %5 = arith.addf %2, %4 : vector<24x400xf32>
    %cst_5 = arith.constant 0.000000e+00 : f32
    %6 = vector.broadcast %cst_5 : f32 to vector<24x400xf32>
    %7 = arith.maximumf %5, %6 : vector<24x400xf32>
    %8 = arith.truncf %7 : vector<24x400xf32> to vector<24x400xbf16>
    %c0_6 = arith.constant 0 : index
    %c0_7 = arith.constant 0 : index
    %9 = vector.load %arg5[%c0_6, %c0_7] : memref<400x256xbf16, #tpu.memory_space<vmem>>, vector<400x256xbf16>
    %cst_8 = arith.constant dense<0.000000e+00> : vector<24x256xf32>
    %10 = tpu.matmul %8, %9, %cst_8 {dimension_numbers = #tpu.dot_dimension_numbers<[1], [0], [0], [1], [0, 0, 1, 1], [], []>} : vector<24x400xbf16>, vector<400x256xbf16>, vector<24x256xf32> -> vector<24x256xf32>
    %c0_9 = arith.constant 0 : index
    %c0_10 = arith.constant 0 : index
    %11 = vector.load %arg6[%c0_9, %c0_10] : memref<1x256xf32, #tpu.memory_space<vmem>>, vector<1x256xf32>
    %12 = vector.broadcast %11 : vector<1x256xf32> to vector<24x256xf32>
    %13 = arith.addf %10, %12 : vector<24x256xf32>
    %14 = tpu.iota {dimensions = array<i32: 1>} : vector<24x256xi32>
    %c128_i32 = arith.constant 128 : i32
    %15 = vector.broadcast %c128_i32 : i32 to vector<24x256xi32>
    %16 = arith.cmpi slt, %14, %15 : vector<24x256xi32>
    %17 = math.exp %13 : vector<24x256xf32>
    %18 = arith.select %16, %13, %17 : vector<24x256xi1>, vector<24x256xf32>
    %c0_11 = arith.constant 0 : index
    %c0_12 = arith.constant 0 : index
    %19 = vector.load %arg11[%c0_11, %c0_12] : memref<24x256xf32, #tpu.memory_space<vmem>>, vector<24x256xf32>
    tpu.vector_store %arg11[%c0_11, %c0_12], %18 {strides = array<i32>} : memref<24x256xf32, #tpu.memory_space<vmem>>, vector<24x256xf32>,
    %20 = vector.extract_strided_slice %18 {offsets = [0, 0], sizes = [24, 128], strides = [1, 1]} : vector<24x256xf32> to vector<24x128xf32>
    %21 = vector.extract_strided_slice %18 {offsets = [0, 128], sizes = [24, 128], strides = [1, 1]} : vector<24x256xf32> to vector<24x128xf32>
    %c0_13 = arith.constant 0 : index
    %c0_14 = arith.constant 0 : index
    %22 = vector.load %arg2[%c0_13, %c0_14] : memref<24x128xf32, #tpu.memory_space<vmem>>, vector<24x128xf32>
    %23 = arith.mulf %21, %22 : vector<24x128xf32>
    %24 = arith.addf %20, %23 : vector<24x128xf32>
    %25 = arith.truncf %24 : vector<24x128xf32> to vector<24x128xbf16>
    %c0_15 = arith.constant 0 : index
    %c0_16 = arith.constant 0 : index
    %26 = vector.load %arg7[%c0_15, %c0_16] : memref<128x400xbf16, #tpu.memory_space<vmem>>, vector<128x400xbf16>
    %cst_17 = arith.constant dense<0.000000e+00> : vector<24x400xf32>
    %27 = tpu.matmul %25, %26, %cst_17 {dimension_numbers = #tpu.dot_dimension_numbers<[1], [0], [0], [1], [0, 0, 1, 1], [], []>} : vector<24x128xbf16>, vector<128x400xbf16>, vector<24x400xf32> -> vector<24x400xf32>
    %c0_18 = arith.constant 0 : index
    %c0_19 = arith.constant 0 : index
    %28 = vector.load %arg8[%c0_18, %c0_19] : memref<1x400xf32, #tpu.memory_space<vmem>>, vector<1x400xf32>
    %29 = vector.broadcast %28 : vector<1x400xf32> to vector<24x400xf32>
    %30 = arith.addf %27, %29 : vector<24x400xf32>
    %cst_20 = arith.constant 0.000000e+00 : f32
    %31 = vector.broadcast %cst_20 : f32 to vector<24x400xf32>
    %32 = arith.maximumf %30, %31 : vector<24x400xf32>
    %33 = arith.truncf %32 : vector<24x400xf32> to vector<24x400xbf16>
    %c0_21 = arith.constant 0 : index
    %c0_22 = arith.constant 0 : index
    %34 = vector.load %arg9[%c0_21, %c0_22] : memref<400x784xbf16, #tpu.memory_space<vmem>>, vector<400x784xbf16>
    %cst_23 = arith.constant dense<0.000000e+00> : vector<24x784xf32>
    %35 = tpu.matmul %33, %34, %cst_23 {dimension_numbers = #tpu.dot_dimension_numbers<[1], [0], [0], [1], [0, 0, 1, 1], [], []>} : vector<24x400xbf16>, vector<400x784xbf16>, vector<24x784xf32> -> vector<24x784xf32>
    %c0_24 = arith.constant 0 : index
    %c0_25 = arith.constant 0 : index
    %36 = vector.load %arg10[%c0_24, %c0_25] : memref<1x784xf32, #tpu.memory_space<vmem>>, vector<1x784xf32>
    %37 = vector.broadcast %36 : vector<1x784xf32> to vector<24x784xf32>
    %38 = arith.addf %35, %37 : vector<24x784xf32>
    %cst_26 = arith.constant 0.000000e+00 : f32
    %39 = vector.broadcast %cst_26 : f32 to vector<24x784xf32>
    %40 = arith.subf %39, %38 : vector<24x784xf32>
    %41 = math.exp %40 : vector<24x784xf32>
    %cst_27 = arith.constant 1.000000e+00 : f32
    %42 = vector.broadcast %cst_27 : f32 to vector<24x784xf32>
    %43 = arith.addf %42, %41 : vector<24x784xf32>
    %cst_28 = arith.constant 1.000000e+00 : f32
    %44 = vector.broadcast %cst_28 : f32 to vector<24x784xf32>
    %45 = arith.divf %44, %43 : vector<24x784xf32>
    %c0_29 = arith.constant 0 : index
    %c0_30 = arith.constant 0 : index
    %46 = vector.load %arg12[%c0_29, %c0_30] : memref<24x784xf32, #tpu.memory_space<vmem>>, vector<24x784xf32>
    tpu.vector_store %arg12[%c0_29, %c0_30], %45 {strides = array<i32>} : memref<24x784xf32, #tpu.memory_space<vmem>>, vector<24x784xf32>,
    return
  }
  func.func @transform_0(%arg0: i32) -> (i32, i32) {
    %c0_i32 = arith.constant 0 : i32
    %c0_i32_0 = arith.constant 0 : i32
    return %arg0, %c0_i32 : i32, i32
  }
  func.func @transform_1(%arg0: i32) -> (i32, i32) {
    %c0_i32 = arith.constant 0 : i32
    %c0_i32_0 = arith.constant 0 : i32
    return %arg0, %c0_i32 : i32, i32
  }
  func.func @transform_2(%arg0: i32) -> (i32, i32) {
    %c0_i32 = arith.constant 0 : i32
    %c0_i32_0 = arith.constant 0 : i32
    %c0_i32_1 = arith.constant 0 : i32
    return %c0_i32, %c0_i32_0 : i32, i32
  }
  func.func @transform_3(%arg0: i32) -> (i32, i32) {
    %c0_i32 = arith.constant 0 : i32
    %c0_i32_0 = arith.constant 0 : i32
    %c0_i32_1 = arith.constant 0 : i32
    return %c0_i32, %c0_i32_0 : i32, i32
  }
  func.func @transform_4(%arg0: i32) -> (i32, i32) {
    %c0_i32 = arith.constant 0 : i32
    %c0_i32_0 = arith.constant 0 : i32
    %c0_i32_1 = arith.constant 0 : i32
    return %c0_i32, %c0_i32_0 : i32, i32
  }
  func.func @transform_5(%arg0: i32) -> (i32, i32) {
    %c0_i32 = arith.constant 0 : i32
    %c0_i32_0 = arith.constant 0 : i32
    %c0_i32_1 = arith.constant 0 : i32
    return %c0_i32, %c0_i32_0 : i32, i32
  }
  func.func @transform_6(%arg0: i32) -> (i32, i32) {
    %c0_i32 = arith.constant 0 : i32
    %c0_i32_0 = arith.constant 0 : i32
    %c0_i32_1 = arith.constant 0 : i32
    return %c0_i32, %c0_i32_0 : i32, i32
  }
  func.func @transform_7(%arg0: i32) -> (i32, i32) {
    %c0_i32 = arith.constant 0 : i32
    %c0_i32_0 = arith.constant 0 : i32
    %c0_i32_1 = arith.constant 0 : i32
    return %c0_i32, %c0_i32_0 : i32, i32
  }
  func.func @transform_8(%arg0: i32) -> (i32, i32) {
    %c0_i32 = arith.constant 0 : i32
    %c0_i32_0 = arith.constant 0 : i32
    %c0_i32_1 = arith.constant 0 : i32
    return %c0_i32, %c0_i32_0 : i32, i32
  }
  func.func @transform_9(%arg0: i32) -> (i32, i32) {
    %c0_i32 = arith.constant 0 : i32
    %c0_i32_0 = arith.constant 0 : i32
    %c0_i32_1 = arith.constant 0 : i32
    return %c0_i32, %c0_i32_0 : i32, i32
  }
  func.func @transform_10(%arg0: i32) -> (i32, i32) {
    %c0_i32 = arith.constant 0 : i32
    %c0_i32_0 = arith.constant 0 : i32
    return %arg0, %c0_i32 : i32, i32
  }
  func.func @transform_11(%arg0: i32) -> (i32, i32) {
    %c0_i32 = arith.constant 0 : i32
    %c0_i32_0 = arith.constant 0 : i32
    return %arg0, %c0_i32 : i32, i32
  }
}

</mosaic_0001>

<bundles_post_ra>
// kernel: iwae_forward.1
= control target key start
LH: loop header
LB: loop body
LE: loop exit
PB: predicated region body
PF: predicated region fallthrough
CT: control target
= control target key end

     0   :  { %vm1296_vm0 = vcmask 130048   ;;  %s10431_s0 = inlined_call_operand.vmem [shape: bf16[24,784], index: 0, kind: input, shape index: {}]   ;;  %s10432_s1 = inlined_call_operand.vmem [shape: f32[24,128], index: 1, kind: input, shape index: {}]   ;;  %s10433_s2 = inlined_call_operand.vmem [shape: bf16[784,400], index: 2, kind: input, shape index: {}]   ;;  %s10434_s3 = inlined_call_operand.vmem [shape: f32[1,400], index: 3, kind: input, shape index: {}]   ;;  %s10435_s4 = inlined_call_operand.vmem [shape: bf16[400,256], index: 4, kind: input, shape index: {}]   ;;  %s10436_s5 = inlined_call_operand.vmem [shape: f32[1,256], index: 5, kind: input, shape index: {}]   ;;  %s10437_s6 = inlined_call_operand.vmem [shape: bf16[128,400], index: 6, kind: input, shape index: {}]   ;;  %s10438_s7 = inlined_call_operand.vmem [shape: f32[1,400], index: 7, kind: input, shape index: {}]   ;;  %s10439_s8 = inlined_call_operand.vmem [shape: bf16[400,784], index: 8, kind: input, shape index: {}]   ;;  %s10440_s9 = inlined_call_operand.vmem [shape: f32[1,784], index: 9, kind: input, shape index: {}]   ;;  %s10441_s10 = inlined_call_operand.vmem [shape: f32[24,256], index: 10, kind: output, shape index: {0}]   ;;  %s10442_s11 = inlined_call_operand.hbm [shape: f32[24,784], index: 11, kind: output, shape index: {1}]  }
   0x1   :  { %v4827_v0 = vld [vmem:[%s10433_s2 + $0xe0] sm:$0xf]  ;;  %v6588_v1 = vld [vmem:[%s10433_s2 + $0xec] sm:$0xf0] }
   0x2   :  { %v4955_v2 = vld [vmem:[%s10433_s2 + $0x1e0] sm:$0xf]  ;;  %v4828_v3 = vor.u32 %v6588_v1, %v4827_v0  ;;  %v6620_v4 = vld [vmem:[%s10433_s2 + $0x1ec] sm:$0xf0] }
   0x3   :  { %v5083_v5 = vld [vmem:[%s10433_s2 + $0x2e0] sm:$0xf]  ;;  %v6652_v6 = vld [vmem:[%s10433_s2 + $0x2ec] sm:$0xf0]  ;;  %v4956_v7 = vor.u32 %v6620_v4, %v4955_v2 }
   0x4   :  { %v5084_v8 = vor.u32 %v6652_v6, %v5083_v5  ;;  %v5211_v9 = vld [vmem:[%s10433_s2 + $0x3e0] sm:$0xf]  ;;  %v6684_v10 = vld [vmem:[%s10433_s2 + $0x3ec] sm:$0xf0]  ;;  %1303 = vmatpush.bf16.msra.mxu0 %v4828_v3 }
   0x5   :  { %v4811_v11 = vld [vmem:[%s10433_s2 + $0xc0] sm:$0xf]  ;;  %v5212_v12 = vor.u32 %v6684_v10, %v5211_v9  ;;  %v6584_v13 = vld [vmem:[%s10433_s2 + $0xcc] sm:$0xf0]  ;;  %1321 = vmatpush.bf16.msra.mxu1 %v4956_v7 }
   0x6   :  { %v4939_v14 = vld [vmem:[%s10433_s2 + $0x1c0] sm:$0xf]  ;;  %v6616_v15 = vld [vmem:[%s10433_s2 + $0x1cc] sm:$0xf0]  ;;  %1339 = vmatpush.bf16.msra.mxu2 %v5084_v8  ;;  %v4812_v16 = vor.u32 %v6584_v13, %v4811_v11 }
   0x7   :  { %v4940_v17 = vor.u32 %v6616_v15, %v4939_v14  ;;  %v5067_v18 = vld [vmem:[%s10433_s2 + $0x2c0] sm:$0xf]  ;;  %v6648_v19 = vld [vmem:[%s10433_s2 + $0x2cc] sm:$0xf0]  ;;  %1357 = vmatpush.bf16.msra.mxu3 %v5212_v12 }
   0x8   :  { %v5195_v20 = vld [vmem:[%s10433_s2 + $0x3c0] sm:$0xf]  ;;  %v5068_v21 = vor.u32 %v6648_v19, %v5067_v18  ;;  %v6680_v22 = vld [vmem:[%s10433_s2 + $0x3cc] sm:$0xf0]  ;;  %1304 = vmatpush.bf16.msra.mxu0 %v4812_v16 }
   0x9   :  { %v4795_v23 = vld [vmem:[%s10433_s2 + $0xa0] sm:$0xf]  ;;  %v6580_v24 = vld [vmem:[%s10433_s2 + $0xac] sm:$0xf0]  ;;  %v5196_v25 = vor.u32 %v6680_v22, %v5195_v20  ;;  %1322 = vmatpush.bf16.msra.mxu1 %v4940_v17 }
   0xa   :  { %v4923_v26 = vld [vmem:[%s10433_s2 + $0x1a0] sm:$0xf]  ;;  %v6612_v27 = vld [vmem:[%s10433_s2 + $0x1ac] sm:$0xf0]  ;;  %v4796_v29 = vor.u32 %v6580_v24, %v4795_v23  ;;  %1340 = vmatpush.bf16.msra.mxu2 %v5068_v21 }
   0xb   :  { %v5051_v28 = vld [vmem:[%s10433_s2 + $0x2a0] sm:$0xf]  ;;  %v6644_v30 = vld [vmem:[%s10433_s2 + $0x2ac] sm:$0xf0]  ;;  %v4924_v33 = vor.u32 %v6612_v27, %v4923_v26  ;;  %1358 = vmatpush.bf16.msra.mxu3 %v5196_v25 }
   0xc   :  { %v5179_v31 = vld [vmem:[%s10433_s2 + $0x3a0] sm:$0xf]  ;;  %v6676_v32 = vld [vmem:[%s10433_s2 + $0x3ac] sm:$0xf0]  ;;  %v5052_v34 = vor.u32 %v6644_v30, %v5051_v28  ;;  %1305 = vmatpush.bf16.msra.mxu0 %v4796_v29  ;;  %v6554_v29 = vld [vmem:[%s10431_s0 + $0x18] sm:$0xf0] }
   0xd   :  { %v4779_v35 = vld [vmem:[%s10433_s2 + $0x80] sm:$0xf]  ;;  %v6576_v36 = vld [vmem:[%s10433_s2 + $0x8c] sm:$0xf0]  ;;  %v5180_v38 = vor.u32 %v6676_v32, %v5179_v31  ;;  %1323 = vmatpush.bf16.msra.mxu1 %v4924_v33  ;;  %v6551_v30 = vld [vmem:[%s10431_s0 + $0x4] sm:$0xf] }
   0xe   :  { %v4907_v37 = vld [vmem:[%s10433_s2 + $0x180] sm:$0xf]  ;;  %v6608_v39 = vld [vmem:[%s10433_s2 + $0x18c] sm:$0xf0]  ;;  %v4780_v44 = vor.u32 %v6576_v36, %v4779_v35  ;;  %1341 = vmatpush.bf16.msra.mxu2 %v5052_v34 }
   0xf   :  { %v5035_v40 = vld [vmem:[%s10433_s2 + $0x280] sm:$0xf]  ;;  %v6640_v41 = vld [vmem:[%s10433_s2 + $0x28c] sm:$0xf0]  ;;  %v4908_v45 = vor.u32 %v6608_v39, %v4907_v37  ;;  %1359 = vmatpush.bf16.msra.mxu3 %v5180_v38  ;;  %v4695_v39 = vld [vmem:[%s10431_s0 + $0x8] sm:$0xf] }
  0x10   :  { %v5163_v42 = vld [vmem:[%s10433_s2 + $0x380] sm:$0xf]  ;;  %v6672_v43 = vld [vmem:[%s10433_s2 + $0x38c] sm:$0xf0]  ;;  %v5036_v46 = vor.u32 %v6640_v41, %v5035_v40  ;;  %1306 = vmatpush.bf16.msra.mxu0 %v4780_v44  ;;  %v6555_v40 = vld [vmem:[%s10431_s0 + $0x20] sm:$0xf0] }
  0x11   :  { %v4763_v47 = vld [vmem:[%s10433_s2 + $0x60] sm:$0xf]  ;;  %v6572_v48 = vld [vmem:[%s10433_s2 + $0x6c] sm:$0xf0]  ;;  %v5164_v50 = vor.u32 %v6672_v43, %v5163_v42  ;;  %1324 = vmatpush.bf16.msra.mxu1 %v4908_v45  ;;  %v6552_v41 = vld [vmem:[%s10431_s0 + $0xc] sm:$0xf] }
  0x12   :  { %v4891_v49 = vld [vmem:[%s10433_s2 + $0x160] sm:$0xf]  ;;  %v6604_v51 = vld [vmem:[%s10433_s2 + $0x16c] sm:$0xf0]  ;;  %v4764_v56 = vor.u32 %v6572_v48, %v4763_v47  ;;  %1342 = vmatpush.bf16.msra.mxu2 %v5036_v46  ;;  %v4697_v43 = vld [vmem:[%s10431_s0 + $0x24] sm:$0xf0] }
  0x13   :  { %v5019_v52 = vld [vmem:[%s10433_s2 + $0x260] sm:$0xf]  ;;  %v6636_v53 = vld [vmem:[%s10433_s2 + $0x26c] sm:$0xf0]  ;;  %v4892_v57 = vor.u32 %v6604_v51, %v4891_v49  ;;  %1360 = vmatpush.bf16.msra.mxu3 %v5164_v50  ;;  %v6586_v49 = vld [vmem:[%s10433_s2 + $0xe4] sm:$0xf] }
  0x14   :  { %v5147_v54 = vld [vmem:[%s10433_s2 + $0x360] sm:$0xf]  ;;  %v6668_v55 = vld [vmem:[%s10433_s2 + $0x36c] sm:$0xf0]  ;;  %v5020_v58 = vor.u32 %v6636_v53, %v5019_v52  ;;  %1307 = vmatpush.bf16.msra.mxu0 %v4764_v56  ;;  %v4829_v50 = vld [vmem:[%s10433_s2 + $0xf0] sm:$0xf0]  ;;  %v7439_v52 = vor.u32 %v6555_v40, %v4695_v39 }
  0x15   :  { %v4747_v59 = vld [vmem:[%s10433_s2 + $0x40] sm:$0xf]  ;;  %v6568_v60 = vld [vmem:[%s10433_s2 + $0x4c] sm:$0xf0]  ;;  %v5148_v62 = vor.u32 %v6668_v55, %v5147_v54  ;;  %1325 = vmatpush.bf16.msra.mxu1 %v4892_v57  ;;  %v7447_v55 = vor.u32 %v6552_v41, %v4697_v43  ;;  %v4832_v57 = vor.u32 %v6586_v49, %v4829_v50 }
  0x16   :  { %v4875_v61 = vld [vmem:[%s10433_s2 + $0x140] sm:$0xf]  ;;  %v6600_v63 = vld [vmem:[%s10433_s2 + $0x14c] sm:$0xf0]  ;;  %v4748_v4 = vor.u32 %v6568_v60, %v4747_v59  ;;  %1343 = vmatpush.bf16.msra.mxu2 %v5020_v58 }
  0x17   :  { %v5003_v0 = vld [vmem:[%s10433_s2 + $0x240] sm:$0xf]  ;;  %v6632_v1 = vld [vmem:[%s10433_s2 + $0x24c] sm:$0xf0]  ;;  %v4876_v5 = vor.u32 %v6600_v63, %v4875_v61  ;;  %1361 = vmatpush.bf16.msra.mxu3 %v5148_v62  ;;  %v6582_v61 = vld [vmem:[%s10433_s2 + $0xc4] sm:$0xf] }
  0x18   :  { %v5131_v2 = vld [vmem:[%s10433_s2 + $0x340] sm:$0xf]  ;;  %v6664_v3 = vld [vmem:[%s10433_s2 + $0x34c] sm:$0xf0]  ;;  %v5004_v6 = vor.u32 %v6632_v1, %v5003_v0  ;;  %1308 = vmatpush.bf16.msra.mxu0 %v4748_v4  ;;  %v4813_v62 = vld [vmem:[%s10433_s2 + $0xd0] sm:$0xf0] }
  0x19   :  { %v4731_v7 = vld [vmem:[%s10433_s2 + $0x20] sm:$0xf]  ;;  %v6564_v8 = vld [vmem:[%s10433_s2 + $0x2c] sm:$0xf0]  ;;  %v5132_v10 = vor.u32 %v6664_v3, %v5131_v2  ;;  %1326 = vmatpush.bf16.msra.mxu1 %v4876_v5  ;;  %v4816_v2 = vor.u32 %v6582_v61, %v4813_v62 }
  0x1a   :  { %v4859_v9 = vld [vmem:[%s10433_s2 + $0x120] sm:$0xf]  ;;  %v6596_v11 = vld [vmem:[%s10433_s2 + $0x12c] sm:$0xf0]  ;;  %v4732_v17 = vor.u32 %v6564_v8, %v4731_v7  ;;  %1344 = vmatpush.bf16.msra.mxu2 %v5004_v6  ;;  %v6578_v6 = vld [vmem:[%s10433_s2 + $0xa4] sm:$0xf] }
  0x1b   :  { %v4987_v12 = vld [vmem:[%s10433_s2 + $0x220] sm:$0xf]  ;;  %v6628_v13 = vld [vmem:[%s10433_s2 + $0x22c] sm:$0xf0]  ;;  %v4860_v21 = vor.u32 %v6596_v11, %v4859_v9  ;;  %1362 = vmatpush.bf16.msra.mxu3 %v5132_v10  ;;  %v4797_v7 = vld [vmem:[%s10433_s2 + $0xb0] sm:$0xf0] }
  0x1c   :  { %v5115_v14 = vld [vmem:[%s10433_s2 + $0x320] sm:$0xf]  ;;  %v6660_v15 = vld [vmem:[%s10433_s2 + $0x32c] sm:$0xf0]  ;;  %v4988_v22 = vor.u32 %v6628_v13, %v4987_v12  ;;  %1309 = vmatpush.bf16.msra.mxu0 %v4732_v17  ;;  %v47_v10 = vld [vmem:[%s10431_s0 + $0x38] sm:$0xff]  ;;  %v4800_v13 = vor.u32 %v6578_v6, %v4797_v7 }
  0x1d   :  { %v4715_v16 = vld [vmem:[%s10433_s2] sm:$0xf]  ;;  %v6560_v18 = vld [vmem:[%s10433_s2 + $0xc] sm:$0xf0]  ;;  %v5116_v26 = vor.u32 %v6660_v15, %v5115_v14  ;;  %1327 = vmatpush.bf16.msra.mxu1 %v4860_v21  ;;  %v6574_v17 = vld [vmem:[%s10433_s2 + $0x84] sm:$0xf] }
  0x1e   :  { %v4843_v19 = vld [vmem:[%s10433_s2 + $0x100] sm:$0xf]  ;;  %v6592_v20 = vld [vmem:[%s10433_s2 + $0x10c] sm:$0xf0]  ;;  %v4716_v33 = vor.u32 %v6560_v18, %v4715_v16  ;;  %1345 = vmatpush.bf16.msra.mxu2 %v4988_v22  ;;  %v4781_v18 = vld [vmem:[%s10433_s2 + $0x90] sm:$0xf0] }
  0x1f   :  { %v4971_v23 = vld [vmem:[%s10433_s2 + $0x200] sm:$0xf]  ;;  %v6624_v24 = vld [vmem:[%s10433_s2 + $0x20c] sm:$0xf0]  ;;  %v4844_v37 = vor.u32 %v6592_v20, %v4843_v19  ;;  %1363 = vmatpush.bf16.msra.mxu3 %v5116_v26  ;;  %v283_v19 = vunpack.c.l.b16 %v47_v10  ;;  %v284_v20 = vunpack.c.h.b16 %v47_v10  ;;  %v5085_v10 = vld [vmem:[%s10433_s2 + $0x2f0] sm:$0xf0] }
  0x20   :  { %v5099_v25 = vld [vmem:[%s10433_s2 + $0x300] sm:$0xf]  ;;  %v6656_v27 = vld [vmem:[%s10433_s2 + $0x30c] sm:$0xf0]  ;;  %v4972_v38 = vor.u32 %v6624_v24, %v4971_v23  ;;  %1310 = vmatpush.bf16.msra.mxu0 %v4716_v33  ;;  %v6682_v24 = vld [vmem:[%s10433_s2 + $0x3e4] sm:$0xf] }
  0x21   :  { %v4687_v28 = vld [vmem:[%s10431_s0] sm:$0xf]  ;;  %v6752_v32 = vld [vmem:[%s10433_s2 + $0x60c] sm:$0xf0]  ;;  %v5100_v42 = vor.u32 %v6656_v27, %v5099_v25  ;;  %1328 = vmatpush.bf16.msra.mxu1 %v4844_v37  ;;  %v5213_v27 = vld [vmem:[%s10433_s2 + $0x3f0] sm:$0xf0]  ;;  %v7528_v33 = vpack.c.b16 %v283_v19, %v283_v19 }
  0x22   :  { %v5483_v31 = vld [vmem:[%s10433_s2 + $0x600] sm:$0xf]  ;;  %v6748_v36 = vld [vmem:[%s10433_s2 + $0x5ec] sm:$0xf0]  ;;  %v7429_v47 = vor.u32 %v6554_v29, %v4687_v28  ;;  %1346 = vmatpush.bf16.msra.mxu2 %v4972_v38  ;;  %v4784_v28 = vor.u32 %v6574_v17, %v4781_v18  ;;  %v5197_v37 = vld [vmem:[%s10433_s2 + $0x3d0] sm:$0xf0]  ;;  %v7539_v38 = vpack.c.b16 %v284_v20, %v284_v20 }
  0x23   :  { %v4689_v34 = vld [vmem:[%s10431_s0 + $0x1c] sm:$0xf0]  ;;  %v5484_v44 = vor.u32 %v6752_v32, %v5483_v31  ;;  %v6716_v46 = vld [vmem:[%s10433_s2 + $0x4ec] sm:$0xf0]  ;;  %1364 = vmatpush.bf16.msra.mxu3 %v5100_v42  ;;  %v6570_v31 = vld [vmem:[%s10433_s2 + $0x64] sm:$0xf]  ;;  %v5216_v32 = vor.u32 %v6682_v24, %v5213_v27 }
  0x24   :  { %v5467_v35 = vld [vmem:[%s10433_s2 + $0x5e0] sm:$0xf]  ;;  %v7437_v51 = vor.u32 %v6551_v30, %v4689_v34  ;;  %v6744_v54 = vld [vmem:[%s10433_s2 + $0x5cc] sm:$0xf0]  ;;  %1311 = vmatmul.bf16.vlgmr.msra.gmra.mxu0 %v7429_v47  ;;  %v6556_v18 = vld [vmem:[%s10431_s0 + $0x28] sm:$0xf0] }
  0x25   :  { %v5339_v45 = vld [vmem:[%s10433_s2 + $0x4e0] sm:$0xf]  ;;  %v5468_v48 = vor.u32 %v6748_v36, %v5467_v35  ;;  %v6712_v59 = vld [vmem:[%s10433_s2 + $0x4cc] sm:$0xf0]  ;;  %1347 = vmatmul.bf16.vlgmr.msra.gmra.mxu2 %v7439_v52  ;;  %v4765_v35 = vld [vmem:[%s10433_s2 + $0x70] sm:$0xf0] }
  0x26   :  { %v5451_v53 = vld [vmem:[%s10433_s2 + $0x5c0] sm:$0xf]  ;;  %v5340_v56 = vor.u32 %v6716_v46, %v5339_v45  ;;  %1418 = vmatpush.bf16.msrb.mxu2 %v5484_v44  ;;  %1329 = vmatmul.bf16.vlgmr.msra.gmra.mxu1 %v7437_v51  ;;  %v6740_v0 = vld [vmem:[%s10433_s2 + $0x5ac] sm:$0xf0]  ;;  %v6678_v36 = vld [vmem:[%s10433_s2 + $0x3c4] sm:$0xf]  ;;  %v4768_v44 = vor.u32 %v6570_v31, %v4765_v35 }
  0x27   :  { %v5323_v58 = vld [vmem:[%s10433_s2 + $0x4c0] sm:$0xf]  ;;  %1393 = vmatpush.bf16.msrb.mxu1 %v5468_v48  ;;  %v5452_v60 = vor.u32 %v6744_v54, %v5451_v53  ;;  %1365 = vmatmul.bf16.vlgmr.msra.gmra.mxu3 %v7447_v55  ;;  %v6708_v4 = vld [vmem:[%s10433_s2 + $0x4ac] sm:$0xf0]  ;;  %v6566_v48 = vld [vmem:[%s10433_s2 + $0x44] sm:$0xf]  ;;  %v5200_v49 = vor.u32 %v6678_v36, %v5197_v37 }
  0x28   :  { %v5435_v63 = vld [vmem:[%s10433_s2 + $0x5a0] sm:$0xf]  ;;  %1375 = vmatpush.bf16.msrb.mxu0 %v5340_v56  ;;  %v5324_v1 = vor.u32 %v6712_v59, %v5323_v58  ;;  %1429 = vmatpush.bf16.msrb.mxu3 %v4832_v57  ;;  %v6736_v9 = vld [vmem:[%s10433_s2 + $0x58c] sm:$0xf0]  ;;  %v4749_v53 = vld [vmem:[%s10433_s2 + $0x50] sm:$0xf0] }
  0x29   :  { %v5307_v3 = vld [vmem:[%s10433_s2 + $0x4a0] sm:$0xf]  ;;  %v5436_v5 = vor.u32 %v6740_v0, %v5435_v63  ;;  %v6704_v15 = vld [vmem:[%s10433_s2 + $0x48c] sm:$0xf0]  ;;  %v6674_v54 = vld [vmem:[%s10433_s2 + $0x3a4] sm:$0xf] }
  0x2a   :  { %v5419_v8 = vld [vmem:[%s10433_s2 + $0x580] sm:$0xf]  ;;  %v5308_v11 = vor.u32 %v6708_v4, %v5307_v3  ;;  %v6732_v23 = vld [vmem:[%s10433_s2 + $0x56c] sm:$0xf0]  ;;  %1483 = vmatpush.bf16.msra.mxu2 %v5216_v32  ;;  %v5181_v56 = vld [vmem:[%s10433_s2 + $0x3b0] sm:$0xf0] }
  0x2b   :  { %1394 = vmatpush.bf16.msrb.mxu1 %v5452_v60  ;;  %v48_v12 = vld [vmem:[%s10431_s0 + $0x40] sm:$0xff]  ;;  %v5420_v16 = vor.u32 %v6736_v9, %v5419_v8  ;;  %v6700_v30 = vld [vmem:[%s10433_s2 + $0x46c] sm:$0xf0]  ;;  %v4752_v60 = vor.u32 %v6566_v48, %v4749_v53  ;;  %v5184_v0 = vor.u32 %v6674_v54, %v5181_v56  ;;  %v5165_v4 = vld [vmem:[%s10433_s2 + $0x390] sm:$0xf0] }
  0x2c   :  { %1376 = vmatpush.bf16.msrb.mxu0 %v5324_v1  ;;  %1430 = vmatpush.bf16.msrb.mxu3 %v4816_v2  ;;  %v5291_v14 = vld [vmem:[%s10433_s2 + $0x480] sm:$0xf]  ;;  %v285_v21 = vunpack.c.l.b16 %v48_v12  ;;  %v286_v26 = vunpack.c.h.b16 %v48_v12  ;;  %v6728_v41 = vld [vmem:[%s10433_s2 + $0x54c] sm:$0xf0]  ;;  %v6562_v63 = vld [vmem:[%s10433_s2 + $0x24] sm:$0xf] }
  0x2d   :  { %v5403_v22 = vld [vmem:[%s10433_s2 + $0x560] sm:$0xf]  ;;  %v5292_v25 = vor.u32 %v6704_v15, %v5291_v14  ;;  %v6696_v46 = vld [vmem:[%s10433_s2 + $0x44c] sm:$0xf0]  ;;  %v4733_v2 = vld [vmem:[%s10433_s2 + $0x30] sm:$0xf0] }
  0x2e   :  { %v5275_v29 = vld [vmem:[%s10433_s2 + $0x460] sm:$0xf]  ;;  %v5404_v34 = vor.u32 %v6732_v23, %v5403_v22  ;;  %v7541_v39 = vpack.c.b16 %v285_v21, %v285_v21  ;;  %v7549_v42 = vpack.c.b16 %v286_v26, %v286_v26  ;;  %v6724_v58 = vld [vmem:[%s10433_s2 + $0x52c] sm:$0xf0]  ;;  %1484 = vmatpush.bf16.msra.mxu2 %v5200_v49  ;;  %v6670_v3 = vld [vmem:[%s10433_s2 + $0x384] sm:$0xf] }
  0x2f   :  { %1395 = vmatpush.bf16.msrb.mxu1 %v5436_v5  ;;  %v5387_v40 = vld [vmem:[%s10433_s2 + $0x540] sm:$0xf]  ;;  %v5276_v43 = vor.u32 %v6700_v30, %v5275_v29  ;;  %v6692_v62 = vld [vmem:[%s10433_s2 + $0x42c] sm:$0xf0]  ;;  %v6650_v9 = vld [vmem:[%s10433_s2 + $0x2e4] sm:$0xf]  ;;  %v5168_v15 = vor.u32 %v6670_v3, %v5165_v4 }
  0x30   :  { %1377 = vmatpush.bf16.msrb.mxu0 %v5308_v11  ;;  %1431 = vmatpush.bf16.msrb.mxu3 %v4800_v13  ;;  %v5259_v45 = vld [vmem:[%s10433_s2 + $0x440] sm:$0xf]  ;;  %v5388_v50 = vor.u32 %v6728_v41, %v5387_v40  ;;  %v6720_v6 = vld [vmem:[%s10433_s2 + $0x50c] sm:$0xf0]  ;;  %v4736_v11 = vor.u32 %v6562_v63, %v4733_v2  ;;  %v6558_v13 = vld [vmem:[%s10433_s2 + $0x4] sm:$0xf]  ;;  %v5088_v22 = vor.u32 %v6650_v9, %v5085_v10 }
  0x31   :  { %v5371_v57 = vld [vmem:[%s10433_s2 + $0x520] sm:$0xf]  ;;  %v5260_v59 = vor.u32 %v6696_v46, %v5259_v45  ;;  %v6688_v12 = vld [vmem:[%s10433_s2 + $0x40c] sm:$0xf0]  ;;  %v4717_v14 = vld [vmem:[%s10433_s2 + $0x10] sm:$0xf0] }
  0x32   :  { %v5243_v61 = vld [vmem:[%s10433_s2 + $0x420] sm:$0xf]  ;;  %v5372_v1 = vor.u32 %v6724_v58, %v5371_v57  ;;  %1485 = vmatpush.bf16.msra.mxu2 %v5184_v0  ;;  %v4703_v17 = vld [vmem:[%s10431_s0 + $0x10] sm:$0xf]  ;;  %v6618_v19 = vld [vmem:[%s10433_s2 + $0x1e4] sm:$0xf]  ;;  %v4720_v30 = vor.u32 %v6558_v13, %v4717_v14 }
  0x33   :  { %1396 = vmatpush.bf16.msrb.mxu1 %v5420_v16  ;;  %v5355_v5 = vld [vmem:[%s10433_s2 + $0x500] sm:$0xf]  ;;  %v5244_v7 = vor.u32 %v6692_v62, %v5243_v61  ;;  %v4957_v20 = vld [vmem:[%s10433_s2 + $0x1f0] sm:$0xf0]  ;;  %v6714_v21 = vld [vmem:[%s10433_s2 + $0x4e4] sm:$0xf] }
  0x34   :  { %1378 = vmatpush.bf16.msrb.mxu0 %v5292_v25  ;;  %1432 = vmatpush.bf16.msrb.mxu3 %v4784_v28  ;;  %v5227_v8 = vld [vmem:[%s10433_s2 + $0x400] sm:$0xf]  ;;  %v5356_v16 = vor.u32 %v6720_v6, %v5355_v5  ;;  %v5341_v23 = vld [vmem:[%s10433_s2 + $0x4f0] sm:$0xf0]  ;;  %v6666_v24 = vld [vmem:[%s10433_s2 + $0x364] sm:$0xf]  ;;  %v4960_v32 = vor.u32 %v6618_v19, %v4957_v20 }
  0x35   :  { %1316 = vmatmul.bf16.gmra.mxu0 %v7528_v33  ;;  %1352 = vmatmul.bf16.gmra.mxu2 %v7541_v39  ;;  %v5149_v25 = vld [vmem:[%s10433_s2 + $0x370] sm:$0xf0]  ;;  %v5228_v26 = vor.u32 %v6688_v12, %v5227_v8  ;;  %v4705_v28 = vld [vmem:[%s10431_s0 + $0x2c] sm:$0xf0]  ;;  %v4711_v29 = vld [vmem:[%s10431_s0 + $0x18] sm:$0xf]  ;;  %v5344_v36 = vor.u32 %v6714_v21, %v5341_v23 }
  0x36   :  { %1334 = vmatmul.bf16.gmra.mxu1 %v7539_v38  ;;  %v6553_v27 = vld [vmem:[%s10431_s0 + $0x14] sm:$0xf]  ;;  %1486 = vmatpush.bf16.msra.mxu2 %v5168_v15  ;;  %v6646_v37 = vld [vmem:[%s10433_s2 + $0x2c4] sm:$0xf] }
  0x37   :  { %1397 = vmatpush.bf16.msrb.mxu1 %v5404_v34  ;;  %1370 = vmatmul.bf16.gmra.mxu3 %v7549_v42  ;;  %v6557_v31 = vld [vmem:[%s10431_s0 + $0x30] sm:$0xf0]  ;;  %v6614_v34 = vld [vmem:[%s10433_s2 + $0x1c4] sm:$0xf]  ;;  %v7674_v45 = vor.u32 %v6553_v27, %v4705_v28 }
  0x38   :  { %1379 = vmatpush.bf16.msrb.mxu0 %v5276_v43  ;;  %1433 = vmatpush.bf16.msrb.mxu3 %v4768_v44  ;;  %v4941_v35 = vld [vmem:[%s10433_s2 + $0x1d0] sm:$0xf0]  ;;  %v6710_v41 = vld [vmem:[%s10433_s2 + $0x4c4] sm:$0xf]  ;;  %v5152_v43 = vor.u32 %v6666_v24, %v5149_v25  ;;  %v7672_v44 = vor.u32 %v6556_v18, %v4703_v17 }
  0x39   :  { %v5069_v40 = vld [vmem:[%s10433_s2 + $0x2d0] sm:$0xf0]  ;;  %v6662_v48 = vld [vmem:[%s10433_s2 + $0x344] sm:$0xf]  ;;  %v4944_v53 = vor.u32 %v6614_v34, %v4941_v35 }
  0x3a   :  { %v5325_v46 = vld [vmem:[%s10433_s2 + $0x4d0] sm:$0xf0]  ;;  %v5072_v54 = vor.u32 %v6646_v37, %v5069_v40  ;;  %v6610_v56 = vld [vmem:[%s10433_s2 + $0x1a4] sm:$0xf] }
  0x3b   :  { %1398 = vmatpush.bf16.msrb.mxu1 %v5388_v50  ;;  %v5133_v49 = vld [vmem:[%s10433_s2 + $0x350] sm:$0xf0]  ;;  %v7685_v50 = vor.u32 %v6557_v31, %v4711_v29 }
  0x3c   :  { %1380 = vmatpush.bf16.msrb.mxu0 %v5260_v59  ;;  %1434 = vmatpush.bf16.msrb.mxu3 %v4752_v60  ;;  %v4925_v57 = vld [vmem:[%s10433_s2 + $0x1b0] sm:$0xf0] }
  0x3f   :  { %1399 = vmatpush.bf16.msrb.mxu1 %v5372_v1 }
  0x40   :  { %1381 = vmatpush.bf16.msrb.mxu0 %v5244_v7  ;;  %1435 = vmatpush.bf16.msrb.mxu3 %v4736_v11 }
  0x43   :  { %1400 = vmatpush.bf16.msrb.mxu1 %v5356_v16 }
  0x44   :  { %1382 = vmatpush.bf16.msrb.mxu0 %v5228_v26  ;;  %1436 = vmatpush.bf16.msrb.mxu3 %v4720_v30 }
  0x47   :  { %1465 = vmatpush.bf16.msra.mxu1 %v5088_v22 }
  0x48   :  { %1447 = vmatpush.bf16.msra.mxu0 %v4960_v32 }
  0x49   :  { %17 = vsyncpa [#allocation3], 0  ;;  %1501 = vmatpush.bf16.msra.mxu3 %v5344_v36  ;;  %v5328_v58 = vor.u32 %v6710_v41, %v5325_v46  ;;  %v6642_v59 = vld [vmem:[%s10433_s2 + $0x2a4] sm:$0xf]  ;;  %v5053_v60 = vld [vmem:[%s10433_s2 + $0x2b0] sm:$0xf0]  ;;  %1487 = vmatpush.bf16.msra.mxu2 %v5152_v43  ;;  %v5136_v62 = vor.u32 %v6662_v48, %v5133_v49  ;;  %v4928_v2 = vor.u32 %v6610_v56, %v4925_v57 }
  0x4a   :  { %v6706_v61 = vld [vmem:[%s10433_s2 + $0x4a4] sm:$0xf]  ;;  %1383 = vmatmul.bf16.vlgmr.msrb.gmra.mxu0 %v7672_v44  ;;  %1401 = vmatmul.bf16.vlgmr.msrb.gmra.mxu1 %v7674_v45  ;;  %v5309_v63 = vld [vmem:[%s10433_s2 + $0x4b0] sm:$0xf0]  ;;  %v5056_v3 = vor.u32 %v6642_v59, %v5053_v60  ;;  %v49_v14 = vld [vmem:[%s10431_s0 + $0x48] sm:$0xff]  ;;  %s4671_s23 = sshll.u32 %s10442_s11, 4  ;;  %s4672_s23 = int_to_ptr.hbm [resolvable:$true] %s4671_s23 }
  0x4b   :  { %v6658_v0 = vld [vmem:[%s10433_s2 + $0x324] sm:$0xf]  ;;  %v5117_v1 = vld [vmem:[%s10433_s2 + $0x330] sm:$0xf0]  ;;  %5497 = vmatmul.msk.bf16.vlgmr.msrb.gmra.mxu2 %vm1296_vm0, %v7685_v50  ;;  %1437 = vmatmul.bf16.vlgmr.msrb.gmra.mxu3 %v7429_v47  ;;  %v5312_v6 = vor.u32 %v6706_v61, %v5309_v63  ;;  %v4835_v15 = vld [vmem:[%s10433_s2 + $0xe8] sm:$0xf]  ;;  %v287_v26 = vunpack.c.l.b16 %v49_v14  ;;  %v288_v27 = vunpack.c.h.b16 %v49_v14 }
  0x4c   :  { %1448 = vmatpush.bf16.msra.mxu0 %v4944_v53  ;;  %1466 = vmatpush.bf16.msra.mxu1 %v5072_v54  ;;  %v6606_v4 = vld [vmem:[%s10433_s2 + $0x184] sm:$0xf]  ;;  %v4909_v5 = vld [vmem:[%s10433_s2 + $0x190] sm:$0xf0]  ;;  %v5120_v10 = vor.u32 %v6658_v0, %v5117_v1  ;;  %v6589_v16 = vld [vmem:[%s10433_s2 + $0xf4] sm:$0xf0] }
  0x4d   :  { %1502 = vmatpush.bf16.msra.mxu3 %v5328_v58  ;;  %v6638_v7 = vld [vmem:[%s10433_s2 + $0x284] sm:$0xf]  ;;  %v5037_v8 = vld [vmem:[%s10433_s2 + $0x290] sm:$0xf0]  ;;  %1488 = vmatpush.bf16.msra.mxu2 %v5136_v62  ;;  %v4912_v17 = vor.u32 %v6606_v4, %v4909_v5  ;;  %v50_v19 = vld [vmem:[%s10431_s0 + $0x50] sm:$0xf]  ;;  %v4836_v30 = vor.u32 %v6589_v16, %v4835_v15  ;;  %v7785_v46 = vpack.c.b16 %v287_v26, %v287_v26 }
  0x4e   :  { %v6702_v9 = vld [vmem:[%s10433_s2 + $0x484] sm:$0xf]  ;;  %v5293_v11 = vld [vmem:[%s10433_s2 + $0x490] sm:$0xf0]  ;;  %v5040_v18 = vor.u32 %v6638_v7, %v5037_v8  ;;  %v289_v31 = vunpack.c.l.b16 %v50_v19  ;;  %v7787_v48 = vpack.c.b16 %v288_v27, %v288_v27  ;;  %v4819_v53 = vld [vmem:[%s10433_s2 + $0xc8] sm:$0xf] }
  0x4f   :  { %v6654_v12 = vld [vmem:[%s10433_s2 + $0x304] sm:$0xf]  ;;  %v5101_v13 = vld [vmem:[%s10433_s2 + $0x310] sm:$0xf0]  ;;  %v5296_v21 = vor.u32 %v6702_v9, %v5293_v11  ;;  %v6585_v54 = vld [vmem:[%s10433_s2 + $0xd4] sm:$0xf0] }
  0x50   :  { %1449 = vmatpush.bf16.msra.mxu0 %v4928_v2  ;;  %1467 = vmatpush.bf16.msra.mxu1 %v5056_v3  ;;  %v6602_v20 = vld [vmem:[%s10433_s2 + $0x164] sm:$0xf]  ;;  %v4893_v22 = vld [vmem:[%s10433_s2 + $0x170] sm:$0xf0]  ;;  %v5104_v25 = vor.u32 %v6654_v12, %v5101_v13  ;;  %v7798_v56 = vpack.c.b16 %v289_v31, %v289_v31  ;;  %v4820_v1 = vor.u32 %v6585_v54, %v4819_v53  ;;  %v4803_v3 = vld [vmem:[%s10433_s2 + $0xa8] sm:$0xf] }
  0x51   :  { %1503 = vmatpush.bf16.msra.mxu3 %v5312_v6  ;;  %v6634_v23 = vld [vmem:[%s10433_s2 + $0x264] sm:$0xf]  ;;  %v5021_v24 = vld [vmem:[%s10433_s2 + $0x270] sm:$0xf0]  ;;  %1489 = vmatpush.bf16.msra.mxu2 %v5120_v10  ;;  %v4896_v32 = vor.u32 %v6602_v20, %v4893_v22  ;;  %v6581_v4 = vld [vmem:[%s10433_s2 + $0xb4] sm:$0xf0] }
  0x52   :  { %v6698_v28 = vld [vmem:[%s10433_s2 + $0x464] sm:$0xf]  ;;  %v5277_v29 = vld [vmem:[%s10433_s2 + $0x470] sm:$0xf0]  ;;  %v5024_v34 = vor.u32 %v6634_v23, %v5021_v24  ;;  %v4804_v14 = vor.u32 %v6581_v4, %v4803_v3  ;;  %v4787_v23 = vld [vmem:[%s10433_s2 + $0x88] sm:$0xf] }
  0x53   :  { %v6598_v35 = vld [vmem:[%s10433_s2 + $0x144] sm:$0xf]  ;;  %v4877_v36 = vld [vmem:[%s10433_s2 + $0x150] sm:$0xf0]  ;;  %v5280_v37 = vor.u32 %v6698_v28, %v5277_v29  ;;  %v6577_v24 = vld [vmem:[%s10433_s2 + $0x94] sm:$0xf0] }
  0x54   :  { %1450 = vmatpush.bf16.msra.mxu0 %v4912_v17  ;;  %1468 = vmatpush.bf16.msra.mxu1 %v5040_v18  ;;  %v6630_v40 = vld [vmem:[%s10433_s2 + $0x244] sm:$0xf]  ;;  %v5005_v41 = vld [vmem:[%s10433_s2 + $0x250] sm:$0xf0]  ;;  %v4880_v57 = vor.u32 %v6598_v35, %v4877_v36  ;;  %v4963_v17 = vld [vmem:[%s10433_s2 + $0x1e8] sm:$0xf]  ;;  %v4788_v31 = vor.u32 %v6577_v24, %v4787_v23 }
  0x55   :  { %1504 = vmatpush.bf16.msra.mxu3 %v5296_v21  ;;  %v6694_v43 = vld [vmem:[%s10433_s2 + $0x444] sm:$0xf]  ;;  %1490 = vmatpush.bf16.msra.mxu2 %v5104_v25  ;;  %v5261_v49 = vld [vmem:[%s10433_s2 + $0x450] sm:$0xf0]  ;;  %v5008_v58 = vor.u32 %v6630_v40, %v5005_v41  ;;  %v6621_v18 = vld [vmem:[%s10433_s2 + $0x1f4] sm:$0xf0] }
  0x56   :  { %v6594_v59 = vld [vmem:[%s10433_s2 + $0x124] sm:$0xf]  ;;  %v4861_v60 = vld [vmem:[%s10433_s2 + $0x130] sm:$0xf0]  ;;  %v5264_v61 = vor.u32 %v6694_v43, %v5261_v49  ;;  %v4964_v27 = vor.u32 %v6621_v18, %v4963_v17  ;;  %v6617_v35 = vld [vmem:[%s10433_s2 + $0x1d4] sm:$0xf0] }
  0x57   :  { %v6626_v62 = vld [vmem:[%s10433_s2 + $0x224] sm:$0xf]  ;;  %v4989_v63 = vld [vmem:[%s10433_s2 + $0x230] sm:$0xf0]  ;;  %v4864_v5 = vor.u32 %v6594_v59, %v4861_v60  ;;  %v4771_v36 = vld [vmem:[%s10433_s2 + $0x68] sm:$0xf] }
  0x58   :  { %1451 = vmatpush.bf16.msra.mxu0 %v4896_v32  ;;  %1469 = vmatpush.bf16.msra.mxu1 %v5024_v34  ;;  %v6690_v0 = vld [vmem:[%s10433_s2 + $0x424] sm:$0xf]  ;;  %v5245_v2 = vld [vmem:[%s10433_s2 + $0x430] sm:$0xf0]  ;;  %v4992_v6 = vor.u32 %v6626_v62, %v4989_v63  ;;  %v4947_v32 = vld [vmem:[%s10433_s2 + $0x1c8] sm:$0xf] }
  0x59   :  { %1555 = vmatpush.bf16.msrb.mxu2 %v4836_v30  ;;  %1505 = vmatpush.bf16.msra.mxu3 %v5280_v37  ;;  %v6590_v7 = vld [vmem:[%s10433_s2 + $0x104] sm:$0xf]  ;;  %v4845_v8 = vld [vmem:[%s10433_s2 + $0x110] sm:$0xf0]  ;;  %v5248_v10 = vor.u32 %v6690_v0, %v5245_v2  ;;  %v6573_v37 = vld [vmem:[%s10433_s2 + $0x74] sm:$0xf0]  ;;  %v4948_v43 = vor.u32 %v6617_v35, %v4947_v32 }
  0x5a   :  { %1388 = vmatmul.bf16.gmra.mxu0 %v7785_v46  ;;  %1406 = vmatmul.bf16.gmra.mxu1 %v7787_v48  ;;  %v6622_v9 = vld [vmem:[%s10433_s2 + $0x204] sm:$0xf]  ;;  %v4973_v11 = vld [vmem:[%s10433_s2 + $0x210] sm:$0xf0]  ;;  %v4848_v21 = vor.u32 %v6590_v7, %v4845_v8  ;;  %v4931_v49 = vld [vmem:[%s10433_s2 + $0x1a8] sm:$0xf]  ;;  %v4772_v54 = vor.u32 %v6573_v37, %v4771_v36 }
  0x5b   :  { %5498 = vmatmul.msk.bf16.gmra.mxu2 %vm1296_vm0, %v7798_v56  ;;  %1442 = vmatmul.bf16.gmra.mxu3 %v7528_v33  ;;  %v6686_v12 = vld [vmem:[%s10433_s2 + $0x404] sm:$0xf]  ;;  %v5229_v13 = vld [vmem:[%s10433_s2 + $0x410] sm:$0xf0]  ;;  %v4976_v22 = vor.u32 %v6622_v9, %v4973_v11  ;;  %v6613_v53 = vld [vmem:[%s10433_s2 + $0x1b4] sm:$0xf0] }
  0x5c   :  { %1452 = vmatpush.bf16.msra.mxu0 %v4880_v57  ;;  %1470 = vmatpush.bf16.msra.mxu1 %v5008_v58  ;;  %v6746_v15 = vld [vmem:[%s10433_s2 + $0x5e4] sm:$0xf]  ;;  %v5469_v16 = vld [vmem:[%s10433_s2 + $0x5f0] sm:$0xf0]  ;;  %v5232_v25 = vor.u32 %v6686_v12, %v5229_v13  ;;  %v4755_v59 = vld [vmem:[%s10433_s2 + $0x48] sm:$0xf] }
  0x5d   :  { %1506 = vmatpush.bf16.msra.mxu3 %v5264_v61  ;;  %1556 = vmatpush.bf16.msrb.mxu2 %v4820_v1  ;;  %v6750_v19 = vld [vmem:[%s10433_s2 + $0x604] sm:$0xf]  ;;  %v5485_v20 = vld [vmem:[%s10433_s2 + $0x610] sm:$0xf0]  ;;  %v5472_v26 = vor.u32 %v6746_v15, %v5469_v16  ;;  %v6569_v60 = vld [vmem:[%s10433_s2 + $0x54] sm:$0xf0]  ;;  %v4932_v1 = vor.u32 %v6613_v53, %v4931_v49 }
  0x5e   :  { %v5488_v28 = vor.u32 %v6750_v19, %v5485_v20  ;;  %v6742_v29 = vld [vmem:[%s10433_s2 + $0x5c4] sm:$0xf]  ;;  %v5453_v30 = vld [vmem:[%s10433_s2 + $0x5d0] sm:$0xf0]  ;;  %v5219_v62 = vld [vmem:[%s10433_s2 + $0x3e8] sm:$0xf]  ;;  %v4756_v4 = vor.u32 %v6569_v60, %v4755_v59 }
  0x5f   :  { %v5456_v34 = vor.u32 %v6742_v29, %v5453_v30  ;;  %v6738_v40 = vld [vmem:[%s10433_s2 + $0x5a4] sm:$0xf]  ;;  %v5437_v41 = vld [vmem:[%s10433_s2 + $0x5b0] sm:$0xf0]  ;;  %v6685_v63 = vld [vmem:[%s10433_s2 + $0x3f4] sm:$0xf0] }
  0x60   :  { %1453 = vmatpush.bf16.msra.mxu0 %v4864_v5  ;;  %1471 = vmatpush.bf16.msra.mxu1 %v4992_v6  ;;  %v5440_v57 = vor.u32 %v6738_v40, %v5437_v41  ;;  %v6734_v58 = vld [vmem:[%s10433_s2 + $0x584] sm:$0xf]  ;;  %v5421_v61 = vld [vmem:[%s10433_s2 + $0x590] sm:$0xf0]  ;;  %v5220_v0 = vor.u32 %v6685_v63, %v5219_v62  ;;  %v4915_v2 = vld [vmem:[%s10433_s2 + $0x188] sm:$0xf] }
  0x61   :  { %1507 = vmatpush.bf16.msra.mxu3 %v5248_v10  ;;  %1557 = vmatpush.bf16.msrb.mxu2 %v4804_v14  ;;  %v6609_v3 = vld [vmem:[%s10433_s2 + $0x194] sm:$0xf0]  ;;  %v4739_v5 = vld [vmem:[%s10433_s2 + $0x28] sm:$0xf]  ;;  %v5424_v6 = vor.u32 %v6734_v58, %v5421_v61  ;;  %v6730_v10 = vld [vmem:[%s10433_s2 + $0x564] sm:$0xf] }
  0x62   :  { %v6565_v7 = vld [vmem:[%s10433_s2 + $0x34] sm:$0xf0]  ;;  %v5203_v8 = vld [vmem:[%s10433_s2 + $0x3c8] sm:$0xf]  ;;  %v5405_v11 = vld [vmem:[%s10433_s2 + $0x570] sm:$0xf0]  ;;  %v4916_v14 = vor.u32 %v6609_v3, %v4915_v2 }
  0x63   :  { %v6681_v9 = vld [vmem:[%s10433_s2 + $0x3d4] sm:$0xf0]  ;;  %v5187_v13 = vld [vmem:[%s10433_s2 + $0x3a8] sm:$0xf]  ;;  %v4740_v17 = vor.u32 %v6565_v7, %v4739_v5  ;;  %v5408_v19 = vor.u32 %v6730_v10, %v5405_v11  ;;  %v6726_v20 = vld [vmem:[%s10433_s2 + $0x544] sm:$0xf] }
  0x64   :  { %1454 = vmatpush.bf16.msra.mxu0 %v4848_v21  ;;  %1472 = vmatpush.bf16.msra.mxu1 %v4976_v22  ;;  %v5204_v12 = vor.u32 %v6681_v9, %v5203_v8  ;;  %v4899_v15 = vld [vmem:[%s10433_s2 + $0x168] sm:$0xf]  ;;  %v6605_v16 = vld [vmem:[%s10433_s2 + $0x174] sm:$0xf0]  ;;  %v5389_v24 = vld [vmem:[%s10433_s2 + $0x550] sm:$0xf0] }
  0x65   :  { %1508 = vmatpush.bf16.msra.mxu3 %v5232_v25  ;;  %1558 = vmatpush.bf16.msrb.mxu2 %v4788_v31  ;;  %v6677_v18 = vld [vmem:[%s10433_s2 + $0x3b4] sm:$0xf0]  ;;  %v4723_v21 = vld [vmem:[%s10433_s2 + $0x8] sm:$0xf]  ;;  %v5392_v31 = vor.u32 %v6726_v20, %v5389_v24  ;;  %v6722_v32 = vld [vmem:[%s10433_s2 + $0x524] sm:$0xf] }
  0x66   :  { %v6561_v22 = vld [vmem:[%s10433_s2 + $0x14] sm:$0xf0]  ;;  %v5188_v23 = vor.u32 %v6677_v18, %v5187_v13  ;;  %v5347_v25 = vld [vmem:[%s10433_s2 + $0x4e8] sm:$0xf]  ;;  %v5373_v37 = vld [vmem:[%s10433_s2 + $0x530] sm:$0xf0] }
  0x67   :  { %v6601_v29 = vld [vmem:[%s10433_s2 + $0x154] sm:$0xf0]  ;;  %v4724_v30 = vor.u32 %v6561_v22, %v4723_v21  ;;  %v5171_v35 = vld [vmem:[%s10433_s2 + $0x388] sm:$0xf]  ;;  %v6718_v58 = vld [vmem:[%s10433_s2 + $0x504] sm:$0xf] }
  0x68   :  { %1519 = vmatpush.bf16.msrb.mxu0 %v5472_v26  ;;  %1544 = vmatpush.bf16.msrb.mxu1 %v5488_v28  ;;  %v6717_v26 = vld [vmem:[%s10433_s2 + $0x4f4] sm:$0xf0]  ;;  %v4883_v28 = vld [vmem:[%s10433_s2 + $0x148] sm:$0xf]  ;;  %v5357_v59 = vld [vmem:[%s10433_s2 + $0x510] sm:$0xf0] }
  0x69   :  { %1573 = vmatpush.bf16.msrb.mxu3 %v4964_v27  ;;  %1559 = vmatpush.bf16.msrb.mxu2 %v4772_v54  ;;  %v4900_v27 = vor.u32 %v6605_v16, %v4899_v15  ;;  %v6673_v36 = vld [vmem:[%s10433_s2 + $0x394] sm:$0xf0]  ;;  %v5331_v40 = vld [vmem:[%s10433_s2 + $0x4c8] sm:$0xf]  ;;  %v5360_v7 = vor.u32 %v6718_v58, %v5357_v59  ;;  %s7133_s24 = smov 896  }
  0x6a   :  { %1455 = vmatmul.bf16.vlgmr.msra.gmra.mxu0 %v7437_v51  ;;  %1473 = vmatmul.bf16.vlgmr.msra.gmra.mxu1 %v7439_v52  ;;  %v6713_v41 = vld [vmem:[%s10433_s2 + $0x4d4] sm:$0xf0]  ;;  %v4867_v49 = vld [vmem:[%s10433_s2 + $0x128] sm:$0xf]  ;;  %v5172_v54 = vor.u32 %v6673_v36, %v5171_v35 }
  0x6b   :  { %1491 = vmatmul.bf16.vlgmr.msra.gmra.mxu2 %v7447_v55  ;;  %1509 = vmatmul.bf16.vlgmr.msra.gmra.mxu3 %v7672_v44  ;;  %v6597_v53 = vld [vmem:[%s10433_s2 + $0x134] sm:$0xf0]  ;;  %v5332_v60 = vor.u32 %v6713_v41, %v5331_v40  ;;  %v5315_v61 = vld [vmem:[%s10433_s2 + $0x4a8] sm:$0xf] }
  0x6c   :  { %1520 = vmatpush.bf16.msrb.mxu0 %v5456_v34  ;;  %1609 = vmatpush.bf16.msra.mxu1 %v5220_v0  ;;  %v5348_v34 = vor.u32 %v6717_v26, %v5347_v25  ;;  %v6709_v62 = vld [vmem:[%s10433_s2 + $0x4b4] sm:$0xf0]  ;;  %v5155_v63 = vld [vmem:[%s10433_s2 + $0x368] sm:$0xf]  ;;  %v4868_v3 = vor.u32 %v6597_v53, %v4867_v49 }
  0x6d   :  { %1574 = vmatpush.bf16.msrb.mxu3 %v4948_v43  ;;  %1560 = vmatpush.bf16.msrb.mxu2 %v4756_v4  ;;  %v4884_v43 = vor.u32 %v6601_v29, %v4883_v28  ;;  %v6669_v0 = vld [vmem:[%s10433_s2 + $0x374] sm:$0xf0]  ;;  %v4851_v4 = vld [vmem:[%s10433_s2 + $0x108] sm:$0xf]  ;;  %v5316_v9 = vor.u32 %v6709_v62, %v5315_v61  ;;  %v6587_v62 = vld [vmem:[%s10433_s2 + $0xec] sm:$0xf] }
  0x6e   :  { %v6653_v2 = vld [vmem:[%s10433_s2 + $0x2f4] sm:$0xf0]  ;;  %v5475_v8 = vld [vmem:[%s10433_s2 + $0x5e8] sm:$0xf] }
  0x6f   :  { %v6593_v5 = vld [vmem:[%s10433_s2 + $0x114] sm:$0xf0]  ;;  %v5139_v10 = vld [vmem:[%s10433_s2 + $0x348] sm:$0xf] }
  0x70   :  { %1521 = vmatpush.bf16.msrb.mxu0 %v5440_v57  ;;  %1610 = vmatpush.bf16.msra.mxu1 %v5204_v12  ;;  %v5376_v57 = vor.u32 %v6722_v32, %v5373_v37  ;;  %v6665_v11 = vld [vmem:[%s10433_s2 + $0x354] sm:$0xf0]  ;;  %v5075_v16 = vld [vmem:[%s10433_s2 + $0x2c8] sm:$0xf]  ;;  %v4852_v18 = vor.u32 %v6593_v5, %v4851_v4 }
  0x71   :  { %1575 = vmatpush.bf16.msrb.mxu3 %v4932_v1  ;;  %1561 = vmatpush.bf16.msrb.mxu2 %v4740_v17  ;;  %v5091_v1 = vld [vmem:[%s10433_s2 + $0x2e8] sm:$0xf]  ;;  %v6749_v13 = vld [vmem:[%s10433_s2 + $0x5f4] sm:$0xf0] }
  0x72   :  { %v5092_v12 = vor.u32 %v6653_v2, %v5091_v1  ;;  %v6705_v15 = vld [vmem:[%s10433_s2 + $0x494] sm:$0xf0]  ;;  %v5476_v20 = vor.u32 %v6749_v13, %v5475_v8  ;;  %v5459_v21 = vld [vmem:[%s10433_s2 + $0x5c8] sm:$0xf]  ;;  %v4837_v1 = vld [vmem:[%s10433_s2 + $0xf8] sm:$0xf0] }
  0x73   :  { %v6649_v17 = vld [vmem:[%s10433_s2 + $0x2d4] sm:$0xf0]  ;;  %v5059_v29 = vld [vmem:[%s10433_s2 + $0x2a8] sm:$0xf]  ;;  %v4840_v2 = vor.u32 %v6587_v62, %v4837_v1  ;;  %v4821_v13 = vld [vmem:[%s10433_s2 + $0xd8] sm:$0xf0] }
  0x74   :  { %1522 = vmatpush.bf16.msrb.mxu0 %v5424_v6  ;;  %1611 = vmatpush.bf16.msra.mxu1 %v5188_v23  ;;  %v5156_v6 = vor.u32 %v6669_v0, %v5155_v63  ;;  %v5123_v23 = vld [vmem:[%s10433_s2 + $0x328] sm:$0xf]  ;;  %v6661_v24 = vld [vmem:[%s10433_s2 + $0x334] sm:$0xf0]  ;;  %v5076_v25 = vor.u32 %v6649_v17, %v5075_v16  ;;  %v6651_v62 = vld [vmem:[%s10433_s2 + $0x2ec] sm:$0xf] }
  0x75   :  { %1576 = vmatpush.bf16.msrb.mxu3 %v4916_v14  ;;  %1562 = vmatpush.bf16.msrb.mxu2 %v4724_v30  ;;  %v5299_v14 = vld [vmem:[%s10433_s2 + $0x488] sm:$0xf]  ;;  %v6745_v26 = vld [vmem:[%s10433_s2 + $0x5d4] sm:$0xf0]  ;;  %v5093_v1 = vld [vmem:[%s10433_s2 + $0x2f8] sm:$0xf0] }
  0x76   :  { %v5300_v22 = vor.u32 %v6705_v15, %v5299_v14  ;;  %v6701_v28 = vld [vmem:[%s10433_s2 + $0x474] sm:$0xf0]  ;;  %v5460_v32 = vor.u32 %v6745_v26, %v5459_v21  ;;  %v5107_v37 = vld [vmem:[%s10433_s2 + $0x308] sm:$0xf]  ;;  %v6619_v14 = vld [vmem:[%s10433_s2 + $0x1ec] sm:$0xf] }
  0x77   :  { %v6645_v30 = vld [vmem:[%s10433_s2 + $0x2b4] sm:$0xf0]  ;;  %v5267_v40 = vld [vmem:[%s10433_s2 + $0x448] sm:$0xf]  ;;  %v4965_v15 = vld [vmem:[%s10433_s2 + $0x1f8] sm:$0xf0] }
  0x78   :  { %1523 = vmatpush.bf16.msrb.mxu0 %v5408_v19  ;;  %1612 = vmatpush.bf16.msra.mxu1 %v5172_v54  ;;  %v5140_v19 = vor.u32 %v6665_v11, %v5139_v10  ;;  %v6741_v35 = vld [vmem:[%s10433_s2 + $0x5b4] sm:$0xf0]  ;;  %v5060_v49 = vor.u32 %v6645_v30, %v5059_v29  ;;  %v5043_v53 = vld [vmem:[%s10433_s2 + $0x288] sm:$0xf]  ;;  %v6583_v10 = vld [vmem:[%s10433_s2 + $0xcc] sm:$0xf] }
  0x79   :  { %1577 = vmatpush.bf16.msrb.mxu3 %v4900_v27  ;;  %1627 = vmatpush.bf16.msra.mxu2 %v5348_v34  ;;  %v5283_v27 = vld [vmem:[%s10433_s2 + $0x468] sm:$0xf]  ;;  %v6697_v41 = vld [vmem:[%s10433_s2 + $0x454] sm:$0xf0]  ;;  %v4824_v16 = vor.u32 %v6583_v10, %v4821_v13  ;;  %v4805_v26 = vld [vmem:[%s10433_s2 + $0xb8] sm:$0xf0]  ;;  %v5096_v10 = vor.u32 %v6651_v62, %v5093_v1 }
  0x7a   :  { %1460 = vmatmul.bf16.gmra.mxu0 %v7539_v38  ;;  %1478 = vmatmul.bf16.gmra.mxu1 %v7541_v39  ;;  %v5443_v34 = vld [vmem:[%s10433_s2 + $0x5a8] sm:$0xf]  ;;  %v5284_v36 = vor.u32 %v6701_v28, %v5283_v27  ;;  %v6641_v54 = vld [vmem:[%s10433_s2 + $0x294] sm:$0xf0]  ;;  %v5268_v61 = vor.u32 %v6697_v41, %v5267_v40  ;;  %v4789_v40 = vld [vmem:[%s10433_s2 + $0x98] sm:$0xf0] }
  0x7b   :  { %1496 = vmatmul.bf16.gmra.mxu2 %v7549_v42  ;;  %1514 = vmatmul.bf16.gmra.mxu3 %v7785_v46  ;;  %v5444_v58 = vor.u32 %v6741_v35, %v5443_v34  ;;  %v5427_v59 = vld [vmem:[%s10433_s2 + $0x588] sm:$0xf]  ;;  %v6693_v0 = vld [vmem:[%s10433_s2 + $0x434] sm:$0xf0]  ;;  %v6615_v34 = vld [vmem:[%s10433_s2 + $0x1cc] sm:$0xf] }
  0x7c   :  { %1524 = vmatpush.bf16.msrb.mxu0 %v5392_v31  ;;  %1613 = vmatpush.bf16.msra.mxu1 %v5156_v6  ;;  %v5124_v31 = vor.u32 %v6661_v24, %v5123_v23  ;;  %v5251_v63 = vld [vmem:[%s10433_s2 + $0x428] sm:$0xf]  ;;  %v6637_v5 = vld [vmem:[%s10433_s2 + $0x274] sm:$0xf0]  ;;  %v4949_v35 = vld [vmem:[%s10433_s2 + $0x1d8] sm:$0xf0] }
  0x7d   :  { %1578 = vmatpush.bf16.msrb.mxu3 %v4884_v43  ;;  %1628 = vmatpush.bf16.msra.mxu2 %v5332_v60  ;;  %v6657_v43 = vld [vmem:[%s10433_s2 + $0x314] sm:$0xf0]  ;;  %v5027_v4 = vld [vmem:[%s10433_s2 + $0x268] sm:$0xf]  ;;  %v5077_v13 = vld [vmem:[%s10433_s2 + $0x2d8] sm:$0xf0] }
  0x7e   :  { %v6737_v60 = vld [vmem:[%s10433_s2 + $0x594] sm:$0xf0]  ;;  %v5235_v11 = vld [vmem:[%s10433_s2 + $0x408] sm:$0xf]  ;;  %v5028_v17 = vor.u32 %v6637_v5, %v5027_v4 }
  0x7f   :  { %v5428_v6 = vor.u32 %v6737_v60, %v5427_v59  ;;  %v6733_v8 = vld [vmem:[%s10433_s2 + $0x574] sm:$0xf0]  ;;  %v5395_v23 = vld [vmem:[%s10433_s2 + $0x548] sm:$0xf]  ;;  %v6611_v59 = vld [vmem:[%s10433_s2 + $0x1ac] sm:$0xf] }
  0x80   :  { %1525 = vmatpush.bf16.msrb.mxu0 %v5376_v57  ;;  %1614 = vmatpush.bf16.msra.mxu1 %v5140_v19  ;;  %v5108_v57 = vor.u32 %v6657_v43, %v5107_v37  ;;  %v5011_v19 = vld [vmem:[%s10433_s2 + $0x248] sm:$0xf]  ;;  %v6729_v24 = vld [vmem:[%s10433_s2 + $0x554] sm:$0xf0]  ;;  %v6575_v37 = vld [vmem:[%s10433_s2 + $0x8c] sm:$0xf] }
  0x81   :  { %1579 = vmatpush.bf16.msrb.mxu3 %v4868_v3  ;;  %1629 = vmatpush.bf16.msra.mxu2 %v5316_v9  ;;  %v5044_v3 = vor.u32 %v6641_v54, %v5043_v53  ;;  %v5252_v9 = vor.u32 %v6693_v0, %v5251_v63  ;;  %v4995_v29 = vld [vmem:[%s10433_s2 + $0x228] sm:$0xf]  ;;  %v6629_v30 = vld [vmem:[%s10433_s2 + $0x234] sm:$0xf0]  ;;  %v4952_v54 = vor.u32 %v6615_v34, %v4949_v35  ;;  %v4933_v60 = vld [vmem:[%s10433_s2 + $0x1b8] sm:$0xf0] }
  0x82   :  { %v4996_v41 = vor.u32 %v6629_v30, %v4995_v29  ;;  %v4979_v43 = vld [vmem:[%s10433_s2 + $0x208] sm:$0xf]  ;;  %v6753_v0 = vld [vmem:[%s10433_s2 + $0x614] sm:$0xf0]  ;;  %v4936_v5 = vor.u32 %v6611_v59, %v4933_v60  ;;  %v6563_v29 = vld [vmem:[%s10433_s2 + $0x2c] sm:$0xf] }
  0x83   :  { %v5363_v53 = vld [vmem:[%s10433_s2 + $0x508] sm:$0xf]  ;;  %v4741_v30 = vld [vmem:[%s10433_s2 + $0x38] sm:$0xf0]  ;;  %v6639_v35 = vld [vmem:[%s10433_s2 + $0x28c] sm:$0xf] }
  0x84   :  { %1526 = vmatpush.bf16.msrb.mxu0 %v5360_v7  ;;  %1615 = vmatpush.bf16.msra.mxu1 %v5124_v31  ;;  %v5411_v7 = vld [vmem:[%s10433_s2 + $0x568] sm:$0xf]  ;;  %v5396_v31 = vor.u32 %v6729_v24, %v5395_v23  ;;  %v6643_v23 = vld [vmem:[%s10433_s2 + $0x2ac] sm:$0xf] }
  0x85   :  { %1580 = vmatpush.bf16.msrb.mxu3 %v4852_v18  ;;  %1630 = vmatpush.bf16.msra.mxu2 %v5300_v22  ;;  %v5412_v18 = vor.u32 %v6733_v8, %v5411_v7  ;;  %v6579_v22 = vld [vmem:[%s10433_s2 + $0xac] sm:$0xf]  ;;  %v5491_v63 = vld [vmem:[%s10433_s2 + $0x608] sm:$0xf] }
  0x86   :  { %v4808_v27 = vor.u32 %v6579_v22, %v4805_v26  ;;  %v5492_v7 = vor.u32 %v6753_v0, %v5491_v63  ;;  %v6607_v8 = vld [vmem:[%s10433_s2 + $0x18c] sm:$0xf]  ;;  %v5029_v0 = vld [vmem:[%s10433_s2 + $0x278] sm:$0xf0] }
  0x87   :  { %v6599_v26 = vld [vmem:[%s10433_s2 + $0x14c] sm:$0xf] }
  0x88   :  { %1591 = vmatpush.bf16.msra.mxu0 %v5092_v12  ;;  %1616 = vmatpush.bf16.msra.mxu1 %v5108_v57  ;;  %v6689_v12 = vld [vmem:[%s10433_s2 + $0x414] sm:$0xf0]  ;;  %v6715_v60 = vld [vmem:[%s10433_s2 + $0x4ec] sm:$0xf] }
  0x89   :  { %1645 = vmatpush.bf16.msra.mxu3 %v5476_v20  ;;  %1631 = vmatpush.bf16.msra.mxu2 %v5284_v36  ;;  %v6633_v20 = vld [vmem:[%s10433_s2 + $0x254] sm:$0xf0]  ;;  %v5236_v21 = vor.u32 %v6689_v12, %v5235_v11  ;;  %v6647_v11 = vld [vmem:[%s10433_s2 + $0x2cc] sm:$0xf] }
  0x8a   :  { %1527 = vmatmul.bf16.vlgmr.msrb.gmra.mxu0 %v7674_v45  ;;  %5499 = vmatmul.msk.bf16.vlgmr.msrb.gmra.mxu1 %vm1296_vm0, %v7685_v50  ;;  %v5012_v28 = vor.u32 %v6633_v20, %v5011_v19  ;;  %v6725_v36 = vld [vmem:[%s10433_s2 + $0x534] sm:$0xf0]  ;;  %v4901_v19 = vld [vmem:[%s10433_s2 + $0x178] sm:$0xf0]  ;;  %v5080_v20 = vor.u32 %v6647_v11, %v5077_v13  ;;  %v6635_v63 = vld [vmem:[%s10433_s2 + $0x26c] sm:$0xf] }
  0x8b   :  { %1563 = vmatmul.bf16.vlgmr.msrb.gmra.mxu2 %v7429_v47  ;;  %1581 = vmatmul.bf16.vlgmr.msrb.gmra.mxu3 %v7437_v51  ;;  %v5477_v11 = vld [vmem:[%s10433_s2 + $0x5f8] sm:$0xf0] }
  0x8c   :  { %1592 = vmatpush.bf16.msra.mxu0 %v5076_v25  ;;  %1681 = vmatpush.bf16.msrb.mxu1 %v4840_v2  ;;  %v4968_v25 = vor.u32 %v6619_v14, %v4965_v15  ;;  %v6571_v2 = vld [vmem:[%s10433_s2 + $0x6c] sm:$0xf]  ;;  %v4757_v15 = vld [vmem:[%s10433_s2 + $0x58] sm:$0xf0] }
  0x8d   :  { %1646 = vmatpush.bf16.msra.mxu3 %v5460_v32  ;;  %1632 = vmatpush.bf16.msra.mxu2 %v5268_v61  ;;  %v5379_v32 = vld [vmem:[%s10433_s2 + $0x528] sm:$0xf]  ;;  %v4792_v61 = vor.u32 %v6575_v37, %v4789_v40  ;;  %v6567_v14 = vld [vmem:[%s10433_s2 + $0x4c] sm:$0xf]  ;;  %v5205_v13 = vld [vmem:[%s10433_s2 + $0x3d8] sm:$0xf0] }
  0x8e   :  { %v5380_v57 = vor.u32 %v6725_v36, %v5379_v32  ;;  %v5045_v36 = vld [vmem:[%s10433_s2 + $0x298] sm:$0xf0] }
  0x8f   :  { %v5048_v62 = vor.u32 %v6639_v35, %v5045_v36  ;;  %v6627_v36 = vld [vmem:[%s10433_s2 + $0x22c] sm:$0xf] }
  0x90   :  { %1593 = vmatpush.bf16.msra.mxu0 %v5060_v49  ;;  %1682 = vmatpush.bf16.msrb.mxu1 %v4824_v16  ;;  %v6625_v49 = vld [vmem:[%s10433_s2 + $0x214] sm:$0xf0]  ;;  %v8270_v16 = vld [vmem:[%s10434_s3] sm:$0xf] }
  0x91   :  { %1647 = vmatpush.bf16.msra.mxu3 %v5444_v58  ;;  %1633 = vmatpush.bf16.msra.mxu2 %v5252_v9  ;;  %v6721_v58 = vld [vmem:[%s10433_s2 + $0x514] sm:$0xf0]  ;;  %v4980_v4 = vor.u32 %v6625_v49, %v4979_v43  ;;  %v4917_v9 = vld [vmem:[%s10433_s2 + $0x198] sm:$0xf0]  ;;  %v8279_v22 = vperm.slane %v8270_v16, 0  ;;  %v4744_v49 = vor.u32 %v6563_v29, %v4741_v30 }
  0x92   :  { %v4869_v43 = vld [vmem:[%s10433_s2 + $0x138] sm:$0xf0]  ;;  %v6743_v29 = vld [vmem:[%s10433_s2 + $0x5cc] sm:$0xf] }
  0x93   :  { %v5461_v30 = vld [vmem:[%s10433_s2 + $0x5d8] sm:$0xf0] }
  0x94   :  { %1594 = vmatpush.bf16.msra.mxu0 %v5044_v3  ;;  %1683 = vmatpush.bf16.msrb.mxu1 %v4808_v27  ;;  %v4773_v3 = vld [vmem:[%s10433_s2 + $0x78] sm:$0xf0] }
  0x95   :  { %1648 = vmatpush.bf16.msra.mxu3 %v5428_v6  ;;  %1634 = vmatpush.bf16.msra.mxu2 %v5236_v21  ;;  %v5364_v6 = vor.u32 %v6721_v58, %v5363_v53  ;;  %v4776_v12 = vor.u32 %v6571_v2, %v4773_v3  ;;  %v4760_v21 = vor.u32 %v6567_v14, %v4757_v15  ;;  %v4885_v27 = vld [vmem:[%s10433_s2 + $0x158] sm:$0xf0]  ;;  %v6683_v53 = vld [vmem:[%s10433_s2 + $0x3ec] sm:$0xf] }
  0x96   :  { %v4888_v37 = vor.u32 %v6599_v26, %v4885_v27  ;;  %v5221_v58 = vld [vmem:[%s10433_s2 + $0x3f8] sm:$0xf0]  ;;  %v6591_v3 = vld [vmem:[%s10433_s2 + $0x10c] sm:$0xf] }
  0x97   :  { %v5224_v59 = vor.u32 %v6683_v53, %v5221_v58  ;;  %v5013_v26 = vld [vmem:[%s10433_s2 + $0x258] sm:$0xf0]  ;;  %v6671_v53 = vld [vmem:[%s10433_s2 + $0x38c] sm:$0xf] }
  0x98   :  { %1595 = vmatpush.bf16.msra.mxu0 %v5028_v17  ;;  %1684 = vmatpush.bf16.msrb.mxu1 %v4792_v61  ;;  %v4920_v17 = vor.u32 %v6607_v8, %v4917_v9  ;;  %v5349_v61 = vld [vmem:[%s10433_s2 + $0x4f8] sm:$0xf0] }
  0x99   :  { %1649 = vmatpush.bf16.msra.mxu3 %v5412_v18  ;;  %1699 = vmatpush.bf16.msrb.mxu2 %v4968_v25  ;;  %v6603_v18 = vld [vmem:[%s10433_s2 + $0x16c] sm:$0xf]  ;;  %v5061_v25 = vld [vmem:[%s10433_s2 + $0x2b8] sm:$0xf0] }
  0x9a   :  { %1532 = vmatmul.bf16.gmra.mxu0 %v7787_v48  ;;  %5500 = vmatmul.msk.bf16.gmra.mxu1 %vm1296_vm0, %v7798_v56  ;;  %v4904_v24 = vor.u32 %v6603_v18, %v4901_v19  ;;  %v5064_v34 = vor.u32 %v6643_v23, %v5061_v25  ;;  %v6711_v18 = vld [vmem:[%s10433_s2 + $0x4cc] sm:$0xf]  ;;  %v5333_v19 = vld [vmem:[%s10433_s2 + $0x4d8] sm:$0xf0] }
  0x9b   :  { %1568 = vmatmul.bf16.gmra.mxu2 %v7528_v33  ;;  %1586 = vmatmul.bf16.gmra.mxu3 %v7539_v38  ;;  %v6631_v25 = vld [vmem:[%s10433_s2 + $0x24c] sm:$0xf] }
  0x9c   :  { %1596 = vmatpush.bf16.msra.mxu0 %v5012_v28  ;;  %1685 = vmatpush.bf16.msrb.mxu1 %v4776_v12  ;;  %v5352_v12 = vor.u32 %v6715_v60, %v5349_v61  ;;  %v5016_v35 = vor.u32 %v6631_v25, %v5013_v26  ;;  %v5445_v60 = vld [vmem:[%s10433_s2 + $0x5b8] sm:$0xf0]  ;;  %v6663_v26 = vld [vmem:[%s10433_s2 + $0x34c] sm:$0xf] }
  0x9d   :  { %1650 = vmatpush.bf16.msra.mxu3 %v5396_v31  ;;  %1700 = vmatpush.bf16.msrb.mxu2 %v4952_v54  ;;  %v6559_v54 = vld [vmem:[%s10433_s2 + $0xc] sm:$0xf]  ;;  %v5173_v61 = vld [vmem:[%s10433_s2 + $0x398] sm:$0xf0] }
  0x9e   :  { %v5285_v25 = vld [vmem:[%s10433_s2 + $0x478] sm:$0xf0] }
  0xa0   :  { %1597 = vmatpush.bf16.msra.mxu0 %v4996_v41  ;;  %1686 = vmatpush.bf16.msrb.mxu1 %v4760_v21  ;;  %v6595_v41 = vld [vmem:[%s10433_s2 + $0x12c] sm:$0xf]  ;;  %v5032_v21 = vor.u32 %v6635_v63, %v5029_v0 }
  0xa1   :  { %1651 = vmatpush.bf16.msra.mxu3 %v5380_v57  ;;  %1701 = vmatpush.bf16.msrb.mxu2 %v4936_v5  ;;  %v1312_v28 = vpop.f32.mrf.mxu0  ;;  %v4725_v57 = vld [vmem:[%s10433_s2 + $0x18] sm:$0xf0]  ;;  %v4872_v1 = vor.u32 %v6595_v41, %v4869_v43  ;;  %v5464_v41 = vor.u32 %v6743_v29, %v5461_v30  ;;  %v6707_v43 = vld [vmem:[%s10433_s2 + $0x4ac] sm:$0xf] }
  0xa2   :  { %v1313_v31 = vadd.f32 %v1312_v28, %v8279_v22  ;;  %v4728_v5 = vor.u32 %v6559_v54, %v4725_v57  ;;  %v6675_v28 = vld [vmem:[%s10433_s2 + $0x3ac] sm:$0xf] }
  0xa3   :  { %v1330_v32 = vpop.f32.mrf.mxu1  ;;  %v6623_v0 = vld [vmem:[%s10433_s2 + $0x20c] sm:$0xf] }
  0xa4   :  { %1598 = vmatpush.bf16.msra.mxu0 %v4980_v4  ;;  %v1331_v40 = vadd.f32 %v1330_v32, %v1313_v31  ;;  %1687 = vmatpush.bf16.msrb.mxu1 %v4744_v49  ;;  %v4853_v4 = vld [vmem:[%s10433_s2 + $0x118] sm:$0xf0]  ;;  %v5336_v31 = vor.u32 %v6711_v18, %v5333_v19  ;;  %v6731_v30 = vld [vmem:[%s10433_s2 + $0x56c] sm:$0xf] }
  0xa5   :  { %1652 = vmatpush.bf16.msra.mxu3 %v5364_v6  ;;  %1702 = vmatpush.bf16.msrb.mxu2 %v4920_v17  ;;  %v6679_v6 = vld [vmem:[%s10433_s2 + $0x3cc] sm:$0xf]  ;;  %v4856_v23 = vor.u32 %v6591_v3, %v4853_v4  ;;  %v5189_v32 = vld [vmem:[%s10433_s2 + $0x3b8] sm:$0xf0] }
  0xa6   :  { %v5208_v17 = vor.u32 %v6679_v6, %v5205_v13  ;;  %v5317_v49 = vld [vmem:[%s10433_s2 + $0x4b8] sm:$0xf0] }
  0xa7   :  { %v4981_v4 = vld [vmem:[%s10433_s2 + $0x218] sm:$0xf0]  ;;  %v5320_v6 = vor.u32 %v6707_v43, %v5317_v49  ;;  %v6659_v49 = vld [vmem:[%s10433_s2 + $0x32c] sm:$0xf] }
  0xa8   :  { %1670 = vmatpush.bf16.msrb.mxu0 %v5492_v7  ;;  %v1348_v2 = vpop.f32.mrf.mxu2  ;;  %1688 = vmatpush.bf16.msrb.mxu1 %v4728_v5  ;;  %v6751_v5 = vld [vmem:[%s10433_s2 + $0x60c] sm:$0xf]  ;;  %v5429_v13 = vld [vmem:[%s10433_s2 + $0x598] sm:$0xf0] }
  0xa9   :  { %1717 = vmatpush.bf16.msrb.mxu3 %v5096_v10  ;;  %1703 = vmatpush.bf16.msrb.mxu2 %v4904_v24  ;;  %v1349_v7 = vadd.f32 %v1348_v2, %v1331_v40  ;;  %v1314_v9 = vpop.f32.mrf.mxu0  ;;  %v6747_v10 = vld [vmem:[%s10433_s2 + $0x5ec] sm:$0xf]  ;;  %v5269_v43 = vld [vmem:[%s10433_s2 + $0x458] sm:$0xf0] }
  0xaa   :  { %1599 = vmatmul.bf16.vlgmr.msra.gmra.mxu0 %v7439_v52  ;;  %1617 = vmatmul.bf16.vlgmr.msra.gmra.mxu1 %v7447_v55  ;;  %v1366_v8 = vpop.f32.mrf.mxu3  ;;  %v1315_v14 = vadd.f32 %v1314_v9, %v8279_v22  ;;  %v5480_v27 = vor.u32 %v6747_v10, %v5477_v11  ;;  %v6703_v9 = vld [vmem:[%s10433_s2 + $0x48c] sm:$0xf]  ;;  %v5301_v10 = vld [vmem:[%s10433_s2 + $0x498] sm:$0xf0] }
  0xab   :  { %1635 = vmatmul.bf16.vlgmr.msra.gmra.mxu2 %v7672_v44  ;;  %1653 = vmatmul.bf16.vlgmr.msra.gmra.mxu3 %v7674_v45  ;;  %v1332_v15 = vpop.f32.mrf.mxu1  ;;  %v6667_v11 = vld [vmem:[%s10433_s2 + $0x36c] sm:$0xf]  ;;  %v5304_v18 = vor.u32 %v6703_v9, %v5301_v10 }
  0xac   :  { %1735 = vmatpush.bf16.msra.mxu0 %v5224_v59  ;;  %v1333_v24 = vadd.f32 %v1332_v15, %v1315_v14  ;;  %1753 = vmatpush.bf16.msra.mxu1 %v5352_v12  ;;  %v6739_v59 = vld [vmem:[%s10433_s2 + $0x5ac] sm:$0xf]  ;;  %v5157_v14 = vld [vmem:[%s10433_s2 + $0x378] sm:$0xf0] }
  0xad   :  { %1718 = vmatpush.bf16.msrb.mxu3 %v5080_v20  ;;  %1704 = vmatpush.bf16.msrb.mxu2 %v4888_v37  ;;  %v8365_v20 = vadd.f32 %v1366_v8, %v1349_v7  ;;  %v4997_v37 = vld [vmem:[%s10433_s2 + $0x238] sm:$0xf0]  ;;  %v5448_v8 = vor.u32 %v6739_v59, %v5445_v60  ;;  %v6735_v12 = vld [vmem:[%s10433_s2 + $0x58c] sm:$0xf]  ;;  %v5160_v15 = vor.u32 %v6667_v11, %v5157_v14 }
  0xae   :  { %v5000_v3 = vor.u32 %v6627_v36, %v4997_v37  ;;  %v6687_v9 = vld [vmem:[%s10433_s2 + $0x40c] sm:$0xf]  ;;  %v5237_v11 = vld [vmem:[%s10433_s2 + $0x418] sm:$0xf0] }
  0xaf   :  { %v6719_v14 = vld [vmem:[%s10433_s2 + $0x50c] sm:$0xf] }
  0xb0   :  { %1736 = vmatpush.bf16.msra.mxu0 %v5208_v17  ;;  %v1350_v40 = vpop.f32.mrf.mxu2  ;;  %1754 = vmatpush.bf16.msra.mxu1 %v5336_v31  ;;  %v4984_v17 = vor.u32 %v6623_v0, %v4981_v4  ;;  %v5413_v31 = vld [vmem:[%s10433_s2 + $0x578] sm:$0xf0]  ;;  %v6655_v0 = vld [vmem:[%s10433_s2 + $0x30c] sm:$0xf] }
  0xb1   :  { %1719 = vmatpush.bf16.msrb.mxu3 %v5064_v34  ;;  %1705 = vmatpush.bf16.msrb.mxu2 %v4872_v1  ;;  %v5192_v34 = vor.u32 %v6675_v28, %v5189_v32  ;;  %v1351_v54 = vadd.f32 %v1350_v40, %v1333_v24  ;;  %v5176_v1 = vor.u32 %v6671_v53, %v5173_v61  ;;  %v6699_v24 = vld [vmem:[%s10433_s2 + $0x46c] sm:$0xf]  ;;  %v5141_v32 = vld [vmem:[%s10433_s2 + $0x358] sm:$0xf0] }
  0xb2   :  { %v1368_v57 = vpop.f32.mrf.mxu3  ;;  %v1317_v58 = vpop.f32.mrf.mxu0  ;;  %v5288_v37 = vor.u32 %v6699_v24, %v5285_v25  ;;  %v5416_v40 = vor.u32 %v6731_v30, %v5413_v31  ;;  %v6727_v53 = vld [vmem:[%s10433_s2 + $0x54c] sm:$0xf]  ;;  %v5381_v4 = vld [vmem:[%s10433_s2 + $0x538] sm:$0xf0] }
  0xb3   :  { %v1335_v63 = vpop.f32.mrf.mxu1  ;;  %v8413_v2 = vadd.f32 %v1368_v57, %v1351_v54  ;;  %v5397_v54 = vld [vmem:[%s10433_s2 + $0x558] sm:$0xf0] }
  0xb4   :  { %1737 = vmatpush.bf16.msra.mxu0 %v5192_v34  ;;  %1755 = vmatpush.bf16.msra.mxu1 %v5320_v6  ;;  %v5125_v57 = vld [vmem:[%s10433_s2 + $0x338] sm:$0xf0]  ;;  %v5400_v61 = vor.u32 %v6727_v53, %v5397_v54  ;;  %v5627_v53 = vld [vmem:[%s10435_s4 + $0xf0] sm:$0xf]  ;;  %v6785_v54 = vld [vmem:[%s10435_s4 + $0xf4] sm:$0xf0] }
  0xb5   :  { %1720 = vmatpush.bf16.msrb.mxu3 %v5048_v62  ;;  %1706 = vmatpush.bf16.msrb.mxu2 %v4856_v23  ;;  %v1318_v62 = vadd.f32 %v1317_v58, %v8279_v22  ;;  %v5493_v22 = vld [vmem:[%s10433_s2 + $0x618] sm:$0xf0]  ;;  %v5432_v23 = vor.u32 %v6735_v12, %v5429_v13  ;;  %v5128_v58 = vor.u32 %v6659_v49, %v5125_v57  ;;  %v5563_v12 = vld [vmem:[%s10435_s4 + $0x70] sm:$0xf]  ;;  %v6769_v13 = vld [vmem:[%s10435_s4 + $0x74] sm:$0xf0] }
  0xb6   :  { %v5628_v57 = vor.u32 %v6785_v54, %v5627_v53  ;;  %v6764_v53 = vld [vmem:[%s10435_s4 + $0x54] sm:$0xf]  ;;  %v5549_v54 = vld [vmem:[%s10435_s4 + $0x58] sm:$0xf0] }
  0xb7   :  { %v1336_v7 = vadd.f32 %v1335_v63, %v1318_v62  ;;  %v6691_v62 = vld [vmem:[%s10433_s2 + $0x42c] sm:$0xf]  ;;  %v5253_v63 = vld [vmem:[%s10433_s2 + $0x438] sm:$0xf0] }
  0xb8   :  { %1738 = vmatpush.bf16.msra.mxu0 %v5176_v1  ;;  %v1353_v19 = vpop.f32.mrf.mxu2  ;;  %1756 = vmatpush.bf16.msra.mxu1 %v5304_v18  ;;  %v5240_v18 = vor.u32 %v6687_v9, %v5237_v11  ;;  %v6757_v11 = vld [vmem:[%s10435_s4 + $0x14] sm:$0xf0] }
  0xb9   :  { %1721 = vmatpush.bf16.msrb.mxu3 %v5032_v21  ;;  %1771 = vmatpush.bf16.msra.mxu2 %v5480_v27  ;;  %v5496_v21 = vor.u32 %v6751_v5, %v5493_v22  ;;  %v1354_v27 = vadd.f32 %v1353_v19, %v1336_v7  ;;  %v5109_v5 = vld [vmem:[%s10433_s2 + $0x318] sm:$0xf0]  ;;  %v5256_v7 = vor.u32 %v6691_v62, %v5253_v63 }
  0xba   :  { %1604 = vmatmul.bf16.gmra.mxu0 %v7541_v39  ;;  %1622 = vmatmul.bf16.gmra.mxu1 %v7549_v42  ;;  %v1371_v28 = vpop.f32.mrf.mxu3  ;;  %v1319_v29 = vpop.f32.mrf.mxu0 }
  0xbb   :  { %1640 = vmatmul.bf16.gmra.mxu2 %v7785_v46  ;;  %1658 = vmatmul.bf16.gmra.mxu3 %v7787_v48  ;;  %v1337_v34 = vpop.f32.mrf.mxu1  ;;  %v8464_v36 = vadd.f32 %v1371_v28, %v1354_v27  ;;  %v5547_v28 = vld [vmem:[%s10435_s4 + $0x50] sm:$0xf]  ;;  %v6765_v29 = vld [vmem:[%s10435_s4 + $0x54] sm:$0xf0] }
  0xbc   :  { %1739 = vmatpush.bf16.msra.mxu0 %v5160_v15  ;;  %1757 = vmatpush.bf16.msra.mxu1 %v5288_v37  ;;  %v5365_v15 = vld [vmem:[%s10433_s2 + $0x518] sm:$0xf0]  ;;  %v5548_v30 = vor.u32 %v6765_v29, %v5547_v28 }
  0xbd   :  { %1722 = vmatpush.bf16.msrb.mxu3 %v5016_v35  ;;  %1772 = vmatpush.bf16.msra.mxu2 %v5464_v41  ;;  %v5144_v35 = vor.u32 %v6663_v26, %v5141_v32  ;;  %v6695_v41 = vld [vmem:[%s10433_s2 + $0x44c] sm:$0xf]  ;;  %v5368_v19 = vor.u32 %v6719_v14, %v5365_v15  ;;  %v6779_v14 = vld [vmem:[%s10435_s4 + $0xc4] sm:$0xf0]  ;;  %v5565_v28 = vld [vmem:[%s10435_s4 + $0x78] sm:$0xf0] }
  0xbe   :  { %v5272_v59 = vor.u32 %v6695_v41, %v5269_v43 }
  0xc0   :  { %1740 = vmatpush.bf16.msra.mxu0 %v5144_v35  ;;  %v1355_v60 = vpop.f32.mrf.mxu2  ;;  %1758 = vmatpush.bf16.msra.mxu1 %v5272_v59 }
  0xc1   :  { %1723 = vmatpush.bf16.msrb.mxu3 %v5000_v3  ;;  %1773 = vmatpush.bf16.msra.mxu2 %v5448_v8  ;;  %v6723_v3 = vld [vmem:[%s10433_s2 + $0x52c] sm:$0xf]  ;;  %v5112_v8 = vor.u32 %v6655_v0, %v5109_v5  ;;  %v5531_v60 = vld [vmem:[%s10435_s4 + $0x30] sm:$0xf]  ;;  %v5619_v0 = vld [vmem:[%s10435_s4 + $0xe0] sm:$0xf] }
  0xc2   :  { %v1373_v1 = vpop.f32.mrf.mxu3  ;;  %v5384_v10 = vor.u32 %v6723_v3, %v5381_v4  ;;  %s7134_s2 = smov 56  }
  0xc3   :  { %v6783_v1 = vld [vmem:[%s10435_s4 + $0xe4] sm:$0xf0] }
  0xc4   :  { %1741 = vmatpush.bf16.msra.mxu0 %v5128_v58  ;;  %1759 = vmatpush.bf16.msra.mxu1 %v5256_v7  ;;  %v5620_v3 = vor.u32 %v6783_v1, %v5619_v0  ;;  %v5611_v7 = vld [vmem:[%s10435_s4 + $0xd0] sm:$0xf] }
  0xc5   :  { %1724 = vmatpush.bf16.msrb.mxu3 %v4984_v17  ;;  %1774 = vmatpush.bf16.msra.mxu2 %v5432_v23  ;;  %v5564_v17 = vor.u32 %v6769_v13, %v5563_v12  ;;  %v5603_v13 = vld [vmem:[%s10435_s4 + $0xc0] sm:$0xf] }
  0xc6   :  { %v5604_v15 = vor.u32 %v6779_v14, %v5603_v13 }
  0xc7   :  { %v1384_v22 = vpop.f32.mrf.mxu0  ;;  %v1402_v6 = vpop.f32.mrf.mxu1 }
  0xc8   :  { %1742 = vmatpush.bf16.msra.mxu0 %v5112_v8  ;;  %1760 = vmatpush.bf16.msra.mxu1 %v5240_v18  ;;  %v6781_v8 = vld [vmem:[%s10435_s4 + $0xd4] sm:$0xf0]  ;;  %v6755_v18 = vld [vmem:[%s10435_s4 + $0x4] sm:$0xf0] }
  0xc9   :  { %1796 = vmatpush.bf16.msra.mxu3 %v5496_v21  ;;  %1775 = vmatpush.bf16.msra.mxu2 %v5416_v40  ;;  %v6767_v21 = vld [vmem:[%s10435_s4 + $0x64] sm:$0xf0]  ;;  %v5612_v9 = vor.u32 %v6781_v8, %v5611_v7  ;;  %v6760_v7 = vld [vmem:[%s10435_s4 + $0x34] sm:$0xf]  ;;  %v5533_v8 = vld [vmem:[%s10435_s4 + $0x38] sm:$0xf0] }
  0xca   :  { %5501 = vmatmul.msk.bf16.vlgmr.msrb.gmra.mxu0 %vm1296_vm0, %v7685_v50  ;;  %1689 = vmatmul.bf16.vlgmr.msrb.gmra.mxu1 %v7429_v47  ;;  %v5555_v47 = vld [vmem:[%s10435_s4 + $0x60] sm:$0xf] }
  0xcb   :  { %1707 = vmatmul.bf16.vlgmr.msrb.gmra.mxu2 %v7437_v51  ;;  %1725 = vmatmul.bf16.vlgmr.msrb.gmra.mxu3 %v7439_v52  ;;  %v5556_v51 = vor.u32 %v6767_v21, %v5555_v47  ;;  %v1385_v52 = vadd.f32 %v1384_v22, %v8365_v20  ;;  %v5539_v20 = vld [vmem:[%s10435_s4 + $0x40] sm:$0xf] }
  0xcc   :  { %2139 = vmatpush.bf16.msrb.mxu0 %v5564_v17  ;;  %2157 = vmatpush.bf16.msrb.mxu1 %v5628_v57  ;;  %v5507_v17 = vld [vmem:[%s10435_s4] sm:$0xf]  ;;  %v5552_v57 = vor.u32 %v6764_v53, %v5549_v54 }
  0xcd   :  { %1776 = vmatpush.bf16.msra.mxu2 %v5400_v61  ;;  %v1403_v31 = vadd.f32 %v1402_v6, %v1385_v52  ;;  %v6761_v61 = vld [vmem:[%s10435_s4 + $0x34] sm:$0xf0]  ;;  %v5508_v21 = vor.u32 %v6755_v18, %v5507_v17  ;;  %v5595_v52 = vld [vmem:[%s10435_s4 + $0xb0] sm:$0xf] }
  0xce   :  { %v1420_v23 = vpop.f32.mrf.mxu2  ;;  %v8531_v24 = vpop.f32.mrf.mxu3  ;;  %v5532_v62 = vor.u32 %v6761_v61, %v5531_v60  ;;  %v6762_v61 = vld [vmem:[%s10435_s4 + $0x44] sm:$0xf] }
  0xcf   :  { %v1386_v25 = vpop.f32.mrf.mxu0  ;;  %v1404_v26 = vpop.f32.mrf.mxu1  ;;  %v1421_v32 = vadd.f32 %v1420_v23, %v1403_v31  ;;  %v6775_v31 = vld [vmem:[%s10435_s4 + $0xa4] sm:$0xf0] }
  0xd0   :  { %v1387_v27 = vadd.f32 %v1386_v25, %v8413_v2  ;;  %2140 = vmatpush.bf16.msrb.mxu0 %v5556_v51  ;;  %v6763_v2 = vld [vmem:[%s10435_s4 + $0x44] sm:$0xf0]  ;;  %2158 = vmatpush.bf16.msrb.mxu1 %v5620_v3  ;;  %v6777_v25 = vld [vmem:[%s10435_s4 + $0xb4] sm:$0xf0] }
  0xd1   :  { %1777 = vmatpush.bf16.msra.mxu2 %v5384_v10  ;;  %v5540_v40 = vor.u32 %v6763_v2, %v5539_v20  ;;  %v1807_v58 = vmax.f32 %v1421_v32, 0.0  ;;  %v5515_v10 = vld [vmem:[%s10435_s4 + $0x10] sm:$0xf] }
  0xd2   :  { %v1405_v34 = vadd.f32 %v1404_v26, %v1387_v27  ;;  %v5516_v12 = vor.u32 %v6757_v11, %v5515_v10  ;;  %v5596_v26 = vor.u32 %v6777_v25, %v5595_v52  ;;  %v6768_v27 = vld [vmem:[%s10435_s4 + $0x74] sm:$0xf]  ;;  %v5536_v10 = vor.u32 %v6760_v7, %v5533_v8  ;;  %v6782_v11 = vld [vmem:[%s10435_s4 + $0xe4] sm:$0xf]  ;;  %v5517_v25 = vld [vmem:[%s10435_s4 + $0x18] sm:$0xf0] }
  0xd3   :  { %v5568_v29 = vor.u32 %v6768_v27, %v5565_v28  ;;  %v6756_v52 = vld [vmem:[%s10435_s4 + $0x14] sm:$0xf]  ;;  %v6778_v28 = vld [vmem:[%s10435_s4 + $0xc4] sm:$0xf] }
  0xd4   :  { %2141 = vmatpush.bf16.msrb.mxu0 %v5548_v30  ;;  %2159 = vmatpush.bf16.msrb.mxu1 %v5612_v9  ;;  %v5587_v30 = vld [vmem:[%s10435_s4 + $0xa0] sm:$0xf]  ;;  %v250_v9 = vperm.slane %v8270_v16, 1  ;;  %v5520_v27 = vor.u32 %v6756_v52, %v5517_v25  ;;  %v6799_v25 = vld [vmem:[%s10435_s4 + $0x164] sm:$0xf0] }
  0xd5   :  { %1778 = vmatpush.bf16.msra.mxu2 %v5368_v19  ;;  %v5588_v32 = vor.u32 %v6775_v31, %v5587_v30  ;;  %v5683_v52 = vld [vmem:[%s10435_s4 + $0x160] sm:$0xf] }
  0xd6   :  { %v1422_v35 = vpop.f32.mrf.mxu2  ;;  %v8547_v37 = vpop.f32.mrf.mxu3 }
  0xd7   :  { %v1423_v41 = vadd.f32 %v1422_v35, %v1405_v34  ;;  %v8549_v43 = vpop.f32.mrf.mxu0  ;;  %v8551_v49 = vpop.f32.mrf.mxu1  ;;  %v5579_v35 = vld [vmem:[%s10435_s4 + $0x90] sm:$0xf] }
  0xd8   :  { %2142 = vmatpush.bf16.msrb.mxu0 %v5540_v40  ;;  %2160 = vmatpush.bf16.msrb.mxu1 %v5604_v15  ;;  %v6773_v40 = vld [vmem:[%s10435_s4 + $0x94] sm:$0xf0] }
  0xd9   :  { %v1811_v59 = vmax.f32 %v1423_v41, 0.0  ;;  %v5580_v41 = vor.u32 %v6773_v40, %v5579_v35 }
  0xda   :  { %5502 = vmatmul.msk.bf16.gmra.mxu0 %vm1296_vm0, %v7798_v56  ;;  %1694 = vmatmul.bf16.gmra.mxu1 %v7528_v33  ;;  %v5523_v33 = vld [vmem:[%s10435_s4 + $0x20] sm:$0xf] }
  0xdb   :  { %v8568_v63 = vpack.c.bf16 %v1811_v59, %v1807_v58  ;;  %1712 = vmatmul.bf16.gmra.mxu2 %v7539_v38  ;;  %1730 = vmatmul.bf16.gmra.mxu3 %v7541_v39  ;;  %v6759_v38 = vld [vmem:[%s10435_s4 + $0x24] sm:$0xf0]  ;;  %v5571_v58 = vld [vmem:[%s10435_s4 + $0x80] sm:$0xf] }
  0xdc   :  { %2143 = vmatpush.bf16.msrb.mxu0 %v5532_v62  ;;  %v5524_v5 = vor.u32 %v6759_v38, %v5523_v33  ;;  %2161 = vmatpush.bf16.msrb.mxu1 %v5596_v26  ;;  %v6771_v59 = vld [vmem:[%s10435_s4 + $0x84] sm:$0xf0]  ;;  %v5541_v62 = vld [vmem:[%s10435_s4 + $0x48] sm:$0xf0]  ;;  %v1441_v26 = vadd.f32 %v8547_v37, %v250_v9 }
  0xdd   :  { %v5572_v60 = vor.u32 %v6771_v59, %v5571_v58  ;;  %v5544_v3 = vor.u32 %v6762_v61, %v5541_v62  ;;  %v5509_v37 = vld [vmem:[%s10435_s4 + $0x8] sm:$0xf0]  ;;  %v6774_v59 = vld [vmem:[%s10435_s4 + $0xa4] sm:$0xf] }
  0xde   :  { %v8584_v39 = vpop.f32.mrf.mxu2  ;;  %v8586_v4 = vpop.f32.mrf.mxu3 }
  0xdf   :  { %v1391_v22 = vpop.f32.mrf.mxu0  ;;  %v1409_v6 = vpop.f32.mrf.mxu1 }
  0xe0   :  { %2144 = vmatpush.bf16.msrb.mxu0 %v5524_v5  ;;  %2162 = vmatpush.bf16.msrb.mxu1 %v5588_v32  ;;  %v6784_v5 = vld [vmem:[%s10435_s4 + $0xf4] sm:$0xf]  ;;  %v5629_v22 = vld [vmem:[%s10435_s4 + $0xf8] sm:$0xf0]  ;;  %v6754_v32 = vld [vmem:[%s10435_s4 + $0x4] sm:$0xf] }
  0xe1   :  { %v5632_v6 = vor.u32 %v6784_v5, %v5629_v22  ;;  %v5512_v35 = vor.u32 %v6754_v32, %v5509_v37 }
  0xe4   :  { %2145 = vmatpush.bf16.msrb.mxu0 %v5516_v12  ;;  %2163 = vmatpush.bf16.msrb.mxu1 %v5580_v41  ;;  %v5621_v12 = vld [vmem:[%s10435_s4 + $0xe8] sm:$0xf0] }
  0xe5   :  { %v5624_v13 = vor.u32 %v6782_v11, %v5621_v12  ;;  %v5573_v11 = vld [vmem:[%s10435_s4 + $0x88] sm:$0xf0] }
  0xe6   :  { %v1427_v19 = vpop.f32.mrf.mxu2  ;;  %v1445_v47 = vpop.f32.mrf.mxu3 }
  0xe7   :  { %v8612_v23 = vpop.f32.mrf.mxu0  ;;  %v8614_v51 = vpop.f32.mrf.mxu1  ;;  %v6780_v19 = vld [vmem:[%s10435_s4 + $0xd4] sm:$0xf]  ;;  %v5613_v47 = vld [vmem:[%s10435_s4 + $0xd8] sm:$0xf0] }
  0xe8   :  { %2146 = vmatpush.bf16.msrb.mxu0 %v5508_v21  ;;  %2164 = vmatpush.bf16.msrb.mxu1 %v5572_v60  ;;  %v1444_v60 = vadd.f32 %v8586_v4, %v250_v9  ;;  %v5581_v4 = vld [vmem:[%s10435_s4 + $0x98] sm:$0xf0] }
  0xea   :  { %1743 = vmatmul.bf16.vlgmr.msra.gmra.mxu0 %v7447_v55  ;;  %1761 = vmatmul.bf16.vlgmr.msra.gmra.mxu1 %v7672_v44  ;;  %v6766_v55 = vld [vmem:[%s10435_s4 + $0x64] sm:$0xf]  ;;  %v5557_v44 = vld [vmem:[%s10435_s4 + $0x68] sm:$0xf0] }
  0xeb   :  { %1779 = vmatmul.bf16.vlgmr.msra.gmra.mxu2 %v7674_v45  ;;  %5503 = vmatmul.msk.bf16.vlgmr.msra.gmra.mxu3 %vm1296_vm0, %v7685_v50  ;;  %v5560_v34 = vor.u32 %v6766_v55, %v5557_v44 }
  0xec   :  { %2211 = vmatpush.bf16.msra.mxu0 %v5568_v29  ;;  %2229 = vmatpush.bf16.msra.mxu1 %v5632_v6  ;;  %v6772_v6 = vld [vmem:[%s10435_s4 + $0x94] sm:$0xf] }
  0xee   :  { %v8645_v45 = vpop.f32.mrf.mxu2  ;;  %v8647_v50 = vpop.f32.mrf.mxu3 }
  0xef   :  { %v1458_v20 = vpop.f32.mrf.mxu0  ;;  %v8649_v2 = vpop.f32.mrf.mxu1 }
  0xf0   :  { %2212 = vmatpush.bf16.msra.mxu0 %v5560_v34  ;;  %2230 = vmatpush.bf16.msra.mxu1 %v5624_v13  ;;  %v1459_v30 = vadd.f32 %v1458_v20, %v1441_v26  ;;  %v5597_v20 = vld [vmem:[%s10435_s4 + $0xb8] sm:$0xf0] }
  0xf2   :  { %v1477_v53 = vadd.f32 %v8649_v2, %v1459_v30  ;;  %v5589_v2 = vld [vmem:[%s10435_s4 + $0xa8] sm:$0xf0] }
  0xf3   :  { %v5592_v62 = vor.u32 %v6774_v59, %v5589_v2  ;;  %v6791_v59 = vld [vmem:[%s10435_s4 + $0x124] sm:$0xf0] }
  0xf4   :  { %2213 = vmatpush.bf16.msra.mxu0 %v5552_v57 }
  0xf6   :  { %v8675_v0 = vpop.f32.mrf.mxu2  ;;  %v8677_v1 = vpop.f32.mrf.mxu3 }
  0xf7   :  { %v8679_v33 = vpop.f32.mrf.mxu0  ;;  %v8681_v38 = vpop.f32.mrf.mxu1  ;;  %v1495_v58 = vadd.f32 %v8675_v0, %v1477_v53 }
  0xf8   :  { %2214 = vmatpush.bf16.msra.mxu0 %v5544_v3 }
  0xfa   :  { %1748 = vmatmul.bf16.gmra.mxu0 %v7549_v42  ;;  %1766 = vmatmul.bf16.gmra.mxu1 %v7785_v46  ;;  %v6758_v42 = vld [vmem:[%s10435_s4 + $0x24] sm:$0xf]  ;;  %v5525_v46 = vld [vmem:[%s10435_s4 + $0x28] sm:$0xf0] }
  0xfb   :  { %1784 = vmatmul.bf16.gmra.mxu2 %v7787_v48  ;;  %5504 = vmatmul.msk.bf16.gmra.mxu3 %vm1296_vm0, %v7798_v56  ;;  %v1439_v48 = vadd.f32 %v8531_v24, %v250_v9  ;;  %v5528_v15 = vor.u32 %v6758_v42, %v5525_v46  ;;  %v5616_v24 = vor.u32 %v6780_v19, %v5613_v47 }
  0xfc   :  { %2215 = vmatpush.bf16.msra.mxu0 %v5536_v10  ;;  %v6770_v10 = vld [vmem:[%s10435_s4 + $0x84] sm:$0xf] }
  0xfd   :  { %v1457_v21 = vadd.f32 %v8612_v23, %v1439_v48  ;;  %v5605_v23 = vld [vmem:[%s10435_s4 + $0xc8] sm:$0xf0]  ;;  %2231 = vmatpush.bf16.msra.mxu1 %v5616_v24  ;;  %v5576_v46 = vor.u32 %v6770_v10, %v5573_v11  ;;  %v6801_v48 = vld [vmem:[%s10435_s4 + $0x174] sm:$0xf0]  ;;  %v251_v10 = vperm.slane %v8270_v16, 2 }
  0xfe   :  { %v8714_v56 = vpop.f32.mrf.mxu2  ;;  %v8716_v14 = vpop.f32.mrf.mxu3  ;;  %v5608_v31 = vor.u32 %v6778_v28, %v5605_v23  ;;  %v6797_v28 = vld [vmem:[%s10435_s4 + $0x154] sm:$0xf0]  ;;  %v6798_v11 = vld [vmem:[%s10435_s4 + $0x164] sm:$0xf]  ;;  %v6796_v16 = vld [vmem:[%s10435_s4 + $0x154] sm:$0xf] }
  0xff   :  { %v1463_v17 = vpop.f32.mrf.mxu0  ;;  %v1481_v18 = vpop.f32.mrf.mxu1  ;;  %v1475_v29 = vadd.f32 %v8614_v51, %v1457_v21  ;;  %v6776_v51 = vld [vmem:[%s10435_s4 + $0xb4] sm:$0xf] }
 0x100   :  { %2216 = vmatpush.bf16.msra.mxu0 %v5528_v15  ;;  %v5600_v54 = vor.u32 %v6776_v51, %v5597_v20 }
 0x101   :  { %v1493_v55 = vadd.f32 %v8645_v45, %v1475_v29  ;;  %2232 = vmatpush.bf16.msra.mxu1 %v5608_v31  ;;  %v1390_v45 = vadd.f32 %v8549_v43, %v8464_v36  ;;  %v1513_v43 = vadd.f32 %v8677_v1, %v1495_v58  ;;  %v5651_v58 = vld [vmem:[%s10435_s4 + $0x120] sm:$0xf] }
 0x102   :  { %v5652_v2 = vor.u32 %v6791_v59, %v5651_v58 }
 0x103   :  { %v1511_v57 = vadd.f32 %v8647_v50, %v1493_v55  ;;  %v1408_v36 = vadd.f32 %v8551_v49, %v1390_v45  ;;  %v1462_v50 = vadd.f32 %v8679_v33, %v1444_v60  ;;  %v5584_v33 = vor.u32 %v6772_v6, %v5581_v4  ;;  %v5667_v55 = vld [vmem:[%s10435_s4 + $0x140] sm:$0xf]  ;;  %v5643_v60 = vld [vmem:[%s10435_s4 + $0x110] sm:$0xf]  ;;  %v6800_v4 = vld [vmem:[%s10435_s4 + $0x174] sm:$0xf] }
 0x104   :  { %2217 = vmatpush.bf16.msra.mxu0 %v5520_v27  ;;  %v5684_v27 = vor.u32 %v6799_v25, %v5683_v52 }
 0x105   :  { %2233 = vmatpush.bf16.msra.mxu1 %v5600_v54  ;;  %v1426_v49 = vadd.f32 %v8584_v39, %v1408_v36  ;;  %v1480_v8 = vadd.f32 %v8681_v38, %v1462_v50  ;;  %v5691_v38 = vld [vmem:[%s10435_s4 + $0x170] sm:$0xf] }
 0x106   :  { %v1499_v44 = vpop.f32.mrf.mxu2  ;;  %v1517_v34 = vpop.f32.mrf.mxu3  ;;  %v5692_v19 = vor.u32 %v6801_v48, %v5691_v38 }
 0x107   :  { %v1528_v40 = vpop.f32.mrf.mxu0  ;;  %v1546_v41 = vpop.f32.mrf.mxu1  ;;  %v1815_v12 = vmax.f32 %v1426_v49, 0.0  ;;  %v1498_v13 = vadd.f32 %v8714_v56, %v1480_v8  ;;  %v6795_v44 = vld [vmem:[%s10435_s4 + $0x144] sm:$0xf0]  ;;  %v5693_v49 = vld [vmem:[%s10435_s4 + $0x178] sm:$0xf0] }
 0x108   :  { %2218 = vmatpush.bf16.msra.mxu0 %v5512_v35  ;;  %v1529_v61 = vadd.f32 %v1528_v40, %v1511_v57  ;;  %2175 = vmatpush.bf16.msrb.mxu2 %v5692_v19  ;;  %v5668_v35 = vor.u32 %v6795_v44, %v5667_v55  ;;  %v5659_v40 = vld [vmem:[%s10435_s4 + $0x130] sm:$0xf] }
 0x109   :  { %2234 = vmatpush.bf16.msra.mxu1 %v5592_v62  ;;  %v8799_v21 = vpack.c.bf16 %v1815_v12, %v1815_v12  ;;  %v1516_v24 = vadd.f32 %v8716_v14, %v1498_v13  ;;  %v5675_v14 = vld [vmem:[%s10435_s4 + $0x150] sm:$0xf]  ;;  %v5685_v12 = vld [vmem:[%s10435_s4 + $0x168] sm:$0xf0] }
 0x10a   :  { %2147 = vmatmul.bf16.vlgmr.msrb.gmra.mxu0 %v8568_v63  ;;  %v1547_v7 = vadd.f32 %v1546_v41, %v1529_v61  ;;  %v5676_v31 = vor.u32 %v6797_v28, %v5675_v14  ;;  %v6793_v41 = vld [vmem:[%s10435_s4 + $0x134] sm:$0xf0]  ;;  %v5688_v13 = vor.u32 %v6798_v11, %v5685_v12  ;;  %v6792_v14 = vld [vmem:[%s10435_s4 + $0x134] sm:$0xf]  ;;  %v5661_v28 = vld [vmem:[%s10435_s4 + $0x138] sm:$0xf0] }
 0x10b   :  { %v5660_v54 = vor.u32 %v6793_v41, %v5659_v40  ;;  %v6789_v61 = vld [vmem:[%s10435_s4 + $0x114] sm:$0xf0]  ;;  %v5653_v40 = vld [vmem:[%s10435_s4 + $0x128] sm:$0xf0] }
 0x10c   :  { %v1808_v42 = vmax.f32 %v1547_v7, 0.0  ;;  %2176 = vmatpush.bf16.msrb.mxu2 %v5684_v27 }
 0x10d   :  { %2235 = vmatpush.bf16.msra.mxu1 %v5584_v33  ;;  %v5696_v33 = vor.u32 %v6800_v4, %v5693_v49 }
 0x10e   :  { %v8768_v0 = vpop.f32.mrf.mxu2  ;;  %v8770_v3 = vpop.f32.mrf.mxu3 }
 0x10f   :  { %v1530_v5 = vpop.f32.mrf.mxu0  ;;  %v1548_v22 = vpop.f32.mrf.mxu1 }
 0x110   :  { %v1531_v1 = vadd.f32 %v1530_v5, %v1513_v43  ;;  %2177 = vmatpush.bf16.msrb.mxu2 %v5676_v31  ;;  %v5644_v43 = vor.u32 %v6789_v61, %v5643_v60 }
 0x111   :  { %2236 = vmatpush.bf16.msra.mxu1 %v5576_v46 }
 0x112   :  { %v1549_v9 = vadd.f32 %v1548_v22, %v1531_v1  ;;  %v6787_v22 = vld [vmem:[%s10435_s4 + $0x104] sm:$0xf0] }
 0x114   :  { %v1812_v39 = vmax.f32 %v1549_v9, 0.0  ;;  %2178 = vmatpush.bf16.msrb.mxu2 %v5668_v35  ;;  %v6790_v35 = vld [vmem:[%s10435_s4 + $0x124] sm:$0xf] }
 0x116   :  { %v8793_v15 = vpack.c.bf16 %v1812_v39, %v1808_v42  ;;  %v8795_v17 = vpop.f32.mrf.mxu2  ;;  %v8797_v18 = vpop.f32.mrf.mxu3  ;;  %v1565_v42 = vadd.f32 %v8768_v0, %v251_v10  ;;  %v5677_v39 = vld [vmem:[%s10435_s4 + $0x158] sm:$0xf0]  ;;  %v5699_v0 = vld [vmem:[%s10435_s4 + $0x180] sm:$0xf] }
 0x117   :  { %v1533_v56 = vpop.f32.mrf.mxu0  ;;  %v1551_v47 = vpop.f32.mrf.mxu1  ;;  %v1567_v46 = vadd.f32 %v8795_v17, %v251_v10  ;;  %v6794_v17 = vld [vmem:[%s10435_s4 + $0x144] sm:$0xf] }
 0x118   :  { %2165 = vmatmul.bf16.vlgmr.msrb.gmra.mxu1 %v8793_v15  ;;  %v1534_v26 = vadd.f32 %v1533_v56, %v1516_v24  ;;  %2179 = vmatpush.bf16.msrb.mxu2 %v5660_v54 }
 0x119   :  { %v1585_v24 = vadd.f32 %v8797_v18, %v1567_v46  ;;  %v6802_v46 = vld [vmem:[%s10435_s4 + $0x184] sm:$0xf] }
 0x11a   :  { %2152 = vmatmul.bf16.gmra.mxu0 %v8799_v21  ;;  %v1552_v23 = vadd.f32 %v1551_v47, %v1534_v26  ;;  %v1583_v47 = vadd.f32 %v8770_v3, %v1565_v42  ;;  %v5669_v3 = vld [vmem:[%s10435_s4 + $0x148] sm:$0xf0]  ;;  %v7104_v42 = vld [vmem:[%s10434_s3] sm:$0xf] }
 0x11b   :  { %v5672_v26 = vor.u32 %v6794_v17, %v5669_v3 }
 0x11c   :  { %v1816_v34 = vmax.f32 %v1552_v23, 0.0  ;;  %2180 = vmatpush.bf16.msrb.mxu2 %v5652_v2 }
 0x11e   :  { %v8816_v29 = vpop.f32.mrf.mxu2  ;;  %v8818_v30 = vpop.f32.mrf.mxu3  ;;  %v8832_v51 = vpack.c.bf16 %v1816_v34, %v1816_v34 }
 0x11f   :  { %v1535_v32 = vpop.f32.mrf.mxu0  ;;  %v1553_v37 = vpop.f32.mrf.mxu1  ;;  %v1570_v41 = vadd.f32 %v8816_v29, %v251_v10 }
 0x120   :  { %2181 = vmatpush.bf16.msrb.mxu2 %v5644_v43  ;;  %v5664_v32 = vor.u32 %v6792_v14, %v5661_v28 }
 0x126   :  { %v1571_v20 = vpop.f32.mrf.mxu2  ;;  %v1589_v53 = vpop.f32.mrf.mxu3 }
 0x127   :  { %v1600_v45 = vpop.f32.mrf.mxu0  ;;  %v1618_v57 = vpop.f32.mrf.mxu1  ;;  %v5656_v53 = vor.u32 %v6790_v35, %v5653_v40 }
 0x128   :  { %2170 = vmatmul.bf16.gmra.mxu1 %v8832_v51  ;;  %v1601_v52 = vadd.f32 %v1600_v45, %v1583_v47  ;;  %v5645_v45 = vld [vmem:[%s10435_s4 + $0x118] sm:$0xf0] }
 0x12a   :  { %2219 = vmatmul.bf16.vlgmr.msra.gmra.mxu0 %v8568_v63  ;;  %v5635_v63 = vld [vmem:[%s10435_s4 + $0x100] sm:$0xf]  ;;  %v1619_v23 = vadd.f32 %v1618_v57, %v1601_v52  ;;  %v1588_v57 = vadd.f32 %v8818_v30, %v1570_v41 }
 0x12b   :  { %v5636_v6 = vor.u32 %v6787_v22, %v5635_v63 }
 0x12d   :  { %2182 = vmatpush.bf16.msrb.mxu2 %v5636_v6 }
 0x12e   :  { %v1636_v62 = vpop.f32.mrf.mxu2  ;;  %v8848_v36 = vpop.f32.mrf.mxu3 }
 0x12f   :  { %v1602_v50 = vpop.f32.mrf.mxu0  ;;  %v1620_v5 = vpop.f32.mrf.mxu1  ;;  %v1637_v44 = vadd.f32 %v1636_v62, %v1619_v23 }
 0x130   :  { %v1603_v27 = vadd.f32 %v1602_v50, %v1585_v24  ;;  %v6786_v50 = vld [vmem:[%s10435_s4 + $0x104] sm:$0xf] }
 0x131   :  { %2247 = vmatpush.bf16.msra.mxu2 %v5696_v33  ;;  %v1655_v54 = vadd.f32 %v8848_v36, %v1637_v44 }
 0x132   :  { %v1621_v34 = vadd.f32 %v1620_v5, %v1603_v27  ;;  %v5637_v5 = vld [vmem:[%s10435_s4 + $0x108] sm:$0xf0] }
 0x133   :  { %v5640_v22 = vor.u32 %v6786_v50, %v5637_v5 }
 0x135   :  { %2248 = vmatpush.bf16.msra.mxu2 %v5688_v13 }
 0x136   :  { %v1638_v7 = vpop.f32.mrf.mxu2  ;;  %v1656_v1 = vpop.f32.mrf.mxu3 }
 0x137   :  { %v1605_v8 = vpop.f32.mrf.mxu0  ;;  %v8862_v9 = vpop.f32.mrf.mxu1  ;;  %v1639_v20 = vadd.f32 %v1638_v7, %v1621_v34 }
 0x138   :  { %2237 = vmatmul.bf16.vlgmr.msra.gmra.mxu1 %v8793_v15  ;;  %v5680_v15 = vor.u32 %v6796_v16, %v5677_v39  ;;  %v1606_v43 = vadd.f32 %v1605_v8, %v1588_v57  ;;  %v252_v16 = vperm.slane %v7104_v42, 3 }
 0x139   :  { %v1657_v58 = vadd.f32 %v1656_v1, %v1639_v20 }
 0x13a   :  { %2224 = vmatmul.bf16.gmra.mxu0 %v8799_v21  ;;  %2249 = vmatpush.bf16.msra.mxu2 %v5680_v15  ;;  %v6803_v21 = vld [vmem:[%s10435_s4 + $0x184] sm:$0xf0]  ;;  %v1624_v6 = vadd.f32 %v8862_v9, %v1606_v43 }
 0x13b   :  { %v5700_v25 = vor.u32 %v6803_v21, %v5699_v0 }
 0x13d   :  { %2200 = vmatpush.bf16.msrb.mxu3 %v5700_v25 }
 0x13e   :  { %v1641_v38 = vpop.f32.mrf.mxu2  ;;  %v8881_v48 = vpop.f32.mrf.mxu3  ;;  %2250 = vmatpush.bf16.msra.mxu2 %v5672_v26 }
 0x13f   :  { %v1607_v19 = vpop.f32.mrf.mxu0  ;;  %v1625_v56 = vpop.f32.mrf.mxu1  ;;  %v1642_v49 = vadd.f32 %v1641_v38, %v1624_v6  ;;  %v5701_v38 = vld [vmem:[%s10435_s4 + $0x188] sm:$0xf0] }
 0x141   :  { %v1660_v10 = vadd.f32 %v8881_v48, %v1642_v49  ;;  %v5704_v48 = vor.u32 %v6802_v46, %v5701_v38 }
 0x142   :  { %2251 = vmatpush.bf16.msra.mxu2 %v5664_v32 }
 0x143   :  { %2272 = vmatpush.bf16.msra.mxu3 %v5704_v48 }
 0x146   :  { %v1643_v18 = vpop.f32.mrf.mxu2  ;;  %v1661_v31 = vpop.f32.mrf.mxu3  ;;  %2252 = vmatpush.bf16.msra.mxu2 %v5656_v53 }
 0x147   :  { %v1672_v37 = vpop.f32.mrf.mxu0  ;;  %v1690_v55 = vpop.f32.mrf.mxu1 }
 0x148   :  { %2242 = vmatmul.bf16.gmra.mxu1 %v8832_v51  ;;  %v6788_v51 = vld [vmem:[%s10435_s4 + $0x114] sm:$0xf]  ;;  %v1673_v59 = vadd.f32 %v1672_v37, %v1655_v54  ;;  %v1691_v19 = vadd.f32 %v1690_v55, %v252_v16 }
 0x149   :  { %v5648_v29 = vor.u32 %v6788_v51, %v5645_v45 }
 0x14a   :  { %v1809_v63 = vmax.f32 %v1673_v59, 0.0 }
 0x14b   :  { %2253 = vmatpush.bf16.msra.mxu2 %v5648_v29 }
 0x14e   :  { %v1708_v2 = vpop.f32.mrf.mxu2  ;;  %v1726_v60 = vpop.f32.mrf.mxu3 }
 0x14f   :  { %v1674_v61 = vpop.f32.mrf.mxu0  ;;  %v1692_v62 = vpop.f32.mrf.mxu1  ;;  %2254 = vmatpush.bf16.msra.mxu2 %v5640_v22  ;;  %v1709_v21 = vadd.f32 %v1708_v2, %v1691_v19 }
 0x150   :  { %v1675_v36 = vadd.f32 %v1674_v61, %v1657_v58  ;;  %v1693_v52 = vadd.f32 %v1692_v62, %v252_v16 }
 0x151   :  { %v1727_v25 = vadd.f32 %v1726_v60, %v1709_v21 }
 0x152   :  { %v1813_v30 = vmax.f32 %v1675_v36, 0.0 }
 0x154   :  { %v1821_v4 = vpack.c.bf16 %v1813_v30, %v1809_v63 }
 0x156   :  { %v1710_v7 = vpop.f32.mrf.mxu2  ;;  %v1728_v1 = vpop.f32.mrf.mxu3  ;;  %2183 = vmatmul.bf16.vlgmr.msrb.gmra.mxu2 %v1821_v4 }
 0x157   :  { %v1677_v33 = vpop.f32.mrf.mxu0  ;;  %v1695_v8 = vpop.f32.mrf.mxu1  ;;  %v1711_v3 = vadd.f32 %v1710_v7, %v1693_v52 }
 0x158   :  { %v1678_v11 = vadd.f32 %v1677_v33, %v1660_v10  ;;  %v1696_v31 = vadd.f32 %v1695_v8, %v252_v16 }
 0x159   :  { %v1729_v28 = vadd.f32 %v1728_v1, %v1711_v3 }
 0x15a   :  { %v1817_v15 = vmax.f32 %v1678_v11, 0.0 }
 0x15c   :  { %v1825_v56 = vpack.c.bf16 %v1817_v15, %v1817_v15 }
 0x15e   :  { %v1713_v12 = vpop.f32.mrf.mxu2  ;;  %v1731_v13 = vpop.f32.mrf.mxu3 }
 0x15f   :  { %v1679_v39 = vpop.f32.mrf.mxu0  ;;  %v1697_v9 = vpop.f32.mrf.mxu1  ;;  %v1714_v44 = vadd.f32 %v1713_v12, %v1696_v31 }
 0x161   :  { %v1732_v51 = vadd.f32 %v1731_v13, %v1714_v44 }
 0x166   :  { %v1715_v47 = vpop.f32.mrf.mxu2  ;;  %v1733_v0 = vpop.f32.mrf.mxu3  ;;  %2188 = vmatmul.bf16.gmra.mxu2 %v1825_v56 }
 0x167   :  { %v1744_v17 = vpop.f32.mrf.mxu0  ;;  %v1762_v24 = vpop.f32.mrf.mxu1 }
 0x168   :  { %v1745_v26 = vadd.f32 %v1744_v17, %v1727_v25 }
 0x16a   :  { %v1763_v32 = vadd.f32 %v1762_v24, %v1745_v26 }
 0x16e   :  { %v1780_v27 = vpop.f32.mrf.mxu2  ;;  %v1798_v14 = vpop.f32.mrf.mxu3 }
 0x16f   :  { %v1746_v23 = vpop.f32.mrf.mxu0  ;;  %v1764_v18 = vpop.f32.mrf.mxu1  ;;  %v1781_v55 = vadd.f32 %v1780_v27, %v1763_v32  ;;  %v6834_v32 = vld [vmem:[%s10437_s6 + $0xec] sm:$0xf0] }
 0x170   :  { %v1747_v37 = vadd.f32 %v1746_v23, %v1729_v28  ;;  %v5831_v28 = vld [vmem:[%s10437_s6 + $0xe8] sm:$0xf]  ;;  %v6835_v23 = vld [vmem:[%s10437_s6 + $0xf4] sm:$0xf0] }
 0x171   :  { %v1799_v41 = vadd.f32 %v1798_v14, %v1781_v55  ;;  %v5832_v31 = vor.u32 %v6835_v23, %v5831_v28  ;;  %v5825_v55 = vld [vmem:[%s10437_s6 + $0xf0] sm:$0xf0] }
 0x172   :  { %v1765_v34 = vadd.f32 %v1764_v18, %v1747_v37  ;;  %v5823_v18 = vld [vmem:[%s10437_s6 + $0xe0] sm:$0xf]  ;;  %v6832_v37 = vld [vmem:[%s10437_s6 + $0xe4] sm:$0xf] }
 0x173   :  { %v1810_v57 = vmax.f32 %v1799_v41, 0.0  ;;  %v5824_v44 = vor.u32 %v6834_v32, %v5823_v18  ;;  %v5815_v41 = vld [vmem:[%s10437_s6 + $0xc8] sm:$0xf]  ;;  %2561 = vmatpush.bf16.msrb.mxu2 %v5832_v31  ;;  %v6819_v31 = vld [vmem:[%s10437_s6 + $0x74] sm:$0xf0] }
 0x174   :  { %v5767_v18 = vld [vmem:[%s10437_s6 + $0x68] sm:$0xf]  ;;  %v5759_v32 = vld [vmem:[%s10437_s6 + $0x60] sm:$0xf] }
 0x175   :  { %2525 = vmatpush.bf16.msrb.mxu0 %v5824_v44  ;;  %v6816_v44 = vld [vmem:[%s10437_s6 + $0x64] sm:$0xf] }
 0x176   :  { %v1782_v35 = vpop.f32.mrf.mxu2  ;;  %v1800_v40 = vpop.f32.mrf.mxu3  ;;  %2255 = vmatmul.bf16.vlgmr.msra.gmra.mxu2 %v1821_v4  ;;  %v1877_v4 = vld [vmem:[%s10436_s5] sm:$0x3] }
 0x177   :  { %v1783_v20 = vadd.f32 %v1782_v35, %v1765_v34  ;;  %v1749_v53 = vpop.f32.mrf.mxu0  ;;  %v1767_v54 = vpop.f32.mrf.mxu1  ;;  %v8943_v7 = vperm.slane %v1877_v4, 0  ;;  %v8955_v38 = vperm.slane %v1877_v4, 1  ;;  %v5828_v34 = vor.u32 %v6832_v37, %v5825_v55  ;;  %v6833_v35 = vld [vmem:[%s10437_s6 + $0xec] sm:$0xf]  ;;  %v6824_v4 = vld [vmem:[%s10437_s6 + $0xa4] sm:$0xf] }
 0x178   :  { %v1750_v59 = vadd.f32 %v1749_v53, %v1732_v51  ;;  %v6831_v53 = vld [vmem:[%s10437_s6 + $0xd4] sm:$0xf0]  ;;  %v6830_v51 = vld [vmem:[%s10437_s6 + $0xcc] sm:$0xf0]  ;;  %v5768_v37 = vor.u32 %v6819_v31, %v5767_v18 }
 0x179   :  { %v1801_v45 = vadd.f32 %v1800_v40, %v1783_v20  ;;  %v5833_v40 = vld [vmem:[%s10437_s6 + $0xf8] sm:$0xf0]  ;;  %2543 = vmatpush.bf16.msrb.mxu1 %v5828_v34  ;;  %v6818_v55 = vld [vmem:[%s10437_s6 + $0x6c] sm:$0xf0]  ;;  %v5761_v34 = vld [vmem:[%s10437_s6 + $0x70] sm:$0xf0] }
 0x17a   :  { %v1768_v61 = vadd.f32 %v1767_v54, %v1750_v59  ;;  %v5836_v20 = vor.u32 %v6833_v35, %v5833_v40  ;;  %v5807_v54 = vld [vmem:[%s10437_s6 + $0xc0] sm:$0xf]  ;;  %v5809_v59 = vld [vmem:[%s10437_s6 + $0xd0] sm:$0xf0]  ;;  %v5760_v35 = vor.u32 %v6818_v55, %v5759_v32  ;;  %v5764_v40 = vor.u32 %v6816_v44, %v5761_v34 }
 0x17b   :  { %v1814_v58 = vmax.f32 %v1801_v45, 0.0  ;;  %v5816_v45 = vor.u32 %v6831_v53, %v5815_v41  ;;  %v6817_v41 = vld [vmem:[%s10437_s6 + $0x6c] sm:$0xf] }
 0x17d   :  { %v1822_v2 = vpack.c.bf16 %v1814_v58, %v1810_v57  ;;  %v5808_v57 = vor.u32 %v6830_v51, %v5807_v54  ;;  %v6828_v58 = vld [vmem:[%s10437_s6 + $0xc4] sm:$0xf]  ;;  %2562 = vmatpush.bf16.msrb.mxu2 %v5816_v45  ;;  %v5751_v54 = vld [vmem:[%s10437_s6 + $0x48] sm:$0xf]  ;;  %v6815_v51 = vld [vmem:[%s10437_s6 + $0x54] sm:$0xf0] }
 0x17e   :  { %v1785_v60 = vpop.f32.mrf.mxu2  ;;  %v1803_v29 = vpop.f32.mrf.mxu3  ;;  %v5743_v45 = vld [vmem:[%s10437_s6 + $0x40] sm:$0xf] }
 0x17f   :  { %5705 = vmatmul.msk.bf16.vlgmr.msrb.gmra.mxu3 %vm1296_vm0, %v1822_v2  ;;  %v1751_v62 = vpop.f32.mrf.mxu0  ;;  %v1769_v43 = vpop.f32.mrf.mxu1  ;;  %v1786_v36 = vadd.f32 %v1785_v60, %v1768_v61  ;;  %v5812_v60 = vor.u32 %v6828_v58, %v5809_v59  ;;  %2526 = vmatpush.bf16.msrb.mxu0 %v5808_v57  ;;  %v5752_v57 = vor.u32 %v6815_v51, %v5751_v54  ;;  %v6814_v58 = vld [vmem:[%s10437_s6 + $0x4c] sm:$0xf0]  ;;  %v6812_v59 = vld [vmem:[%s10437_s6 + $0x44] sm:$0xf]  ;;  %v6881_v51 = vld [vmem:[%s10439_s8 + $0x168] sm:$0xf0] }
 0x180   :  { %2579 = vmatpush.bf16.msrb.mxu3 %v5836_v20  ;;  %v5769_v20 = vld [vmem:[%s10437_s6 + $0x78] sm:$0xf0]  ;;  %v6007_v54 = vld [vmem:[%s10439_s8 + $0x150] sm:$0xf] }
 0x181   :  { %v1804_v50 = vadd.f32 %v1803_v29, %v1786_v36  ;;  %v5817_v29 = vld [vmem:[%s10437_s6 + $0xd8] sm:$0xf0]  ;;  %2544 = vmatpush.bf16.msrb.mxu1 %v5812_v60  ;;  %v5772_v53 = vor.u32 %v6817_v41, %v5769_v20  ;;  %v5744_v60 = vor.u32 %v6814_v58, %v5743_v45  ;;  %v6231_v45 = vld [vmem:[%s10439_s8 + $0x310] sm:$0xf]  ;;  %v6008_v58 = vor.u32 %v6881_v51, %v6007_v54  ;;  %v5867_v54 = vld [vmem:[%s10439_s8 + $0x38] sm:$0xf] }
 0x182   :  { %v6846_v51 = vld [vmem:[%s10439_s8 + $0x50] sm:$0xf0] }
 0x183   :  { %v1818_v22 = vmax.f32 %v1804_v50, 0.0  ;;  %v5799_v50 = vld [vmem:[%s10437_s6 + $0xa8] sm:$0xf] }
 0x185   :  { %v1826_v6 = vpack.c.bf16 %v1818_v22, %v1818_v22 }
 0x186   :  { %v1787_v5 = vpop.f32.mrf.mxu2  ;;  %2260 = vmatmul.bf16.gmra.mxu2 %v1825_v56  ;;  %v1805_v63 = vpop.f32.mrf.mxu3 }
 0x187   :  { %v2148_v30 = vpop.f32.mrf.mxu0  ;;  %v6827_v5 = vld [vmem:[%s10437_s6 + $0xb4] sm:$0xf0]  ;;  %v5791_v63 = vld [vmem:[%s10437_s6 + $0xa0] sm:$0xf] }
 0x188   :  { %v2149_v1 = vadd.f32 %v2148_v30, %v8943_v7  ;;  %v5800_v22 = vor.u32 %v6827_v5, %v5799_v50 }
 0x18a   :  { %2563 = vmatpush.bf16.msrb.mxu2 %v5800_v22  ;;  %v5735_v22 = vld [vmem:[%s10437_s6 + $0x28] sm:$0xf] }
 0x18f   :  { %5706 = vmatmul.msk.bf16.gmra.mxu3 %vm1296_vm0, %v1826_v6  ;;  %v8941_v49 = vpop.f32.mrf.mxu0 }
 0x195   :  { %v2166_v33 = vpop.f32.mrf.mxu1 }
 0x196   :  { %v2167_v8 = vadd.f32 %v2166_v33, %v2149_v1  ;;  %v5793_v1 = vld [vmem:[%s10437_s6 + $0xb0] sm:$0xf0] }
 0x197   :  { %v2153_v10 = vpop.f32.mrf.mxu0 }
 0x198   :  { %v2154_v13 = vadd.f32 %v2153_v10, %v8943_v7  ;;  %v6825_v10 = vld [vmem:[%s10437_s6 + $0xac] sm:$0xf] }
 0x19d   :  { %v8946_v11 = vpop.f32.mrf.mxu1 }
 0x19f   :  { %5707 = vmatmul.msk.bf16.vlgmr.msra.gmra.mxu3 %vm1296_vm0, %v1822_v2  ;;  %v2155_v12 = vpop.f32.mrf.mxu0  ;;  %v6829_v2 = vld [vmem:[%s10437_s6 + $0xcc] sm:$0xf] }
 0x1a0   :  { %v5820_v61 = vor.u32 %v6829_v2, %v5817_v29  ;;  %v5801_v12 = vld [vmem:[%s10437_s6 + $0xb8] sm:$0xf0]  ;;  %v5745_v2 = vld [vmem:[%s10437_s6 + $0x50] sm:$0xf0] }
 0x1a1   :  { %v5748_v29 = vor.u32 %v6812_v59, %v5745_v2  ;;  %v6937_v59 = vld [vmem:[%s10439_s8 + $0x328] sm:$0xf0]  ;;  %v6483_v2 = vld [vmem:[%s10439_s8 + $0x508] sm:$0xf] }
 0x1a2   :  { %2580 = vmatpush.bf16.msrb.mxu3 %v5820_v61  ;;  %v6813_v61 = vld [vmem:[%s10437_s6 + $0x4c] sm:$0xf] }
 0x1a5   :  { %v2171_v42 = vpop.f32.mrf.mxu1 }
 0x1a6   :  { %v8950_v16 = vadd.f32 %v2171_v42, %v2154_v13  ;;  %v2151_v13 = vadd.f32 %v8941_v49, %v8943_v7  ;;  %v5804_v42 = vor.u32 %v6825_v10, %v5801_v12  ;;  %v5775_v49 = vld [vmem:[%s10437_s6 + $0x80] sm:$0xf] }
 0x1a7   :  { %v2220_v39 = vpop.f32.mrf.mxu0 }
 0x1a8   :  { %v2221_v15 = vadd.f32 %v2220_v39, %v8955_v38  ;;  %v5783_v39 = vld [vmem:[%s10437_s6 + $0x88] sm:$0xf]  ;;  %v2169_v7 = vadd.f32 %v8946_v11, %v2151_v13  ;;  %2581 = vmatpush.bf16.msrb.mxu3 %v5804_v42  ;;  %v6821_v11 = vld [vmem:[%s10437_s6 + $0x8c] sm:$0xf]  ;;  %v5737_v42 = vld [vmem:[%s10437_s6 + $0x38] sm:$0xf0] }
 0x1a9   :  { %v6809_v13 = vld [vmem:[%s10437_s6 + $0x2c] sm:$0xf] }
 0x1ad   :  { %v2173_v9 = vpop.f32.mrf.mxu1 }
 0x1ae   :  { %v6823_v9 = vld [vmem:[%s10437_s6 + $0x94] sm:$0xf0] }
 0x1af   :  { %5708 = vmatmul.msk.bf16.gmra.mxu3 %vm1296_vm0, %v1826_v6  ;;  %v8953_v46 = vpop.f32.mrf.mxu0  ;;  %v6826_v6 = vld [vmem:[%s10437_s6 + $0xac] sm:$0xf0] }
 0x1b0   :  { %v5792_v33 = vor.u32 %v6826_v6, %v5791_v63  ;;  %v6811_v6 = vld [vmem:[%s10437_s6 + $0x34] sm:$0xf0]  ;;  %v2223_v32 = vadd.f32 %v8953_v46, %v8955_v38  ;;  %v6888_v46 = vld [vmem:[%s10439_s8 + $0x1a0] sm:$0xf0] }
 0x1b2   :  { %2527 = vmatpush.bf16.msrb.mxu0 %v5792_v33  ;;  %v6808_v33 = vld [vmem:[%s10437_s6 + $0x24] sm:$0xf] }
 0x1b5   :  { %v2238_v48 = vpop.f32.mrf.mxu1 }
 0x1b6   :  { %v8958_v19 = vadd.f32 %v2238_v48, %v2221_v15  ;;  %v5784_v15 = vor.u32 %v6823_v9, %v5783_v39  ;;  %v6822_v48 = vld [vmem:[%s10437_s6 + $0x8c] sm:$0xf0]  ;;  %v5740_v39 = vor.u32 %v6809_v13, %v5737_v42  ;;  %v5719_v9 = vld [vmem:[%s10437_s6 + $0x8] sm:$0xf]  ;;  %v6427_v42 = vld [vmem:[%s10439_s8 + $0x498] sm:$0xf] }
 0x1b7   :  { %v2225_v56 = vpop.f32.mrf.mxu0 }
 0x1b8   :  { %v2226_v21 = vadd.f32 %v2225_v56, %v8955_v38  ;;  %v6820_v56 = vld [vmem:[%s10437_s6 + $0x84] sm:$0xf]  ;;  %2564 = vmatpush.bf16.msrb.mxu2 %v5784_v15 }
 0x1bc   :  { %2565 = vmatpush.bf16.msrb.mxu2 %v5768_v37 }
 0x1bd   :  { %v8960_v47 = vpop.f32.mrf.mxu1 }
 0x1be   :  { %v2241_v55 = vadd.f32 %v8960_v47, %v2223_v32  ;;  %v6860_v32 = vld [vmem:[%s10439_s8 + $0xc0] sm:$0xf0] }
 0x1bf   :  { %v2227_v0 = vpop.f32.mrf.mxu0 }
 0x1c0   :  { %v5777_v0 = vld [vmem:[%s10437_s6 + $0x90] sm:$0xf0]  ;;  %2566 = vmatpush.bf16.msrb.mxu2 %v5752_v57 }
 0x1c5   :  { %v2243_v17 = vpop.f32.mrf.mxu1 }
 0x1c6   :  { %v8963_v24 = vadd.f32 %v2243_v17, %v2226_v21  ;;  %v5776_v21 = vor.u32 %v6822_v48, %v5775_v49  ;;  %v5780_v17 = vor.u32 %v6820_v56, %v5777_v0  ;;  %v6807_v49 = vld [vmem:[%s10437_s6 + $0x14] sm:$0xf0]  ;;  %v6806_v48 = vld [vmem:[%s10437_s6 + $0xc] sm:$0xf0]  ;;  %v6804_v56 = vld [vmem:[%s10437_s6 + $0x4] sm:$0xf] }
 0x1c7   :  { %v5720_v15 = vor.u32 %v6807_v49, %v5719_v9  ;;  %v5713_v0 = vld [vmem:[%s10437_s6 + $0x10] sm:$0xf0]  ;;  %v5951_v49 = vld [vmem:[%s10439_s8 + $0xe0] sm:$0xf] }
 0x1c8   :  { %2528 = vmatpush.bf16.msrb.mxu0 %v5776_v21 }
 0x1cc   :  { %2529 = vmatpush.bf16.msrb.mxu0 %v5760_v35  ;;  %v2312_v35 = vld [vmem:[%s10432_s1] sm:$0xff] }
 0x1cd   :  { %v2245_v52 = vpop.f32.mrf.mxu1 }
 0x1ce   :  { %v5785_v52 = vld [vmem:[%s10437_s6 + $0x98] sm:$0xf0] }
 0x1cf   :  { %v5788_v28 = vor.u32 %v6821_v11, %v5785_v52  ;;  %v6805_v11 = vld [vmem:[%s10437_s6 + $0xc] sm:$0xf]  ;;  %v5721_v52 = vld [vmem:[%s10437_s6 + $0x18] sm:$0xf0] }
 0x1d0   :  { %2530 = vmatpush.bf16.msrb.mxu0 %v5744_v60  ;;  %v7000_v60 = vld [vmem:[%s10439_s8 + $0x520] sm:$0xf0] }
 0x1d1   :  { %2582 = vmatpush.bf16.msrb.mxu3 %v5788_v28 }
 0x1d5   :  { %2583 = vmatpush.bf16.msrb.mxu3 %v5772_v53 }
 0x1d9   :  { %v2184_v25 = vpop.f32.mrf.mxu2 }
 0x1da   :  { %v2185_v62 = vadd.f32 %v2184_v25, %v2167_v8  ;;  %v5796_v8 = vor.u32 %v6824_v4, %v5793_v1  ;;  %v5727_v4 = vld [vmem:[%s10437_s6 + $0x20] sm:$0xf] }
 0x1dc   :  { %2545 = vmatpush.bf16.msrb.mxu1 %v5796_v8  ;;  %v5729_v8 = vld [vmem:[%s10437_s6 + $0x30] sm:$0xf0] }
 0x1dd   :  { %v5732_v12 = vor.u32 %v6808_v33, %v5729_v8 }
 0x1e0   :  { %2546 = vmatpush.bf16.msrb.mxu1 %v5780_v17  ;;  %v5716_v17 = vor.u32 %v6804_v56, %v5713_v0 }
 0x1e1   :  { %v8965_v3 = vpop.f32.mrf.mxu2 }
 0x1e2   :  { %v2187_v25 = vadd.f32 %v8965_v3, %v2169_v7  ;;  %v5711_v7 = vld [vmem:[%s10437_s6] sm:$0xf] }
 0x1e3   :  { %v5712_v21 = vor.u32 %v6806_v48, %v5711_v7  ;;  %v6867_v7 = vld [vmem:[%s10439_s8 + $0xf8] sm:$0xf0] }
 0x1e4   :  { %2547 = vmatpush.bf16.msrb.mxu1 %v5764_v40  ;;  %v6923_v48 = vld [vmem:[%s10439_s8 + $0x2b8] sm:$0xf0] }
 0x1e8   :  { %2548 = vmatpush.bf16.msrb.mxu1 %v5748_v29 }
 0x1e9   :  { %v8967_v26 = vpop.f32.mrf.mxu2 }
 0x1ec   :  { %2549 = vmatpush.bf16.msrb.mxu1 %v5732_v12 }
 0x1f0   :  { %2550 = vmatpush.bf16.msrb.mxu1 %v5716_v17 }
 0x1f1   :  { %v2191_v27 = vpop.f32.mrf.mxu2 }
 0x1f9   :  { %v8969_v14 = vpop.f32.mrf.mxu2 }
 0x201   :  { %v9019_v43 = vpop.f32.mrf.mxu2 }
 0x202   :  { %v2202_v36 = vpop.f32.mrf.mxu3  ;;  %v2259_v44 = vadd.f32 %v9019_v43, %v2241_v55  ;;  %v6944_v43 = vld [vmem:[%s10439_s8 + $0x360] sm:$0xf0] }
 0x203   :  { %v9030_v30 = vadd.f32 %v2202_v36, %v2185_v62  ;;  %v5753_v62 = vld [vmem:[%s10437_s6 + $0x58] sm:$0xf0]  ;;  %v2190_v36 = vadd.f32 %v8967_v26, %v8950_v16  ;;  %v5736_v16 = vor.u32 %v6811_v6, %v5735_v22  ;;  %v6810_v26 = vld [vmem:[%s10437_s6 + $0x2c] sm:$0xf0]  ;;  %v6930_v22 = vld [vmem:[%s10439_s8 + $0x2f0] sm:$0xf0] }
 0x204   :  { %v5756_v5 = vor.u32 %v6813_v61, %v5753_v62  ;;  %v5728_v10 = vor.u32 %v6810_v26, %v5727_v4  ;;  %v6232_v61 = vor.u32 %v6937_v59, %v6231_v45  ;;  %v6511_v62 = vld [vmem:[%s10439_s8 + $0x540] sm:$0xf]  ;;  %v2313_v6 = vld [vmem:[%s10432_s1 + $0x8] sm:$0xff]  ;;  %v5868_v45 = vor.u32 %v6846_v51, %v5867_v54 }
 0x205   :  { %2306 = vst [vmem:[%s10441_s10] sm:$0xff] %v9030_v30  ;;  %2567 = vmatpush.bf16.msrb.mxu2 %v5736_v16  ;;  %v6455_v16 = vld [vmem:[%s10439_s8 + $0x4d0] sm:$0xf]  ;;  %v6993_v26 = vld [vmem:[%s10439_s8 + $0x4e8] sm:$0xf0]  ;;  %v6401_v54 = vld [vmem:[%s10439_s8 + $0x47c] sm:$0xf0] }
 0x206   :  { %2584 = vmatpush.bf16.msrb.mxu3 %v5756_v5  ;;  %2531 = vmatpush.bf16.msrb.mxu0 %v5728_v10  ;;  %v6456_v8 = vor.u32 %v6993_v26, %v6455_v16  ;;  %v6261_v26 = vld [vmem:[%s10439_s8 + $0x364] sm:$0xf0] }
 0x209   :  { %v9079_v27 = vpop.f32.mrf.mxu2  ;;  %2568 = vmatpush.bf16.msrb.mxu2 %v5720_v15  ;;  %v6175_v15 = vld [vmem:[%s10439_s8 + $0x2a0] sm:$0xf] }
 0x20a   :  { %v2204_v23 = vpop.f32.mrf.mxu3  ;;  %2585 = vmatpush.bf16.msrb.mxu3 %v5740_v39  ;;  %2532 = vmatpush.bf16.msrb.mxu0 %v5712_v21  ;;  %v2262_v29 = vadd.f32 %v9079_v27, %v8963_v24  ;;  %v6874_v24 = vld [vmem:[%s10439_s8 + $0x130] sm:$0xf0]  ;;  %v6203_v27 = vld [vmem:[%s10439_s8 + $0x2d8] sm:$0xf] }
 0x20b   :  { %v9090_v3 = vadd.f32 %v2204_v23, %v2187_v25  ;;  %v5724_v25 = vor.u32 %v6805_v11, %v5721_v52  ;;  %v2257_v23 = vadd.f32 %v8969_v14, %v8958_v19  ;;  %v6035_v19 = vld [vmem:[%s10439_s8 + $0x188] sm:$0xf]  ;;  %v6204_v13 = vor.u32 %v6930_v22, %v6203_v27  ;;  %v6986_v39 = vld [vmem:[%s10439_s8 + $0x4b0] sm:$0xf0]  ;;  %v6885_v22 = vld [vmem:[%s10439_s8 + $0x18c] sm:$0xf] }
 0x20c   :  { %v6036_v47 = vor.u32 %v6888_v46, %v6035_v19  ;;  %v6259_v14 = vld [vmem:[%s10439_s8 + $0x348] sm:$0xf]  ;;  %v6428_v56 = vor.u32 %v6986_v39, %v6427_v42  ;;  %v5952_v11 = vor.u32 %v6867_v7, %v5951_v49  ;;  %v6176_v52 = vor.u32 %v6923_v48, %v6175_v15  ;;  %v6119_v19 = vld [vmem:[%s10439_s8 + $0x230] sm:$0xf]  ;;  %v6934_v39 = vld [vmem:[%s10439_s8 + $0x314] sm:$0xf] }
 0x20d   :  { %2308 = vst [vmem:[%s10441_s10 + $0x10] sm:$0xff] %v9090_v3  ;;  %v6260_v53 = vor.u32 %v6944_v43, %v6259_v14  ;;  %v6972_v14 = vld [vmem:[%s10439_s8 + $0x440] sm:$0xf0]  ;;  %v6009_v42 = vld [vmem:[%s10439_s8 + $0x16c] sm:$0xf0] }
 0x20e   :  { %2586 = vmatpush.bf16.msrb.mxu3 %v5724_v25  ;;  %3739 = vmatpush.bf16.msra.mxu0 %v6036_v47  ;;  %v2314_v25 = vld [vmem:[%s10432_s1 + $0x10] sm:$0xff]  ;;  %v6371_v47 = vld [vmem:[%s10439_s8 + $0x428] sm:$0xf]  ;;  %v6997_v15 = vld [vmem:[%s10439_s8 + $0x50c] sm:$0xf] }
 0x20f   :  { %3757 = vmatpush.bf16.msra.mxu1 %v6260_v53  ;;  %v6372_v53 = vor.u32 %v6972_v14, %v6371_v47  ;;  %v6233_v49 = vld [vmem:[%s10439_s8 + $0x32c] sm:$0xf0]  ;;  %v6485_v48 = vld [vmem:[%s10439_s8 + $0x524] sm:$0xf0]  ;;  %v6913_v47 = vld [vmem:[%s10439_s8 + $0x26c] sm:$0xf] }
 0x210   :  { %v6236_v7 = vor.u32 %v6934_v39, %v6233_v49  ;;  %v6836_v49 = vld [vmem:[%s10439_s8 + $0x4] sm:$0xf] }
 0x211   :  { %v2263_v50 = vpop.f32.mrf.mxu2 }
 0x212   :  { %v2207_v63 = vpop.f32.mrf.mxu3  ;;  %v5979_v50 = vld [vmem:[%s10439_s8 + $0x118] sm:$0xf]  ;;  %3740 = vmatpush.bf16.msra.mxu0 %v6008_v58  ;;  %v6902_v58 = vld [vmem:[%s10439_s8 + $0x210] sm:$0xf0] }
 0x213   :  { %v9146_v1 = vadd.f32 %v2207_v63, %v2190_v36  ;;  %v7007_v36 = vld [vmem:[%s10439_s8 + $0x558] sm:$0xf0]  ;;  %v5980_v33 = vor.u32 %v6874_v24, %v5979_v50  ;;  %3758 = vmatpush.bf16.msra.mxu1 %v6232_v61  ;;  %v5839_v61 = vld [vmem:[%s10439_s8] sm:$0xf]  ;;  %v6958_v24 = vld [vmem:[%s10439_s8 + $0x3d0] sm:$0xf0] }
 0x214   :  { %v6512_v63 = vor.u32 %v7007_v36, %v6511_v62  ;;  %v6063_v62 = vld [vmem:[%s10439_s8 + $0x1c0] sm:$0xf]  ;;  %v6895_v50 = vld [vmem:[%s10439_s8 + $0x1d8] sm:$0xf0] }
 0x215   :  { %2310 = vst [vmem:[%s10441_s10 + $0x20] sm:$0xff] %v9146_v1 }
 0x216   :  { %3800 = vmatpush.bf16.msra.mxu3 %v6512_v63  ;;  %3741 = vmatpush.bf16.msra.mxu0 %v5980_v33  ;;  %v6315_v63 = vld [vmem:[%s10439_s8 + $0x3b8] sm:$0xf] }
 0x217   :  { %3759 = vmatpush.bf16.msra.mxu1 %v6204_v13  ;;  %v6316_v27 = vor.u32 %v6958_v24, %v6315_v63  ;;  %v6878_v13 = vld [vmem:[%s10439_s8 + $0x154] sm:$0xf]  ;;  %v6843_v24 = vld [vmem:[%s10439_s8 + $0x3c] sm:$0xf] }
 0x21a   :  { %v2209_v28 = vpop.f32.mrf.mxu3  ;;  %3742 = vmatpush.bf16.msra.mxu0 %v5952_v11 }
 0x21b   :  { %3760 = vmatpush.bf16.msra.mxu1 %v6176_v52  ;;  %v6205_v52 = vld [vmem:[%s10439_s8 + $0x2f4] sm:$0xf0] }
 0x222   :  { %v2274_v18 = vpop.f32.mrf.mxu3 }
 0x223   :  { %v2275_v31 = vadd.f32 %v2274_v18, %v2257_v23 }
 0x225   :  { %v2290_v37 = vmul.f32 1.442695, %v2275_v31  ;;  %v5923_v31 = vld [vmem:[%s10439_s8 + $0xa8] sm:$0xf] }
 0x226   :  { %v5924_v55 = vor.u32 %v6860_v32, %v5923_v31  ;;  %v5953_v31 = vld [vmem:[%s10439_s8 + $0xfc] sm:$0xf0]  ;;  %v6920_v32 = vld [vmem:[%s10439_s8 + $0x2a4] sm:$0xf] }
 0x227   :  { %7014 = vpow2.f32 %v2290_v37  ;;  %v6147_v37 = vld [vmem:[%s10439_s8 + $0x268] sm:$0xf] }
 0x228   :  { %3743 = vmatpush.bf16.msra.mxu0 %v5924_v55  ;;  %v6177_v55 = vld [vmem:[%s10439_s8 + $0x2bc] sm:$0xf0] }
 0x22a   :  { %v2276_v34 = vpop.f32.mrf.mxu3 }
 0x22b   :  { %v2277_v40 = vadd.f32 %v2276_v34, %v2259_v44  ;;  %v6399_v34 = vld [vmem:[%s10439_s8 + $0x460] sm:$0xf] }
 0x22d   :  { %v7015_v41 = vpop.eup %7014  ;;  %v2294_v20 = vmul.f32 1.442695, %v2277_v40 }
 0x22e   :  { %2307 = vst [vmem:[%s10441_s10 + $0x8] sm:$0xff] %v7015_v41  ;;  %v2315_v38 = vmul.f32 %v7015_v41, %v2312_v35  ;;  %v6979_v35 = vld [vmem:[%s10439_s8 + $0x478] sm:$0xf0]  ;;  %v5895_v41 = vld [vmem:[%s10439_s8 + $0x70] sm:$0xf] }
 0x22f   :  { %7016 = vpow2.f32 %v2294_v20  ;;  %v6400_v40 = vor.u32 %v6979_v35, %v6399_v34  ;;  %v6853_v20 = vld [vmem:[%s10439_s8 + $0x88] sm:$0xf0]  ;;  %v6180_v34 = vor.u32 %v6920_v32, %v6177_v55  ;;  %v6983_v35 = vld [vmem:[%s10439_s8 + $0x49c] sm:$0xf] }
 0x230   :  { %v2318_v57 = vadd.f32 %v2315_v38, %v9030_v30  ;;  %v6484_v30 = vor.u32 %v7000_v60, %v6483_v2  ;;  %v5896_v46 = vor.u32 %v6853_v20, %v5895_v41  ;;  %v6909_v38 = vld [vmem:[%s10439_s8 + $0x248] sm:$0xf0]  ;;  %v6343_v2 = vld [vmem:[%s10439_s8 + $0x3f0] sm:$0xf]  ;;  %v6429_v41 = vld [vmem:[%s10439_s8 + $0x4b4] sm:$0xf0] }
 0x231   :  { %v6120_v43 = vor.u32 %v6909_v38, %v6119_v19  ;;  %v6965_v60 = vld [vmem:[%s10439_s8 + $0x408] sm:$0xf0]  ;;  %v2355_v20 = vld [vmem:[%s10438_s7] sm:$0xf]  ;;  %v6432_v19 = vor.u32 %v6983_v35, %v6429_v41  ;;  %v5925_v38 = vld [vmem:[%s10439_s8 + $0xc4] sm:$0xf0] }
 0x232   :  { %v2279_v5 = vpop.f32.mrf.mxu3  ;;  %3775 = vmatpush.bf16.msra.mxu2 %v6484_v30  ;;  %3744 = vmatpush.bf16.msra.mxu0 %v5896_v46  ;;  %v6839_v30 = vld [vmem:[%s10439_s8 + $0x18] sm:$0xf0]  ;;  %v6857_v46 = vld [vmem:[%s10439_s8 + $0xac] sm:$0xf] }
 0x233   :  { %v2280_v4 = vadd.f32 %v2279_v5, %v2262_v29  ;;  %v6344_v29 = vor.u32 %v6965_v60, %v6343_v2  ;;  %v5840_v36 = vor.u32 %v6839_v30, %v5839_v61  ;;  %v6064_v5 = vor.u32 %v6895_v50, %v6063_v62  ;;  %v5897_v2 = vld [vmem:[%s10439_s8 + $0x8c] sm:$0xf0]  ;;  %v6906_v60 = vld [vmem:[%s10439_s8 + $0x234] sm:$0xf]  ;;  %v6969_v50 = vld [vmem:[%s10439_s8 + $0x42c] sm:$0xf] }
 0x234   :  { %v5928_v14 = vor.u32 %v6857_v46, %v5925_v38  ;;  %v6121_v61 = vld [vmem:[%s10439_s8 + $0x24c] sm:$0xf0]  ;;  %v9475_v62 = vperm.slane %v2355_v20, 0  ;;  %v6889_v35 = vld [vmem:[%s10439_s8 + $0x1a8] sm:$0xf0] }
 0x235   :  { %v7017_v10 = vpop.eup %7016  ;;  %v2298_v12 = vmul.f32 1.442695, %v2280_v4  ;;  %v6941_v4 = vld [vmem:[%s10439_s8 + $0x34c] sm:$0xf]  ;;  %v6124_v30 = vor.u32 %v6906_v60, %v6121_v61  ;;  %v6948_v38 = vld [vmem:[%s10439_s8 + $0x384] sm:$0xf] }
 0x236   :  { %2309 = vst [vmem:[%s10441_s10 + $0x18] sm:$0xff] %v7017_v10  ;;  %v2316_v9 = vmul.f32 %v7017_v10, %v2313_v6  ;;  %3776 = vmatpush.bf16.msra.mxu2 %v6456_v8  ;;  %3745 = vmatpush.bf16.msra.mxu0 %v5868_v45  ;;  %v6037_v6 = vld [vmem:[%s10439_s8 + $0x1a4] sm:$0xf0]  ;;  %v6264_v33 = vor.u32 %v6941_v4, %v6261_v26  ;;  %v6287_v8 = vld [vmem:[%s10439_s8 + $0x380] sm:$0xf] }
 0x237   :  { %7018 = vpow2.f32 %v2298_v12  ;;  %v6040_v16 = vor.u32 %v6885_v22, %v6037_v6  ;;  %v6951_v10 = vld [vmem:[%s10439_s8 + $0x398] sm:$0xf0]  ;;  %v6945_v46 = vld [vmem:[%s10439_s8 + $0x368] sm:$0xf0]  ;;  %v6938_v61 = vld [vmem:[%s10439_s8 + $0x330] sm:$0xf0] }
 0x238   :  { %v2319_v0 = vadd.f32 %v2316_v9, %v9090_v3  ;;  %v6288_v12 = vor.u32 %v6951_v10, %v6287_v8  ;;  %v6012_v9 = vor.u32 %v6878_v13, %v6009_v42  ;;  %v6899_v22 = vld [vmem:[%s10439_s8 + $0x1fc] sm:$0xf]  ;;  %v6093_v8 = vld [vmem:[%s10439_s8 + $0x214] sm:$0xf0]  ;;  %v6962_v10 = vld [vmem:[%s10439_s8 + $0x3f4] sm:$0xf] }
 0x239   :  { %v6096_v39 = vor.u32 %v6899_v22, %v6093_v8  ;;  %v5987_v8 = vld [vmem:[%s10439_s8 + $0x120] sm:$0xf] }
 0x23a   :  { %v2281_v21 = vpop.f32.mrf.mxu3  ;;  %v2321_v17 = vpack.c.bf16 %v2319_v0, %v2318_v57  ;;  %3777 = vmatpush.bf16.msra.mxu2 %v6428_v56  ;;  %v6091_v57 = vld [vmem:[%s10439_s8 + $0x1f8] sm:$0xf]  ;;  %3746 = vmatpush.bf16.msra.mxu0 %v5840_v36  ;;  %v6488_v56 = vor.u32 %v6997_v15, %v6485_v48  ;;  %v6871_v0 = vld [vmem:[%s10439_s8 + $0x11c] sm:$0xf]  ;;  %v9477_v36 = vperm.slane %v2355_v20, 1 }
 0x23b   :  { %v6092_v59 = vor.u32 %v6902_v58, %v6091_v57  ;;  %v5981_v21 = vld [vmem:[%s10439_s8 + $0x134] sm:$0xf0]  ;;  %v6892_v15 = vld [vmem:[%s10439_s8 + $0x1c4] sm:$0xf] }
 0x23c   :  { %2533 = vmatmul.bf16.vlgmr.msrb.gmra.mxu0 %v2321_v17  ;;  %2551 = vmatmul.bf16.vlgmr.msrb.gmra.mxu1 %v2321_v17  ;;  %v5984_v11 = vor.u32 %v6871_v0, %v5981_v21  ;;  %v6065_v21 = vld [vmem:[%s10439_s8 + $0x1dc] sm:$0xf0] }
 0x23d   :  { %v7019_v28 = vpop.eup %7018  ;;  %2569 = vmatmul.bf16.vlgmr.msrb.gmra.mxu2 %v2321_v17  ;;  %2587 = vmatmul.bf16.vlgmr.msrb.gmra.mxu3 %v2321_v17  ;;  %v6927_v17 = vld [vmem:[%s10439_s8 + $0x2dc] sm:$0xf] }
 0x23e   :  { %2311 = vst [vmem:[%s10441_s10 + $0x28] sm:$0xff] %v7019_v28  ;;  %v2317_v3 = vmul.f32 %v7019_v28, %v2314_v25  ;;  %3778 = vmatpush.bf16.msra.mxu2 %v6400_v40  ;;  %3811 = vmatpush.bf16.msrb.mxu0 %v6040_v16  ;;  %v6208_v25 = vor.u32 %v6927_v17, %v6205_v52  ;;  %v6990_v28 = vld [vmem:[%s10439_s8 + $0x4d4] sm:$0xf]  ;;  %v6955_v17 = vld [vmem:[%s10439_s8 + $0x3bc] sm:$0xf]  ;;  %v9525_v52 = vperm.slane %v2355_v20, 2 }
 0x240   :  { %v2320_v23 = vadd.f32 %v2317_v3, %v9146_v1  ;;  %v6916_v1 = vld [vmem:[%s10439_s8 + $0x280] sm:$0xf0]  ;;  %v6457_v3 = vld [vmem:[%s10439_s8 + $0x4ec] sm:$0xf0] }
 0x241   :  { %v6148_v44 = vor.u32 %v6916_v1, %v6147_v37  ;;  %v7004_v1 = vld [vmem:[%s10439_s8 + $0x544] sm:$0xf] }
 0x242   :  { %v2322_v18 = vpack.c.bf16 %v2320_v23, %v2320_v23  ;;  %3779 = vmatpush.bf16.msra.mxu2 %v6372_v53  ;;  %3812 = vmatpush.bf16.msrb.mxu0 %v6012_v9  ;;  %v6460_v23 = vor.u32 %v6990_v28, %v6457_v3  ;;  %v6976_v53 = vld [vmem:[%s10439_s8 + $0x464] sm:$0xf]  ;;  %v6068_v28 = vor.u32 %v6892_v15, %v6065_v21  ;;  %v5959_v21 = vld [vmem:[%s10439_s8 + $0xe8] sm:$0xf] }
 0x243   :  { %3761 = vmatpush.bf16.msra.mxu1 %v6148_v44  ;;  %v6513_v44 = vld [vmem:[%s10439_s8 + $0x55c] sm:$0xf0]  ;;  %v6404_v58 = vor.u32 %v6976_v53, %v6401_v54 }
 0x244   :  { %v6516_v40 = vor.u32 %v7004_v1, %v6513_v44 }
 0x246   :  { %3780 = vmatpush.bf16.msra.mxu2 %v6344_v29  ;;  %3813 = vmatpush.bf16.msrb.mxu0 %v5984_v11  ;;  %v6317_v11 = vld [vmem:[%s10439_s8 + $0x3d4] sm:$0xf0] }
 0x247   :  { %3762 = vmatpush.bf16.msra.mxu1 %v6120_v43  ;;  %3872 = vmatpush.bf16.msrb.mxu3 %v6516_v40  ;;  %v6149_v43 = vld [vmem:[%s10439_s8 + $0x284] sm:$0xf0]  ;;  %v6320_v32 = vor.u32 %v6955_v17, %v6317_v11  ;;  %v6267_v40 = vld [vmem:[%s10439_s8 + $0x350] sm:$0xf]  ;;  %v6868_v11 = vld [vmem:[%s10439_s8 + $0x100] sm:$0xf0] }
 0x248   :  { %v6152_v57 = vor.u32 %v6913_v47, %v6149_v43  ;;  %v6289_v47 = vld [vmem:[%s10439_s8 + $0x39c] sm:$0xf0] }
 0x24a   :  { %3781 = vmatpush.bf16.msra.mxu2 %v6316_v27  ;;  %v5869_v27 = vld [vmem:[%s10439_s8 + $0x54] sm:$0xf0] }
 0x24b   :  { %3763 = vmatpush.bf16.msra.mxu1 %v6092_v59  ;;  %v6850_v59 = vld [vmem:[%s10439_s8 + $0x74] sm:$0xf] }
 0x24c   :  { %2538 = vmatmul.bf16.gmra.mxu0 %v2322_v18  ;;  %2556 = vmatmul.bf16.gmra.mxu1 %v2322_v18  ;;  %v5900_v29 = vor.u32 %v6850_v59, %v5897_v2  ;;  %v6239_v59 = vld [vmem:[%s10439_s8 + $0x318] sm:$0xf] }
 0x24d   :  { %2574 = vmatmul.bf16.gmra.mxu2 %v2322_v18  ;;  %2592 = vmatmul.bf16.gmra.mxu3 %v2322_v18  ;;  %v6864_v18 = vld [vmem:[%s10439_s8 + $0xe4] sm:$0xf] }
 0x24e   :  { %3782 = vmatpush.bf16.msra.mxu2 %v6288_v12  ;;  %v5956_v37 = vor.u32 %v6864_v18, %v5953_v31  ;;  %v6345_v12 = vld [vmem:[%s10439_s8 + $0x40c] sm:$0xf0] }
 0x24f   :  { %3764 = vmatpush.bf16.msra.mxu1 %v6064_v5  ;;  %v6373_v5 = vld [vmem:[%s10439_s8 + $0x444] sm:$0xf0]  ;;  %v6348_v9 = vor.u32 %v6962_v10, %v6345_v12 }
 0x250   :  { %3814 = vmatpush.bf16.msrb.mxu0 %v5956_v37  ;;  %v6376_v63 = vor.u32 %v6969_v50, %v6373_v5 }
 0x252   :  { %3847 = vmatpush.bf16.msrb.mxu2 %v6488_v56 }
 0x253   :  { %3829 = vmatpush.bf16.msrb.mxu1 %v6264_v33  ;;  %v5872_v33 = vor.u32 %v6843_v24, %v5869_v27  ;;  %v6240_v24 = vor.u32 %v6938_v61, %v6239_v59  ;;  %v6910_v59 = vld [vmem:[%s10439_s8 + $0x250] sm:$0xf0] }
 0x254   :  { %3815 = vmatpush.bf16.msrb.mxu0 %v5928_v14 }
 0x256   :  { %3848 = vmatpush.bf16.msrb.mxu2 %v6460_v23 }
 0x257   :  { %3830 = vmatpush.bf16.msrb.mxu1 %v6236_v7  ;;  %v5841_v7 = vld [vmem:[%s10439_s8 + $0x1c] sm:$0xf0] }
 0x258   :  { %3816 = vmatpush.bf16.msrb.mxu0 %v5900_v29  ;;  %v5844_v0 = vor.u32 %v6836_v49, %v5841_v7 }
 0x25a   :  { %3849 = vmatpush.bf16.msrb.mxu2 %v6432_v19 }
 0x25b   :  { %3831 = vmatpush.bf16.msrb.mxu1 %v6208_v25  ;;  %v9527_v25 = vperm.slane %v2355_v20, 3 }
 0x25c   :  { %3817 = vmatpush.bf16.msrb.mxu0 %v5872_v33  ;;  %v7008_v33 = vld [vmem:[%s10439_s8 + $0x560] sm:$0xf0] }
 0x25e   :  { %3850 = vmatpush.bf16.msrb.mxu2 %v6404_v58  ;;  %v6882_v58 = vld [vmem:[%s10439_s8 + $0x170] sm:$0xf0] }
 0x25f   :  { %3832 = vmatpush.bf16.msrb.mxu1 %v6180_v34  ;;  %v6043_v34 = vld [vmem:[%s10439_s8 + $0x190] sm:$0xf] }
 0x260   :  { %3818 = vmatpush.bf16.msrb.mxu0 %v5844_v0  ;;  %v6044_v19 = vor.u32 %v6889_v35, %v6043_v34  ;;  %v6994_v0 = vld [vmem:[%s10439_s8 + $0x4f0] sm:$0xf0] }
 0x262   :  { %3851 = vmatpush.bf16.msrb.mxu2 %v6376_v63 }
 0x263   :  { %3833 = vmatpush.bf16.msrb.mxu1 %v6152_v57  ;;  %v6015_v57 = vld [vmem:[%s10439_s8 + $0x158] sm:$0xf] }
 0x264   :  { %v6016_v29 = vor.u32 %v6882_v58, %v6015_v57  ;;  %v6854_v57 = vld [vmem:[%s10439_s8 + $0x90] sm:$0xf0]  ;;  %v6127_v58 = vld [vmem:[%s10439_s8 + $0x238] sm:$0xf] }
 0x265   :  { %v6128_v61 = vor.u32 %v6910_v59, %v6127_v58  ;;  %v5961_v58 = vld [vmem:[%s10439_s8 + $0x104] sm:$0xf0]  ;;  %v6921_v59 = vld [vmem:[%s10439_s8 + $0x2ac] sm:$0xf] }
 0x266   :  { %3852 = vmatpush.bf16.msrb.mxu2 %v6348_v9  ;;  %v6931_v9 = vld [vmem:[%s10439_s8 + $0x2f8] sm:$0xf0] }
 0x267   :  { %3834 = vmatpush.bf16.msrb.mxu1 %v6124_v30 }
 0x26a   :  { %3853 = vmatpush.bf16.msrb.mxu2 %v6320_v32 }
 0x26b   :  { %3835 = vmatpush.bf16.msrb.mxu1 %v6096_v39  ;;  %v6211_v39 = vld [vmem:[%s10439_s8 + $0x2e0] sm:$0xf] }
 0x26f   :  { %3836 = vmatpush.bf16.msrb.mxu1 %v6068_v28  ;;  %v6183_v28 = vld [vmem:[%s10439_s8 + $0x2a8] sm:$0xf] }
 0x2b9   :  { %v2534_v51 = vpop.f32.mrf.mxu0  ;;  %v2552_v45 = vpop.f32.mrf.mxu1 }
 0x2ba   :  { %v2535_v6 = vadd.f32 %v2534_v51, %v9475_v62  ;;  %v2553_v4 = vadd.f32 %v2552_v45, %v9477_v36  ;;  %v6268_v51 = vor.u32 %v6945_v46, %v6267_v40  ;;  %v6292_v45 = vor.u32 %v6948_v38, %v6289_v47  ;;  %v6917_v38 = vld [vmem:[%s10439_s8 + $0x288] sm:$0xf0]  ;;  %v6407_v47 = vld [vmem:[%s10439_s8 + $0x468] sm:$0xf] }
 0x2bc   :  { %v2597_v3 = vmax.f32 %v2535_v6, 0.0  ;;  %v2598_v23 = vmax.f32 %v2553_v4, 0.0  ;;  %3854 = vmatpush.bf16.msrb.mxu2 %v6292_v45  ;;  %v5903_v45 = vld [vmem:[%s10439_s8 + $0x78] sm:$0xf] }
 0x2c0   :  { %v2570_v16 = vpop.f32.mrf.mxu2  ;;  %v2588_v26 = vpop.f32.mrf.mxu3 }
 0x2c1   :  { %v2536_v13 = vpop.f32.mrf.mxu0  ;;  %v2554_v42 = vpop.f32.mrf.mxu1  ;;  %v2571_v1 = vadd.f32 %v2570_v16, %v9525_v52  ;;  %v2589_v44 = vadd.f32 %v2588_v26, %v9527_v25  ;;  %v6519_v26 = vld [vmem:[%s10439_s8 + $0x548] sm:$0xf] }
 0x2c2   :  { %v2537_v48 = vadd.f32 %v2536_v13, %v9475_v62  ;;  %v2555_v56 = vadd.f32 %v2554_v42, %v9477_v36  ;;  %v6520_v13 = vor.u32 %v7008_v33, %v6519_v26  ;;  %v6875_v42 = vld [vmem:[%s10439_s8 + $0x138] sm:$0xf0] }
 0x2c3   :  { %v2599_v30 = vmax.f32 %v2571_v1, 0.0  ;;  %v2600_v50 = vmax.f32 %v2589_v44, 0.0  ;;  %v5988_v15 = vor.u32 %v6875_v42, %v5987_v8  ;;  %v5847_v8 = vld [vmem:[%s10439_s8 + $0x8] sm:$0xf]  ;;  %v6323_v42 = vld [vmem:[%s10439_s8 + $0x3c0] sm:$0xf] }
 0x2c4   :  { %v2601_v18 = vmax.f32 %v2537_v48, 0.0  ;;  %v2602_v31 = vmax.f32 %v2555_v56, 0.0  ;;  %v6212_v48 = vor.u32 %v6931_v9, %v6211_v39  ;;  %v6463_v56 = vld [vmem:[%s10439_s8 + $0x4d8] sm:$0xf]  ;;  %v6959_v39 = vld [vmem:[%s10439_s8 + $0x3d8] sm:$0xf0] }
 0x2c5   :  { %v6464_v17 = vor.u32 %v6994_v0, %v6463_v56  ;;  %v6942_v56 = vld [vmem:[%s10439_s8 + $0x354] sm:$0xf] }
 0x2c6   :  { %v9529_v37 = vpack.c.bf16 %v2601_v18, %v2597_v3  ;;  %v9531_v55 = vpack.c.bf16 %v2602_v31, %v2598_v23  ;;  %v6924_v3 = vld [vmem:[%s10439_s8 + $0x2c0] sm:$0xf0]  ;;  %v5960_v23 = vor.u32 %v6868_v11, %v5959_v21  ;;  %v6435_v18 = vld [vmem:[%s10439_s8 + $0x4a0] sm:$0xf]  ;;  %v6987_v31 = vld [vmem:[%s10439_s8 + $0x4b8] sm:$0xf0] }
 0x2c7   :  { %v6184_v44 = vor.u32 %v6924_v3, %v6183_v28  ;;  %v6436_v34 = vor.u32 %v6987_v31, %v6435_v18  ;;  %v6269_v21 = vld [vmem:[%s10439_s8 + $0x36c] sm:$0xf0]  ;;  %v6952_v11 = vld [vmem:[%s10439_s8 + $0x3a0] sm:$0xf0]  ;;  %v6879_v3 = vld [vmem:[%s10439_s8 + $0x15c] sm:$0xf] }
 0x2c8   :  { %v2572_v41 = vpop.f32.mrf.mxu2  ;;  %v2590_v20 = vpop.f32.mrf.mxu3  ;;  %3747 = vmatmul.bf16.vlgmr.msra.gmra.mxu0 %v9529_v37  ;;  %3765 = vmatmul.bf16.vlgmr.msra.gmra.mxu1 %v9531_v55  ;;  %v6272_v28 = vor.u32 %v6942_v56, %v6269_v21  ;;  %v6935_v18 = vld [vmem:[%s10439_s8 + $0x31c] sm:$0xf]  ;;  %v5877_v56 = vld [vmem:[%s10439_s8 + $0x5c] sm:$0xf0] }
 0x2c9   :  { %v2573_v14 = vadd.f32 %v2572_v41, %v9525_v52  ;;  %v2591_v43 = vadd.f32 %v2590_v20, %v9527_v25  ;;  %v2539_v53 = vpop.f32.mrf.mxu0  ;;  %v2557_v54 = vpop.f32.mrf.mxu1  ;;  %3883 = vmatpush.bf16.msra.mxu0 %v6044_v19  ;;  %3901 = vmatpush.bf16.msra.mxu1 %v6268_v51  ;;  %v5931_v41 = vld [vmem:[%s10439_s8 + $0xb0] sm:$0xf]  ;;  %v6861_v20 = vld [vmem:[%s10439_s8 + $0xc8] sm:$0xf0] }
 0x2ca   :  { %v2540_v2 = vadd.f32 %v2539_v53, %v9475_v62  ;;  %v2558_v60 = vadd.f32 %v2557_v54, %v9477_v36  ;;  %v6491_v62 = vld [vmem:[%s10439_s8 + $0x510] sm:$0xf]  ;;  %v7001_v36 = vld [vmem:[%s10439_s8 + $0x528] sm:$0xf0]  ;;  %v5932_v46 = vor.u32 %v6861_v20, %v5931_v41 }
 0x2cb   :  { %v2603_v5 = vmax.f32 %v2573_v14, 0.0  ;;  %v2604_v63 = vmax.f32 %v2591_v43, 0.0  ;;  %v6492_v16 = vor.u32 %v7001_v36, %v6491_v62  ;;  %v6980_v14 = vld [vmem:[%s10439_s8 + $0x480] sm:$0xf0]  ;;  %v6099_v62 = vld [vmem:[%s10439_s8 + $0x200] sm:$0xf] }
 0x2cc   :  { %v2605_v6 = vmax.f32 %v2540_v2, 0.0  ;;  %v2606_v4 = vmax.f32 %v2558_v60, 0.0  ;;  %v6408_v51 = vor.u32 %v6980_v14, %v6407_v47  ;;  %v5904_v2 = vor.u32 %v6854_v57, %v5903_v45  ;;  %v6493_v41 = vld [vmem:[%s10439_s8 + $0x52c] sm:$0xf0]  ;;  %v6928_v47 = vld [vmem:[%s10439_s8 + $0x2e4] sm:$0xf] }
 0x2cd   :  { %v9571_v27 = vpack.c.bf16 %v2603_v5, %v2599_v30  ;;  %v9573_v22 = vpack.c.bf16 %v2604_v63, %v2600_v50  ;;  %3884 = vmatpush.bf16.msra.mxu0 %v6016_v29  ;;  %3902 = vmatpush.bf16.msra.mxu1 %v6240_v24  ;;  %v6379_v30 = vld [vmem:[%s10439_s8 + $0x430] sm:$0xf]  ;;  %v6973_v50 = vld [vmem:[%s10439_s8 + $0x448] sm:$0xf0]  ;;  %v5875_v63 = vld [vmem:[%s10439_s8 + $0x40] sm:$0xf] }
 0x2ce   :  { %v9628_v35 = vpack.c.bf16 %v2605_v6, %v2605_v6  ;;  %v9630_v40 = vpack.c.bf16 %v2606_v4, %v2606_v4  ;;  %v6380_v5 = vor.u32 %v6973_v50, %v6379_v30  ;;  %v6847_v24 = vld [vmem:[%s10439_s8 + $0x58] sm:$0xf0]  ;;  %v6351_v4 = vld [vmem:[%s10439_s8 + $0x3f8] sm:$0xf]  ;;  %v6213_v14 = vld [vmem:[%s10439_s8 + $0x2fc] sm:$0xf0] }
 0x2cf   :  { %3783 = vmatmul.bf16.vlgmr.msra.gmra.mxu2 %v9571_v27  ;;  %6537 = vmatmul.msk.bf16.vlgmr.msra.gmra.mxu3 %vm1296_vm0, %v9573_v22  ;;  %v5876_v36 = vor.u32 %v6847_v24, %v5875_v63  ;;  %v6903_v6 = vld [vmem:[%s10439_s8 + $0x218] sm:$0xf0]  ;;  %v6865_v45 = vld [vmem:[%s10439_s8 + $0xec] sm:$0xf]  ;;  %v6984_v30 = vld [vmem:[%s10439_s8 + $0x4a4] sm:$0xf] }
 0x2d0   :  { %v2575_v10 = vpop.f32.mrf.mxu2  ;;  %v2593_v12 = vpop.f32.mrf.mxu3  ;;  %3919 = vmatpush.bf16.msra.mxu2 %v6492_v16  ;;  %3944 = vmatpush.bf16.msra.mxu3 %v6520_v13  ;;  %v6966_v16 = vld [vmem:[%s10439_s8 + $0x410] sm:$0xf0]  ;;  %v6100_v26 = vor.u32 %v6903_v6, %v6099_v62  ;;  %v6896_v13 = vld [vmem:[%s10439_s8 + $0x1e0] sm:$0xf0]  ;;  %v6437_v50 = vld [vmem:[%s10439_s8 + $0x4bc] sm:$0xf0] }
 0x2d1   :  { %v2541_v49 = vpop.f32.mrf.mxu0  ;;  %v2559_v7 = vpop.f32.mrf.mxu1  ;;  %3885 = vmatpush.bf16.msra.mxu0 %v5988_v15  ;;  %3903 = vmatpush.bf16.msra.mxu1 %v6212_v48  ;;  %v2576_v32 = vadd.f32 %v2575_v10, %v9525_v52  ;;  %v2594_v1 = vadd.f32 %v2593_v12, %v9527_v25  ;;  %v6155_v52 = vld [vmem:[%s10439_s8 + $0x270] sm:$0xf]  ;;  %v6352_v33 = vor.u32 %v6966_v16, %v6351_v4  ;;  %v6840_v10 = vld [vmem:[%s10439_s8 + $0x20] sm:$0xf0]  ;;  %v6071_v12 = vld [vmem:[%s10439_s8 + $0x1c8] sm:$0xf] }
 0x2d2   :  { %v6156_v54 = vor.u32 %v6917_v38, %v6155_v52  ;;  %v5848_v9 = vor.u32 %v6840_v10, %v5847_v8  ;;  %v6072_v49 = vor.u32 %v6896_v13, %v6071_v12  ;;  %v6324_v7 = vor.u32 %v6959_v39, %v6323_v42  ;;  %v6886_v15 = vld [vmem:[%s10439_s8 + $0x194] sm:$0xf]  ;;  %v6045_v48 = vld [vmem:[%s10439_s8 + $0x1ac] sm:$0xf0]  ;;  %v7005_v52 = vld [vmem:[%s10439_s8 + $0x54c] sm:$0xf] }
 0x2d3   :  { %v2607_v43 = vmax.f32 %v2576_v32, 0.0  ;;  %v2608_v53 = vmax.f32 %v2594_v1, 0.0  ;;  %v6048_v0 = vor.u32 %v6886_v15, %v6045_v48  ;;  %v6241_v1 = vld [vmem:[%s10439_s8 + $0x334] sm:$0xf0]  ;;  %v5989_v38 = vld [vmem:[%s10439_s8 + $0x13c] sm:$0xf0]  ;;  %v6440_v63 = vor.u32 %v6984_v30, %v6437_v50 }
 0x2d4   :  { %3920 = vmatpush.bf16.msra.mxu2 %v6464_v17  ;;  %v6295_v17 = vld [vmem:[%s10439_s8 + $0x388] sm:$0xf]  ;;  %v6858_v24 = vld [vmem:[%s10439_s8 + $0xb4] sm:$0xf]  ;;  %v5933_v62 = vld [vmem:[%s10439_s8 + $0xcc] sm:$0xf0] }
 0x2d5   :  { %3886 = vmatpush.bf16.msra.mxu0 %v5960_v23  ;;  %3904 = vmatpush.bf16.msra.mxu1 %v6184_v44  ;;  %v9664_v60 = vpack.c.bf16 %v2607_v43, %v2607_v43  ;;  %v9666_v29 = vpack.c.bf16 %v2608_v53, %v2608_v53  ;;  %v6017_v23 = vld [vmem:[%s10439_s8 + $0x174] sm:$0xf0]  ;;  %v6296_v31 = vor.u32 %v6952_v11, %v6295_v17  ;;  %v6157_v4 = vld [vmem:[%s10439_s8 + $0x28c] sm:$0xf0]  ;;  %v6977_v16 = vld [vmem:[%s10439_s8 + $0x46c] sm:$0xf] }
 0x2d6   :  { %v6020_v32 = vor.u32 %v6879_v3, %v6017_v23  ;;  %v6244_v44 = vor.u32 %v6935_v18, %v6241_v1  ;;  %v6216_v53 = vor.u32 %v6928_v47, %v6213_v14  ;;  %v5936_v6 = vor.u32 %v6858_v24, %v5933_v62  ;;  %v6851_v10 = vld [vmem:[%s10439_s8 + $0x7c] sm:$0xf]  ;;  %v5905_v12 = vld [vmem:[%s10439_s8 + $0x94] sm:$0xf0]  ;;  %v6844_v48 = vld [vmem:[%s10439_s8 + $0x44] sm:$0xf] }
 0x2d7   :  { %v6907_v13 = vld [vmem:[%s10439_s8 + $0x23c] sm:$0xf]  ;;  %v6129_v42 = vld [vmem:[%s10439_s8 + $0x254] sm:$0xf0]  ;;  %v5908_v39 = vor.u32 %v6851_v10, %v5905_v12  ;;  %v5880_v21 = vor.u32 %v6844_v48, %v5877_v56  ;;  %v6101_v17 = vld [vmem:[%s10439_s8 + $0x21c] sm:$0xf0] }
 0x2d8   :  { %v2577_v25 = vpop.f32.mrf.mxu2  ;;  %v2595_v19 = vpop.f32.mrf.mxu3  ;;  %3752 = vmatmul.bf16.gmra.mxu0 %v9628_v35  ;;  %3770 = vmatmul.bf16.gmra.mxu1 %v9630_v40  ;;  %v6963_v11 = vld [vmem:[%s10439_s8 + $0x3fc] sm:$0xf]  ;;  %v6837_v18 = vld [vmem:[%s10439_s8 + $0xc] sm:$0xf]  ;;  %v6073_v1 = vld [vmem:[%s10439_s8 + $0x1e4] sm:$0xf0] }
 0x2d9   :  { %3921 = vmatpush.bf16.msra.mxu2 %v6436_v34  ;;  %3887 = vmatpush.bf16.msra.mxu0 %v5932_v46  ;;  %v6998_v34 = vld [vmem:[%s10439_s8 + $0x514] sm:$0xf]  ;;  %v6521_v25 = vld [vmem:[%s10439_s8 + $0x564] sm:$0xf0]  ;;  %v6872_v19 = vld [vmem:[%s10439_s8 + $0x124] sm:$0xf] }
 0x2da   :  { %3905 = vmatpush.bf16.msra.mxu1 %v6156_v54  ;;  %v6496_v20 = vor.u32 %v6998_v34, %v6493_v41  ;;  %v6524_v46 = vor.u32 %v7005_v52, %v6521_v25  ;;  %v5992_v43 = vor.u32 %v6872_v19, %v5989_v38  ;;  %v6991_v54 = vld [vmem:[%s10439_s8 + $0x4dc] sm:$0xf]  ;;  %v6325_v34 = vld [vmem:[%s10439_s8 + $0x3dc] sm:$0xf0]  ;;  %v6051_v25 = vld [vmem:[%s10439_s8 + $0x198] sm:$0xf] }
 0x2db   :  { %v6890_v19 = vld [vmem:[%s10439_s8 + $0x1b0] sm:$0xf0]  ;;  %v6949_v14 = vld [vmem:[%s10439_s8 + $0x38c] sm:$0xf]  ;;  %v5995_v24 = vld [vmem:[%s10439_s8 + $0x128] sm:$0xf] }
 0x2dc   :  { %v6052_v38 = vor.u32 %v6890_v19, %v6051_v25  ;;  %v6946_v47 = vld [vmem:[%s10439_s8 + $0x370] sm:$0xf0]  ;;  %v5967_v10 = vld [vmem:[%s10439_s8 + $0xf0] sm:$0xf]  ;;  %v5939_v56 = vld [vmem:[%s10439_s8 + $0xb8] sm:$0xf] }
 0x2dd   :  { %3922 = vmatpush.bf16.msra.mxu2 %v6408_v51  ;;  %3888 = vmatpush.bf16.msra.mxu0 %v5904_v2  ;;  %v6465_v51 = vld [vmem:[%s10439_s8 + $0x4f4] sm:$0xf0]  ;;  %v6185_v2 = vld [vmem:[%s10439_s8 + $0x2c4] sm:$0xf0]  ;;  %v7002_v30 = vld [vmem:[%s10439_s8 + $0x530] sm:$0xf0] }
 0x2de   :  { %3906 = vmatpush.bf16.msra.mxu1 %v6128_v61  ;;  %v6468_v57 = vor.u32 %v6991_v54, %v6465_v51  ;;  %v5964_v61 = vor.u32 %v6865_v45, %v5961_v58  ;;  %v6023_v54 = vld [vmem:[%s10439_s8 + $0x160] sm:$0xf]  ;;  %v6883_v51 = vld [vmem:[%s10439_s8 + $0x178] sm:$0xf0]  ;;  %v5883_v19 = vld [vmem:[%s10439_s8 + $0x48] sm:$0xf] }
 0x2df   :  { %3788 = vmatmul.bf16.gmra.mxu2 %v9664_v60  ;;  %6538 = vmatmul.msk.bf16.gmra.mxu3 %vm1296_vm0, %v9666_v29  ;;  %v6247_v45 = vld [vmem:[%s10439_s8 + $0x320] sm:$0xf]  ;;  %v6024_v58 = vor.u32 %v6883_v51, %v6023_v54 }
 0x2e1   :  { %3923 = vmatpush.bf16.msra.mxu2 %v6380_v5  ;;  %3889 = vmatpush.bf16.msra.mxu0 %v5876_v36  ;;  %v6188_v5 = vor.u32 %v6921_v59, %v6185_v2  ;;  %v6914_v36 = vld [vmem:[%s10439_s8 + $0x274] sm:$0xf]  ;;  %v6939_v59 = vld [vmem:[%s10439_s8 + $0x338] sm:$0xf0] }
 0x2e2   :  { %3907 = vmatpush.bf16.msra.mxu1 %v6100_v26  ;;  %v6409_v26 = vld [vmem:[%s10439_s8 + $0x484] sm:$0xf0]  ;;  %v6248_v2 = vor.u32 %v6939_v59, %v6247_v45  ;;  %v5855_v45 = vld [vmem:[%s10439_s8 + $0x10] sm:$0xf]  ;;  %v6897_v59 = vld [vmem:[%s10439_s8 + $0x1e8] sm:$0xf0] }
 0x2e3   :  { %v6412_v8 = vor.u32 %v6977_v16, %v6409_v26 }
 0x2e5   :  { %3924 = vmatpush.bf16.msra.mxu2 %v6352_v33  ;;  %3890 = vmatpush.bf16.msra.mxu0 %v5848_v9  ;;  %v6160_v33 = vor.u32 %v6914_v36, %v6157_v4  ;;  %v6132_v9 = vor.u32 %v6907_v13, %v6129_v42  ;;  %v6876_v36 = vld [vmem:[%s10439_s8 + $0x140] sm:$0xf0]  ;;  %v6869_v13 = vld [vmem:[%s10439_s8 + $0x108] sm:$0xf0]  ;;  %v6191_v42 = vld [vmem:[%s10439_s8 + $0x2b0] sm:$0xf] }
 0x2e6   :  { %3908 = vmatpush.bf16.msra.mxu1 %v6072_v49  ;;  %v6970_v49 = vld [vmem:[%s10439_s8 + $0x434] sm:$0xf]  ;;  %v6932_v4 = vld [vmem:[%s10439_s8 + $0x300] sm:$0xf0]  ;;  %v5996_v16 = vor.u32 %v6876_v36, %v5995_v24  ;;  %v6053_v24 = vld [vmem:[%s10439_s8 + $0x1b4] sm:$0xf0] }
 0x2e8   :  { %3819 = vmatmul.bf16.vlgmr.msrb.gmra.mxu0 %v9529_v37  ;;  %3837 = vmatmul.bf16.vlgmr.msrb.gmra.mxu1 %v9531_v55 }
 0x2e9   :  { %3925 = vmatpush.bf16.msra.mxu2 %v6324_v7  ;;  %3955 = vmatpush.bf16.msrb.mxu0 %v6048_v0  ;;  %v6381_v7 = vld [vmem:[%s10439_s8 + $0x44c] sm:$0xf0]  ;;  %v6900_v0 = vld [vmem:[%s10439_s8 + $0x204] sm:$0xf] }
 0x2ea   :  { %3973 = vmatpush.bf16.msrb.mxu1 %v6272_v28  ;;  %v6384_v15 = vor.u32 %v6970_v49, %v6381_v7  ;;  %v6353_v28 = vld [vmem:[%s10439_s8 + $0x414] sm:$0xf0]  ;;  %v6104_v3 = vor.u32 %v6900_v0, %v6101_v17  ;;  %v6443_v49 = vld [vmem:[%s10439_s8 + $0x4a8] sm:$0xf]  ;;  %v6988_v7 = vld [vmem:[%s10439_s8 + $0x4c0] sm:$0xf0] }
 0x2eb   :  { %v6356_v23 = vor.u32 %v6963_v11, %v6353_v28  ;;  %v6444_v48 = vor.u32 %v6988_v7, %v6443_v49  ;;  %v6862_v0 = vld [vmem:[%s10439_s8 + $0xd0] sm:$0xf0]  ;;  %v6415_v28 = vld [vmem:[%s10439_s8 + $0x470] sm:$0xf]  ;;  %v6501_v49 = vld [vmem:[%s10439_s8 + $0x534] sm:$0xf0] }
 0x2ec   :  { %v5940_v17 = vor.u32 %v6862_v0, %v5939_v56  ;;  %v6918_v11 = vld [vmem:[%s10439_s8 + $0x290] sm:$0xf0]  ;;  %v6929_v56 = vld [vmem:[%s10439_s8 + $0x2ec] sm:$0xf] }
 0x2ed   :  { %3926 = vmatpush.bf16.msra.mxu2 %v6296_v31  ;;  %3956 = vmatpush.bf16.msrb.mxu0 %v6020_v32  ;;  %v5849_v31 = vld [vmem:[%s10439_s8 + $0x24] sm:$0xf0]  ;;  %v6893_v32 = vld [vmem:[%s10439_s8 + $0x1cc] sm:$0xf]  ;;  %v7006_v0 = vld [vmem:[%s10439_s8 + $0x554] sm:$0xf] }
 0x2ee   :  { %3974 = vmatpush.bf16.msrb.mxu1 %v6244_v44  ;;  %v6956_v44 = vld [vmem:[%s10439_s8 + $0x3c4] sm:$0xf]  ;;  %v5852_v41 = vor.u32 %v6837_v18, %v5849_v31  ;;  %v5911_v31 = vld [vmem:[%s10439_s8 + $0x80] sm:$0xf] }
 0x2ef   :  { %3855 = vmatmul.bf16.vlgmr.msrb.gmra.mxu2 %v9571_v27  ;;  %6539 = vmatmul.msk.bf16.vlgmr.msrb.gmra.mxu3 %vm1296_vm0, %v9573_v22  ;;  %v6328_v52 = vor.u32 %v6956_v44, %v6325_v34  ;;  %v6911_v44 = vld [vmem:[%s10439_s8 + $0x258] sm:$0xf0] }
 0x2f0   :  { %4016 = vmatpush.bf16.msrb.mxu3 %v6524_v46  ;;  %v6275_v46 = vld [vmem:[%s10439_s8 + $0x358] sm:$0xf] }
 0x2f1   :  { %3991 = vmatpush.bf16.msrb.mxu2 %v6496_v20  ;;  %3957 = vmatpush.bf16.msrb.mxu0 %v5992_v43  ;;  %v6076_v20 = vor.u32 %v6893_v32, %v6073_v1  ;;  %v6297_v43 = vld [vmem:[%s10439_s8 + $0x3a4] sm:$0xf0]  ;;  %v6855_v32 = vld [vmem:[%s10439_s8 + $0x98] sm:$0xf0]  ;;  %v6135_v1 = vld [vmem:[%s10439_s8 + $0x240] sm:$0xf] }
 0x2f2   :  { %3975 = vmatpush.bf16.msrb.mxu1 %v6216_v53  ;;  %v6276_v53 = vor.u32 %v6946_v47, %v6275_v46  ;;  %v5912_v34 = vor.u32 %v6855_v32, %v5911_v31  ;;  %v6848_v46 = vld [vmem:[%s10439_s8 + $0x60] sm:$0xf0]  ;;  %v6866_v32 = vld [vmem:[%s10439_s8 + $0xf4] sm:$0xf] }
 0x2f3   :  { %v5884_v47 = vor.u32 %v6848_v46, %v5883_v19  ;;  %v6859_v46 = vld [vmem:[%s10439_s8 + $0xbc] sm:$0xf] }
 0x2f5   :  { %3992 = vmatpush.bf16.msrb.mxu2 %v6468_v57  ;;  %3958 = vmatpush.bf16.msrb.mxu0 %v5964_v61  ;;  %v6300_v57 = vor.u32 %v6949_v14, %v6297_v43  ;;  %v6499_v61 = vld [vmem:[%s10439_s8 + $0x518] sm:$0xf]  ;;  %v6904_v14 = vld [vmem:[%s10439_s8 + $0x220] sm:$0xf0]  ;;  %v6359_v43 = vld [vmem:[%s10439_s8 + $0x400] sm:$0xf] }
 0x2f6   :  { %3976 = vmatpush.bf16.msrb.mxu1 %v6188_v5  ;;  %v6500_v50 = vor.u32 %v7002_v30, %v6499_v61  ;;  %v6527_v5 = vld [vmem:[%s10439_s8 + $0x550] sm:$0xf]  ;;  %v6331_v30 = vld [vmem:[%s10439_s8 + $0x3c8] sm:$0xf] }
 0x2f8   :  { %3824 = vmatmul.bf16.gmra.mxu0 %v9628_v35  ;;  %3842 = vmatmul.bf16.gmra.mxu1 %v9630_v40 }
 0x2f9   :  { %3993 = vmatpush.bf16.msrb.mxu2 %v6440_v63  ;;  %3959 = vmatpush.bf16.msrb.mxu0 %v5936_v6  ;;  %v7009_v63 = vld [vmem:[%s10439_s8 + $0x568] sm:$0xf0]  ;;  %v6219_v6 = vld [vmem:[%s10439_s8 + $0x2e8] sm:$0xf] }
 0x2fa   :  { %3977 = vmatpush.bf16.msrb.mxu1 %v6160_v33  ;;  %v6528_v62 = vor.u32 %v7009_v63, %v6527_v5  ;;  %v6220_v26 = vor.u32 %v6932_v4, %v6219_v6  ;;  %v6471_v33 = vld [vmem:[%s10439_s8 + $0x4e0] sm:$0xf]  ;;  %v6887_v63 = vld [vmem:[%s10439_s8 + $0x19c] sm:$0xf]  ;;  %v6277_v6 = vld [vmem:[%s10439_s8 + $0x374] sm:$0xf0] }
 0x2fb   :  { %v6056_v36 = vor.u32 %v6887_v63, %v6053_v24  ;;  %v6303_v4 = vld [vmem:[%s10439_s8 + $0x390] sm:$0xf]  ;;  %v6845_v24 = vld [vmem:[%s10439_s8 + $0x4c] sm:$0xf] }
 0x2fd   :  { %3994 = vmatpush.bf16.msrb.mxu2 %v6412_v8  ;;  %3960 = vmatpush.bf16.msrb.mxu0 %v5908_v39  ;;  %v6995_v8 = vld [vmem:[%s10439_s8 + $0x4f8] sm:$0xf0]  ;;  %v6925_v39 = vld [vmem:[%s10439_s8 + $0x2c8] sm:$0xf0] }
 0x2fe   :  { %3978 = vmatpush.bf16.msrb.mxu1 %v6132_v9  ;;  %v6472_v12 = vor.u32 %v6995_v8, %v6471_v33  ;;  %v5968_v9 = vor.u32 %v6869_v13, %v5967_v10  ;;  %v6880_v8 = vld [vmem:[%s10439_s8 + $0x164] sm:$0xf]  ;;  %v6025_v10 = vld [vmem:[%s10439_s8 + $0x17c] sm:$0xf0] }
 0x2ff   :  { %3860 = vmatmul.bf16.gmra.mxu2 %v9664_v60  ;;  %6540 = vmatmul.msk.bf16.gmra.mxu3 %vm1296_vm0, %v9666_v29  ;;  %v6028_v13 = vor.u32 %v6880_v8, %v6025_v10  ;;  %v6838_v10 = vld [vmem:[%s10439_s8 + $0x14] sm:$0xf] }
 0x301   :  { %3995 = vmatpush.bf16.msrb.mxu2 %v6384_v15  ;;  %3961 = vmatpush.bf16.msrb.mxu0 %v5880_v21  ;;  %v6192_v15 = vor.u32 %v6925_v39, %v6191_v42  ;;  %v6163_v21 = vld [vmem:[%s10439_s8 + $0x278] sm:$0xf]  ;;  %v6249_v42 = vld [vmem:[%s10439_s8 + $0x33c] sm:$0xf0] }
 0x302   :  { %3979 = vmatpush.bf16.msrb.mxu1 %v6104_v3  ;;  %v6981_v3 = vld [vmem:[%s10439_s8 + $0x488] sm:$0xf0] }
 0x303   :  { %v6416_v18 = vor.u32 %v6981_v3, %v6415_v28 }
 0x305   :  { %3996 = vmatpush.bf16.msrb.mxu2 %v6356_v23  ;;  %3962 = vmatpush.bf16.msrb.mxu0 %v5852_v41  ;;  %v6164_v23 = vor.u32 %v6918_v11, %v6163_v21  ;;  %v6136_v41 = vor.u32 %v6911_v44, %v6135_v1  ;;  %v6529_v21 = vld [vmem:[%s10439_s8 + $0x56c] sm:$0xf0]  ;;  %v6221_v11 = vld [vmem:[%s10439_s8 + $0x304] sm:$0xf0]  ;;  %v6922_v44 = vld [vmem:[%s10439_s8 + $0x2b4] sm:$0xf] }
 0x306   :  { %3980 = vmatpush.bf16.msrb.mxu1 %v6076_v20  ;;  %v6387_v20 = vld [vmem:[%s10439_s8 + $0x438] sm:$0xf]  ;;  %v6532_v28 = vor.u32 %v7006_v0, %v6529_v21  ;;  %v6224_v3 = vor.u32 %v6929_v56, %v6221_v11  ;;  %v5969_v1 = vld [vmem:[%s10439_s8 + $0x10c] sm:$0xf0]  ;;  %v6333_v56 = vld [vmem:[%s10439_s8 + $0x3e4] sm:$0xf0] }
 0x307   :  { %v6059_v21 = vld [vmem:[%s10439_s8 + $0x1a0] sm:$0xf] }
 0x308   :  { %3891 = vmatmul.bf16.vlgmr.msra.gmra.mxu0 %v9529_v37  ;;  %3909 = vmatmul.bf16.vlgmr.msra.gmra.mxu1 %v9531_v55  ;;  %v6283_v11 = vld [vmem:[%s10439_s8 + $0x360] sm:$0xf] }
 0x309   :  { %3997 = vmatpush.bf16.msrb.mxu2 %v6328_v52  ;;  %4027 = vmatpush.bf16.msra.mxu0 %v6052_v38  ;;  %v6974_v52 = vld [vmem:[%s10439_s8 + $0x450] sm:$0xf0]  ;;  %v6107_v38 = vld [vmem:[%s10439_s8 + $0x208] sm:$0xf] }
 0x30a   :  { %4045 = vmatpush.bf16.msra.mxu1 %v6276_v53  ;;  %v6388_v25 = vor.u32 %v6974_v52, %v6387_v20  ;;  %v6967_v53 = vld [vmem:[%s10439_s8 + $0x418] sm:$0xf0]  ;;  %v6108_v54 = vor.u32 %v6904_v14, %v6107_v38  ;;  %v6985_v52 = vld [vmem:[%s10439_s8 + $0x4ac] sm:$0xf]  ;;  %v5941_v38 = vld [vmem:[%s10439_s8 + $0xd4] sm:$0xf0] }
 0x30b   :  { %v6360_v51 = vor.u32 %v6967_v53, %v6359_v43  ;;  %v5944_v14 = vor.u32 %v6859_v46, %v5941_v38  ;;  %v6165_v43 = vld [vmem:[%s10439_s8 + $0x294] sm:$0xf0]  ;;  %v6940_v46 = vld [vmem:[%s10439_s8 + $0x340] sm:$0xf0] }
 0x30d   :  { %3998 = vmatpush.bf16.msrb.mxu2 %v6300_v57  ;;  %4028 = vmatpush.bf16.msra.mxu0 %v6024_v58  ;;  %v6841_v57 = vld [vmem:[%s10439_s8 + $0x28] sm:$0xf0]  ;;  %v6079_v58 = vld [vmem:[%s10439_s8 + $0x1d0] sm:$0xf] }
 0x30e   :  { %4046 = vmatpush.bf16.msra.mxu1 %v6248_v2  ;;  %v5856_v2 = vor.u32 %v6841_v57, %v5855_v45  ;;  %v6080_v61 = vor.u32 %v6897_v59, %v6079_v58  ;;  %v6852_v57 = vld [vmem:[%s10439_s8 + $0x84] sm:$0xf]  ;;  %v5913_v58 = vld [vmem:[%s10439_s8 + $0x9c] sm:$0xf0] }
 0x30f   :  { %3927 = vmatmul.bf16.vlgmr.msra.gmra.mxu2 %v9571_v27  ;;  %6541 = vmatmul.msk.bf16.vlgmr.msra.gmra.mxu3 %vm1296_vm0, %v9573_v22  ;;  %v6908_v59 = vld [vmem:[%s10439_s8 + $0x244] sm:$0xf] }
 0x310   :  { %4088 = vmatpush.bf16.msra.mxu3 %v6528_v62  ;;  %v6943_v62 = vld [vmem:[%s10439_s8 + $0x35c] sm:$0xf] }
 0x311   :  { %4063 = vmatpush.bf16.msra.mxu2 %v6500_v50  ;;  %4029 = vmatpush.bf16.msra.mxu0 %v5996_v16  ;;  %v6960_v50 = vld [vmem:[%s10439_s8 + $0x3e0] sm:$0xf0]  ;;  %v6953_v16 = vld [vmem:[%s10439_s8 + $0x3a8] sm:$0xf0] }
 0x312   :  { %4047 = vmatpush.bf16.msra.mxu1 %v6220_v26  ;;  %v6332_v5 = vor.u32 %v6960_v50, %v6331_v30  ;;  %v6280_v26 = vor.u32 %v6943_v62, %v6277_v6  ;;  %v6304_v33 = vor.u32 %v6953_v16, %v6303_v4  ;;  %v6971_v50 = vld [vmem:[%s10439_s8 + $0x43c] sm:$0xf]  ;;  %v5885_v62 = vld [vmem:[%s10439_s8 + $0x64] sm:$0xf0] }
 0x313   :  { %v5888_v6 = vor.u32 %v6845_v24, %v5885_v62  ;;  %v6109_v4 = vld [vmem:[%s10439_s8 + $0x224] sm:$0xf0]  ;;  %v5975_v24 = vld [vmem:[%s10439_s8 + $0xf8] sm:$0xf]  ;;  %v6870_v62 = vld [vmem:[%s10439_s8 + $0x110] sm:$0xf0] }
 0x315   :  { %4064 = vmatpush.bf16.msra.mxu2 %v6472_v12  ;;  %4030 = vmatpush.bf16.msra.mxu0 %v5968_v9  ;;  %v6936_v12 = vld [vmem:[%s10439_s8 + $0x324] sm:$0xf]  ;;  %v6999_v9 = vld [vmem:[%s10439_s8 + $0x51c] sm:$0xf] }
 0x316   :  { %4048 = vmatpush.bf16.msra.mxu1 %v6192_v15  ;;  %v6252_v39 = vor.u32 %v6936_v12, %v6249_v42  ;;  %v6504_v7 = vor.u32 %v6999_v9, %v6501_v49  ;;  %v6873_v15 = vld [vmem:[%s10439_s8 + $0x12c] sm:$0xf]  ;;  %v5857_v12 = vld [vmem:[%s10439_s8 + $0x2c] sm:$0xf0] }
 0x317   :  { %v5860_v9 = vor.u32 %v6838_v10, %v5857_v12  ;;  %v6081_v49 = vld [vmem:[%s10439_s8 + $0x1ec] sm:$0xf0] }
 0x318   :  { %3896 = vmatmul.bf16.gmra.mxu0 %v9628_v35  ;;  %3914 = vmatmul.bf16.gmra.mxu1 %v9630_v40  ;;  %v6451_v12 = vld [vmem:[%s10439_s8 + $0x4b0] sm:$0xf] }
 0x319   :  { %4065 = vmatpush.bf16.msra.mxu2 %v6444_v48  ;;  %4031 = vmatpush.bf16.msra.mxu0 %v5940_v17  ;;  %v5997_v48 = vld [vmem:[%s10439_s8 + $0x144] sm:$0xf0] }
 0x31a   :  { %4049 = vmatpush.bf16.msra.mxu1 %v6164_v23  ;;  %v6000_v17 = vor.u32 %v6873_v15, %v5997_v48  ;;  %v6992_v23 = vld [vmem:[%s10439_s8 + $0x4e4] sm:$0xf]  ;;  %v6957_v48 = vld [vmem:[%s10439_s8 + $0x3cc] sm:$0xf] }
 0x31b   :  { %v6336_v0 = vor.u32 %v6957_v48, %v6333_v56  ;;  %v6863_v48 = vld [vmem:[%s10439_s8 + $0xd8] sm:$0xf0] }
 0x31d   :  { %4066 = vmatpush.bf16.msra.mxu2 %v6416_v18  ;;  %4032 = vmatpush.bf16.msra.mxu0 %v5912_v34  ;;  %v6473_v18 = vld [vmem:[%s10439_s8 + $0x4fc] sm:$0xf0]  ;;  %v5972_v34 = vor.u32 %v6866_v32, %v5969_v1  ;;  %v6305_v32 = vld [vmem:[%s10439_s8 + $0x3ac] sm:$0xf0] }
 0x31e   :  { %4050 = vmatpush.bf16.msra.mxu1 %v6136_v41  ;;  %v6476_v31 = vor.u32 %v6992_v23, %v6473_v18  ;;  %v6193_v41 = vld [vmem:[%s10439_s8 + $0x2cc] sm:$0xf0]  ;;  %v6947_v23 = vld [vmem:[%s10439_s8 + $0x378] sm:$0xf0] }
 0x31f   :  { %3932 = vmatmul.bf16.gmra.mxu2 %v9664_v60  ;;  %6542 = vmatmul.msk.bf16.gmra.mxu3 %vm1296_vm0, %v9666_v29  ;;  %v6196_v20 = vor.u32 %v6922_v44, %v6193_v41  ;;  %v6284_v18 = vor.u32 %v6947_v23, %v6283_v11  ;;  %v6031_v44 = vld [vmem:[%s10439_s8 + $0x168] sm:$0xf]  ;;  %v6919_v11 = vld [vmem:[%s10439_s8 + $0x298] sm:$0xf0] }
 0x320   :  { %v6255_v41 = vld [vmem:[%s10439_s8 + $0x328] sm:$0xf] }
 0x321   :  { %4067 = vmatpush.bf16.msra.mxu2 %v6388_v25  ;;  %4033 = vmatpush.bf16.msra.mxu0 %v5884_v47  ;;  %v6445_v25 = vld [vmem:[%s10439_s8 + $0x4c4] sm:$0xf0]  ;;  %v6915_v47 = vld [vmem:[%s10439_s8 + $0x27c] sm:$0xf]  ;;  %v6256_v38 = vor.u32 %v6940_v46, %v6255_v41 }
 0x322   :  { %4051 = vmatpush.bf16.msra.mxu1 %v6108_v54  ;;  %v6448_v19 = vor.u32 %v6985_v52, %v6445_v25  ;;  %v6168_v53 = vor.u32 %v6915_v47, %v6165_v43  ;;  %v6978_v54 = vld [vmem:[%s10439_s8 + $0x474] sm:$0xf]  ;;  %v6507_v47 = vld [vmem:[%s10439_s8 + $0x520] sm:$0xf] }
 0x325   :  { %4068 = vmatpush.bf16.msra.mxu2 %v6360_v51  ;;  %4034 = vmatpush.bf16.msra.mxu0 %v5856_v2  ;;  %v6417_v51 = vld [vmem:[%s10439_s8 + $0x48c] sm:$0xf0]  ;;  %v5916_v2 = vor.u32 %v6852_v57, %v5913_v58  ;;  %v6933_v58 = vld [vmem:[%s10439_s8 + $0x308] sm:$0xf0] }
 0x326   :  { %4052 = vmatpush.bf16.msra.mxu1 %v6080_v61  ;;  %v6420_v45 = vor.u32 %v6978_v54, %v6417_v51  ;;  %v6137_v61 = vld [vmem:[%s10439_s8 + $0x25c] sm:$0xf0]  ;;  %v6877_v54 = vld [vmem:[%s10439_s8 + $0x148] sm:$0xf0]  ;;  %v6227_v51 = vld [vmem:[%s10439_s8 + $0x2f0] sm:$0xf] }
 0x327   :  { %v6140_v30 = vor.u32 %v6908_v59, %v6137_v61  ;;  %v6228_v61 = vor.u32 %v6933_v58, %v6227_v51 }
 0x328   :  { %3963 = vmatmul.bf16.vlgmr.msrb.gmra.mxu0 %v9529_v37  ;;  %3981 = vmatmul.bf16.vlgmr.msrb.gmra.mxu1 %v9531_v55 }
 0x329   :  { %4069 = vmatpush.bf16.msra.mxu2 %v6332_v5  ;;  %4099 = vmatpush.bf16.msrb.mxu0 %v6056_v36  ;;  %v6389_v5 = vld [vmem:[%s10439_s8 + $0x454] sm:$0xf0]  ;;  %v6901_v36 = vld [vmem:[%s10439_s8 + $0x20c] sm:$0xf] }
 0x32a   :  { %4117 = vmatpush.bf16.msrb.mxu1 %v6280_v26  ;;  %v6392_v63 = vor.u32 %v6971_v50, %v6389_v5  ;;  %v6112_v16 = vor.u32 %v6901_v36, %v6109_v4  ;;  %v6964_v26 = vld [vmem:[%s10439_s8 + $0x404] sm:$0xf]  ;;  %v6199_v36 = vld [vmem:[%s10439_s8 + $0x2b8] sm:$0xf] }
 0x32b   :  { %v6996_v50 = vld [vmem:[%s10439_s8 + $0x500] sm:$0xf0] }
 0x32d   :  { %4070 = vmatpush.bf16.msra.mxu2 %v6304_v33  ;;  %4100 = vmatpush.bf16.msrb.mxu0 %v6028_v13  ;;  %v6361_v33 = vld [vmem:[%s10439_s8 + $0x41c] sm:$0xf0]  ;;  %v6894_v13 = vld [vmem:[%s10439_s8 + $0x1d4] sm:$0xf] }
 0x32e   :  { %4118 = vmatpush.bf16.msrb.mxu1 %v6252_v39  ;;  %v6364_v8 = vor.u32 %v6964_v26, %v6361_v33  ;;  %v6084_v15 = vor.u32 %v6894_v13, %v6081_v49  ;;  %v5976_v33 = vor.u32 %v6870_v62, %v5975_v24  ;;  %v6989_v13 = vld [vmem:[%s10439_s8 + $0x4c8] sm:$0xf0]  ;;  %v6367_v24 = vld [vmem:[%s10439_s8 + $0x408] sm:$0xf]  ;;  %v6968_v62 = vld [vmem:[%s10439_s8 + $0x420] sm:$0xf0] }
 0x32f   :  { %3999 = vmatmul.bf16.vlgmr.msrb.gmra.mxu2 %v9571_v27  ;;  %6543 = vmatmul.msk.bf16.vlgmr.msrb.gmra.mxu3 %vm1296_vm0, %v9573_v22 }
 0x330   :  { %4160 = vmatpush.bf16.msrb.mxu3 %v6532_v28 }
 0x331   :  { %4135 = vmatpush.bf16.msrb.mxu2 %v6504_v7  ;;  %4101 = vmatpush.bf16.msrb.mxu0 %v6000_v17  ;;  %v10190_v7 = vld [vmem:[%s10440_s9] sm:$0x7f]  ;;  %v6891_v17 = vld [vmem:[%s10439_s8 + $0x1b8] sm:$0xf0] }
 0x332   :  { %4119 = vmatpush.bf16.msrb.mxu1 %v6224_v3  ;;  %v10210_v28 = vperm.slane %v10190_v7, 0  ;;  %v6060_v3 = vor.u32 %v6891_v17, %v6059_v21  ;;  %v6171_v17 = vld [vmem:[%s10439_s8 + $0x280] sm:$0xf] }
 0x333   :  { %v6172_v23 = vor.u32 %v6919_v11, %v6171_v17 }
 0x335   :  { %4136 = vmatpush.bf16.msrb.mxu2 %v6476_v31  ;;  %4102 = vmatpush.bf16.msrb.mxu0 %v5972_v34  ;;  %v6950_v31 = vld [vmem:[%s10439_s8 + $0x394] sm:$0xf]  ;;  %v6884_v34 = vld [vmem:[%s10439_s8 + $0x180] sm:$0xf0] }
 0x336   :  { %4120 = vmatpush.bf16.msrb.mxu1 %v6196_v20  ;;  %v6308_v1 = vor.u32 %v6950_v31, %v6305_v32  ;;  %v6982_v31 = vld [vmem:[%s10439_s8 + $0x490] sm:$0xf0] }
 0x338   :  { %3968 = vmatmul.bf16.gmra.mxu0 %v9628_v35  ;;  %3986 = vmatmul.bf16.gmra.mxu1 %v9630_v40 }
 0x339   :  { %4137 = vmatpush.bf16.msrb.mxu2 %v6448_v19  ;;  %4103 = vmatpush.bf16.msrb.mxu0 %v5944_v14  ;;  %v6032_v19 = vor.u32 %v6884_v34, %v6031_v44  ;;  %v7003_v14 = vld [vmem:[%s10439_s8 + $0x538] sm:$0xf0] }
 0x33a   :  { %4121 = vmatpush.bf16.msrb.mxu1 %v6168_v53  ;;  %v6508_v43 = vor.u32 %v7003_v14, %v6507_v47  ;;  %v6003_v53 = vld [vmem:[%s10439_s8 + $0x130] sm:$0xf]  ;;  %v6395_v47 = vld [vmem:[%s10439_s8 + $0x440] sm:$0xf]  ;;  %v6975_v14 = vld [vmem:[%s10439_s8 + $0x458] sm:$0xf0] }
 0x33b   :  { %v6004_v57 = vor.u32 %v6877_v54, %v6003_v53 }
 0x33d   :  { %4138 = vmatpush.bf16.msrb.mxu2 %v6420_v45  ;;  %4104 = vmatpush.bf16.msrb.mxu0 %v5916_v2 }
 0x33e   :  { %4122 = vmatpush.bf16.msrb.mxu1 %v6140_v30  ;;  %v6479_v30 = vld [vmem:[%s10439_s8 + $0x4e8] sm:$0xf] }
 0x33f   :  { %4004 = vmatmul.bf16.gmra.mxu2 %v9664_v60  ;;  %6544 = vmatmul.msk.bf16.gmra.mxu3 %vm1296_vm0, %v9666_v29 }
 0x341   :  { %4139 = vmatpush.bf16.msrb.mxu2 %v6392_v63  ;;  %4105 = vmatpush.bf16.msrb.mxu0 %v5888_v6  ;;  %v6480_v63 = vor.u32 %v6996_v50, %v6479_v30  ;;  %v6115_v30 = vld [vmem:[%s10439_s8 + $0x210] sm:$0xf]  ;;  %v6905_v50 = vld [vmem:[%s10439_s8 + $0x228] sm:$0xf0] }
 0x342   :  { %4123 = vmatpush.bf16.msrb.mxu1 %v6112_v16 }
 0x345   :  { %v3748_v42 = vpop.f32.mrf.mxu0  ;;  %v3766_v39 = vpop.f32.mrf.mxu1  ;;  %4140 = vmatpush.bf16.msrb.mxu2 %v6364_v8  ;;  %4106 = vmatpush.bf16.msrb.mxu0 %v5860_v9  ;;  %v6926_v8 = vld [vmem:[%s10439_s8 + $0x2d0] sm:$0xf0] }
 0x346   :  { %4124 = vmatpush.bf16.msrb.mxu1 %v6084_v15  ;;  %v3749_v20 = vadd.f32 %v3748_v42, %v10210_v28  ;;  %v6200_v10 = vor.u32 %v6926_v8, %v6199_v36  ;;  %v5947_v15 = vld [vmem:[%s10439_s8 + $0xc0] sm:$0xf]  ;;  %v5863_v8 = vld [vmem:[%s10439_s8 + $0x18] sm:$0xf] }
 0x347   :  { %v5948_v21 = vor.u32 %v6863_v48, %v5947_v15  ;;  %v6961_v48 = vld [vmem:[%s10439_s8 + $0x3e8] sm:$0xf0] }
 0x348   :  { %4035 = vmatmul.bf16.vlgmr.msra.gmra.mxu0 %v9529_v37  ;;  %4053 = vmatmul.bf16.vlgmr.msra.gmra.mxu1 %v9531_v55  ;;  %v3767_v45 = vadd.f32 %v3766_v39, %v3749_v20  ;;  %v6452_v39 = vor.u32 %v6989_v13, %v6451_v12  ;;  %v5919_v20 = vld [vmem:[%s10439_s8 + $0x88] sm:$0xf]  ;;  %v6842_v12 = vld [vmem:[%s10439_s8 + $0x30] sm:$0xf0]  ;;  %v6087_v13 = vld [vmem:[%s10439_s8 + $0x1d8] sm:$0xf] }
 0x349   :  { %4141 = vmatpush.bf16.msrb.mxu2 %v6336_v0  ;;  %4171 = vmatpush.bf16.msra.mxu0 %v6060_v3 }
 0x34a   :  { %4189 = vmatpush.bf16.msra.mxu1 %v6284_v18  ;;  %v6423_v18 = vld [vmem:[%s10439_s8 + $0x478] sm:$0xf] }
 0x34b   :  { %v6424_v32 = vor.u32 %v6982_v31, %v6423_v18 }
 0x34d   :  { %v3750_v52 = vpop.f32.mrf.mxu0  ;;  %v3768_v25 = vpop.f32.mrf.mxu1  ;;  %4142 = vmatpush.bf16.msrb.mxu2 %v6308_v1  ;;  %4172 = vmatpush.bf16.msra.mxu0 %v6032_v19 }
 0x34e   :  { %4190 = vmatpush.bf16.msra.mxu1 %v6256_v38  ;;  %v3751_v6 = vadd.f32 %v3750_v52, %v10210_v28  ;;  %v6856_v52 = vld [vmem:[%s10439_s8 + $0xa0] sm:$0xf0] }
 0x34f   :  { %4071 = vmatmul.bf16.vlgmr.msra.gmra.mxu2 %v9571_v27  ;;  %6545 = vmatmul.msk.bf16.vlgmr.msra.gmra.mxu3 %vm1296_vm0, %v9573_v22  ;;  %v5920_v19 = vor.u32 %v6856_v52, %v5919_v20 }
 0x350   :  { %v3769_v9 = vadd.f32 %v3768_v25, %v3751_v6  ;;  %v6143_v25 = vld [vmem:[%s10439_s8 + $0x248] sm:$0xf] }
 0x351   :  { %4207 = vmatpush.bf16.msra.mxu2 %v6508_v43  ;;  %4173 = vmatpush.bf16.msra.mxu0 %v6004_v57  ;;  %v6396_v43 = vor.u32 %v6975_v14, %v6395_v47  ;;  %v6849_v57 = vld [vmem:[%s10439_s8 + $0x68] sm:$0xf0] }
 0x352   :  { %v3784_v59 = vpop.f32.mrf.mxu2  ;;  %v3802_v2 = vpop.f32.mrf.mxu3  ;;  %4191 = vmatpush.bf16.msra.mxu1 %v6228_v61 }
 0x353   :  { %v3785_v5 = vadd.f32 %v3784_v59, %v3767_v45  ;;  %v5891_v45 = vld [vmem:[%s10439_s8 + $0x50] sm:$0xf] }
 0x354   :  { %v5892_v61 = vor.u32 %v6849_v57, %v5891_v45 }
 0x355   :  { %v3803_v4 = vadd.f32 %v3802_v2, %v3785_v5  ;;  %v3753_v16 = vpop.f32.mrf.mxu0  ;;  %v3771_v26 = vpop.f32.mrf.mxu1  ;;  %4208 = vmatpush.bf16.msra.mxu2 %v6480_v63  ;;  %4174 = vmatpush.bf16.msra.mxu0 %v5976_v33  ;;  %v6116_v63 = vor.u32 %v6905_v50, %v6115_v30  ;;  %v6368_v33 = vor.u32 %v6968_v62, %v6367_v24 }
 0x356   :  { %4192 = vmatpush.bf16.msra.mxu1 %v6200_v10  ;;  %v3754_v1 = vadd.f32 %v3753_v16, %v10210_v28  ;;  %v6912_v28 = vld [vmem:[%s10439_s8 + $0x260] sm:$0xf0]  ;;  %v6535_v16 = vld [vmem:[%s10439_s8 + $0x558] sm:$0xf] }
 0x357   :  { %v4243_v42 = vsub.f32 0.0, %v3803_v4  ;;  %v6144_v38 = vor.u32 %v6912_v28, %v6143_v25 }
 0x358   :  { %4040 = vmatmul.bf16.gmra.mxu0 %v9628_v35  ;;  %4058 = vmatmul.bf16.gmra.mxu1 %v9630_v40  ;;  %v3772_v54 = vadd.f32 %v3771_v26, %v3754_v1  ;;  %v7010_v26 = vld [vmem:[%s10439_s8 + $0x570] sm:$0xf0] }
 0x359   :  { %v4264_v49 = vmul.f32 1.442695, %v4243_v42  ;;  %4209 = vmatpush.bf16.msra.mxu2 %v6452_v39  ;;  %4175 = vmatpush.bf16.msra.mxu0 %v5948_v21  ;;  %v6536_v10 = vor.u32 %v7010_v26, %v6535_v16  ;;  %v5864_v39 = vor.u32 %v6842_v12, %v5863_v8  ;;  %v10370_v21 = vperm.slane %v10190_v7, 1  ;;  %v6954_v1 = vld [vmem:[%s10439_s8 + $0x3b0] sm:$0xf0] }
 0x35a   :  { %v3786_v56 = vpop.f32.mrf.mxu2  ;;  %v3804_v0 = vpop.f32.mrf.mxu3  ;;  %4193 = vmatpush.bf16.msra.mxu1 %v6172_v23 }
 0x35b   :  { %7020 = vpow2.f32 %v4264_v49  ;;  %v3787_v3 = vadd.f32 %v3786_v56, %v3769_v9  ;;  %v6898_v9 = vld [vmem:[%s10439_s8 + $0x1f0] sm:$0xf0]  ;;  %v6339_v49 = vld [vmem:[%s10439_s8 + $0x3d0] sm:$0xf]  ;;  %4232 = vmatpush.bf16.msra.mxu3 %v6536_v10 }
 0x35c   :  { %v6088_v15 = vor.u32 %v6898_v9, %v6087_v13  ;;  %v6340_v17 = vor.u32 %v6961_v48, %v6339_v49 }
 0x35d   :  { %v3805_v44 = vadd.f32 %v3804_v0, %v3787_v3  ;;  %v3755_v34 = vpop.f32.mrf.mxu0  ;;  %v3773_v41 = vpop.f32.mrf.mxu1  ;;  %4210 = vmatpush.bf16.msra.mxu2 %v6424_v32  ;;  %4176 = vmatpush.bf16.msra.mxu0 %v5920_v19  ;;  %v6311_v32 = vld [vmem:[%s10439_s8 + $0x398] sm:$0xf] }
 0x35e   :  { %4194 = vmatpush.bf16.msra.mxu1 %v6144_v38  ;;  %v6312_v52 = vor.u32 %v6954_v1, %v6311_v32 }
 0x35f   :  { %v4250_v46 = vsub.f32 0.0, %v3805_v44  ;;  %4076 = vmatmul.bf16.gmra.mxu2 %v9664_v60  ;;  %6546 = vmatmul.msk.bf16.gmra.mxu3 %vm1296_vm0, %v9666_v29 }
 0x361   :  { %v7021_v53 = vpop.eup %7020  ;;  %v4278_v51 = vmul.f32 1.442695, %v4250_v46  ;;  %4211 = vmatpush.bf16.msra.mxu2 %v6396_v43  ;;  %4177 = vmatpush.bf16.msra.mxu0 %v5892_v61 }
 0x362   :  { %v10328_v58 = vadd.f32 1.0, %v7021_v53  ;;  %v3789_v59 = vpop.f32.mrf.mxu2  ;;  %v3807_v2 = vpop.f32.mrf.mxu3  ;;  %4195 = vmatpush.bf16.msra.mxu1 %v6116_v63 }
 0x363   :  { %7022 = vpow2.f32 %v4278_v51  ;;  %v3790_v5 = vadd.f32 %v3789_v59, %v3772_v54 }
 0x364   :  { %7024 = vrcp.f32 %v10328_v58  ;;  %v4338_v25 = vand.u32 2147483648, %v10328_v58  ;;  %v4336_v28 = vand.u32 2147483647, %v10328_v58  ;;  %vm4332_vm2 = vweird.f32 %v10328_v58 }
 0x365   :  { %v3808_v36 = vadd.f32 %v3807_v2, %v3790_v5  ;;  %v3820_v6 = vpop.f32.mrf.mxu0  ;;  %v3838_v4 = vpop.f32.mrf.mxu1  ;;  %4212 = vmatpush.bf16.msra.mxu2 %v6368_v33  ;;  %4178 = vmatpush.bf16.msra.mxu0 %v5864_v39 }
 0x366   :  { %4196 = vmatpush.bf16.msra.mxu1 %v6088_v15  ;;  %v3821_v34 = vadd.f32 %v3820_v6, %v10370_v21  ;;  %v4339_v43 = vor.u32 1.1754944e-38, %v4338_v25  ;;  %vm4337_vm4 = vcmp.eq.f32.partialorder %v4336_v28, 8.507059e+37 }
 0x367   :  { %v4257_v42 = vsub.f32 0.0, %v3808_v36 }
 0x368   :  { %4107 = vmatmul.bf16.vlgmr.msrb.gmra.mxu0 %v9529_v37  ;;  %4125 = vmatmul.bf16.vlgmr.msrb.gmra.mxu1 %v9531_v55  ;;  %v3839_v47 = vadd.f32 %v3838_v4, %v3821_v34 }
 0x369   :  { %v7023_v56 = vpop.eup %7022  ;;  %v4292_v0 = vmul.f32 1.442695, %v4257_v42  ;;  %4213 = vmatpush.bf16.msra.mxu2 %v6340_v17 }
 0x36a   :  { %v7025_v11 = vpop.eup %7024  ;;  %v4313_v3 = vadd.f32 1.0, %v7023_v56  ;;  %v3791_v23 = vpop.f32.mrf.mxu2 }
 0x36b   :  { %v3809_v18 = vpop.f32.mrf.mxu3  ;;  %v4328_v31 = vmul.f32 %v7025_v11, %v10328_v58  ;;  %7026 = vpow2.f32 %v4292_v0  ;;  %vm4333_vm1 = vweird.f32 %v7025_v11 }
 0x36c   :  { %7028 = vrcp.f32 %v4313_v3  ;;  %vm4334_vm3 = vmor %vm4332_vm2, %vm4333_vm1  ;;  %v4443_v63 = vand.u32 2147483648, %v4313_v3  ;;  %v4441_v62 = vand.u32 2147483647, %v4313_v3  ;;  %vm4437_vm6 = vweird.f32 %v4313_v3 }
 0x36d   :  { %v4329_v44 = vsub.f32 1.0, %v4328_v31  ;;  %v3822_v41 = vpop.f32.mrf.mxu0  ;;  %v3840_v20 = vpop.f32.mrf.mxu1  ;;  %4214 = vmatpush.bf16.msra.mxu2 %v6312_v52 }
 0x36e   :  { %v3823_v58 = vadd.f32 %v3822_v41, %v10370_v21  ;;  %v4444_v26 = vor.u32 1.1754944e-38, %v4443_v63  ;;  %vm4442_vm8 = vcmp.eq.f32.partialorder %v4441_v62, 8.507059e+37 }
 0x36f   :  { %v4330_v19 = vmul.f32 %v7025_v11, %v4329_v44  ;;  %4143 = vmatmul.bf16.vlgmr.msrb.gmra.mxu2 %v9571_v27  ;;  %6547 = vmatmul.msk.bf16.vlgmr.msrb.gmra.mxu3 %vm1296_vm0, %v9573_v22 }
 0x370   :  { %v3841_v33 = vadd.f32 %v3840_v20, %v3823_v58 }
 0x371   :  { %v7027_v46 = vpop.eup %7026  ;;  %v4331_v38 = vadd.f32 %v7025_v11, %v4330_v19 }
 0x372   :  { %v7029_v14 = vpop.eup %7028  ;;  %v4320_v53 = vadd.f32 1.0, %v7027_v46  ;;  %v3856_v54 = vpop.f32.mrf.mxu2 }
 0x373   :  { %v3874_v51 = vpop.f32.mrf.mxu3  ;;  %v4335_v45 = vsel %vm4334_vm3, %v7025_v11, %v4331_v38  ;;  %v4433_v57 = vmul.f32 %v7029_v14, %v4313_v3  ;;  %v3857_v59 = vadd.f32 %v3856_v54, %v3839_v47  ;;  %vm4438_vm5 = vweird.f32 %v7029_v14 }
 0x374   :  { %v4340_v2 = vsel %vm4337_vm4, %v4339_v43, %v4335_v45  ;;  %7030 = vrcp.f32 %v4320_v53  ;;  %vm4439_vm7 = vmor %vm4437_vm6, %vm4438_vm5  ;;  %v4548_v56 = vand.u32 2147483648, %v4320_v53  ;;  %v4546_v11 = vand.u32 2147483647, %v4320_v53 }
 0x375   :  { %4642 = vst [vmem:[#allocation2] sm:$0xff] %v4340_v2  ;;  %v4434_v61 = vsub.f32 1.0, %v4433_v57  ;;  %v3875_v30 = vadd.f32 %v3874_v51, %v3857_v59  ;;  %v3825_v50 = vpop.f32.mrf.mxu0  ;;  %v3843_v5 = vpop.f32.mrf.mxu1  ;;  %vm4542_vm10 = vweird.f32 %v4320_v53  ;;  %v10396_v47 = vperm.slane %v10190_v7, 2 }
 0x376   :  { %v3826_v49 = vadd.f32 %v3825_v50, %v10370_v21  ;;  %v4549_v32 = vor.u32 1.1754944e-38, %v4548_v56  ;;  %vm4547_vm12 = vcmp.eq.f32.partialorder %v4546_v11, 8.507059e+37 }
 0x377   :  { %v4435_v24 = vmul.f32 %v7029_v14, %v4434_v61  ;;  %v4244_v36 = vsub.f32 0.0, %v3875_v30 }
 0x378   :  { %4112 = vmatmul.bf16.gmra.mxu0 %v9628_v35  ;;  %4130 = vmatmul.bf16.gmra.mxu1 %v9630_v40  ;;  %v3844_v31 = vadd.f32 %v3843_v5, %v3826_v49 }
 0x379   :  { %v4436_v6 = vadd.f32 %v7029_v14, %v4435_v24  ;;  %v4266_v4 = vmul.f32 1.442695, %v4244_v36 }
 0x37a   :  { %v7031_v16 = vpop.eup %7030  ;;  %v3858_v8 = vpop.f32.mrf.mxu2 }
 0x37b   :  { %v3876_v10 = vpop.f32.mrf.mxu3  ;;  %v4440_v12 = vsel %vm4439_vm7, %v7029_v14, %v4436_v6  ;;  %v4538_v13 = vmul.f32 %v7031_v16, %v4320_v53  ;;  %7032 = vpow2.f32 %v4266_v4  ;;  %v3859_v39 = vadd.f32 %v3858_v8, %v3841_v33 }
 0x37c   :  { %v4445_v42 = vsel %vm4442_vm8, %v4444_v26, %v4440_v12  ;;  %vm4543_vm9 = vweird.f32 %v7031_v16 }
 0x37d   :  { %4649 = vst [vmem:[#allocation2 + $0x38] sm:$0xff] %v4445_v42  ;;  %v4539_v9 = vsub.f32 1.0, %v4538_v13  ;;  %v3827_v15 = vpop.f32.mrf.mxu0  ;;  %v3845_v48 = vpop.f32.mrf.mxu1  ;;  %v3877_v0 = vadd.f32 %v3876_v10, %v3859_v39  ;;  %vm4544_vm11 = vmor %vm4542_vm10, %vm4543_vm9 }
 0x37f   :  { %v4540_v17 = vmul.f32 %v7031_v16, %v4539_v9  ;;  %4148 = vmatmul.bf16.gmra.mxu2 %v9664_v60  ;;  %6548 = vmatmul.msk.bf16.gmra.mxu3 %vm1296_vm0, %v9666_v29  ;;  %v4251_v3 = vsub.f32 0.0, %v3877_v0 }
 0x381   :  { %v7033_v23 = vpop.eup %7032  ;;  %v4541_v18 = vadd.f32 %v7031_v16, %v4540_v17  ;;  %v4280_v1 = vmul.f32 1.442695, %v4251_v3 }
 0x382   :  { %v4307_v21 = vadd.f32 1.0, %v7033_v23  ;;  %v3861_v44 = vpop.f32.mrf.mxu2 }
 0x383   :  { %v3879_v34 = vpop.f32.mrf.mxu3  ;;  %v4545_v41 = vsel %vm4544_vm11, %v7031_v16, %v4541_v18  ;;  %v3862_v20 = vadd.f32 %v3861_v44, %v3844_v31 }
 0x384   :  { %v4550_v52 = vsel %vm4547_vm12, %v4549_v32, %v4545_v41  ;;  %7034 = vrcp.f32 %v4307_v21  ;;  %v4353_v30 = vand.u32 2147483648, %v4307_v21  ;;  %vm4347_vm14 = vweird.f32 %v4307_v21 }
 0x385   :  { %4656 = vst [vmem:[#allocation2 + $0x70] sm:$0xff] %v4550_v52  ;;  %7036 = vpow2.f32 %v4280_v1  ;;  %v3880_v25 = vadd.f32 %v3879_v34, %v3862_v20  ;;  %v3892_v19 = vpop.f32.mrf.mxu0  ;;  %v3910_v28 = vpop.f32.mrf.mxu1 }
 0x386   :  { %v3893_v59 = vadd.f32 %v3892_v19, %v10396_v47  ;;  %v4354_v58 = vor.u32 1.1754944e-38, %v4353_v30 }
 0x387   :  { %v4258_v46 = vsub.f32 0.0, %v3880_v25 }
 0x388   :  { %4179 = vmatmul.bf16.vlgmr.msra.gmra.mxu0 %v9529_v37  ;;  %4197 = vmatmul.bf16.vlgmr.msra.gmra.mxu1 %v9531_v55  ;;  %v4351_v55 = vand.u32 2147483647, %v4307_v21  ;;  %v3911_v63 = vadd.f32 %v3910_v28, %v3893_v59  ;;  %v2822_v59 = vperm.slane %v10190_v7, 3 }
 0x389   :  { %v4294_v38 = vmul.f32 1.442695, %v4258_v46 }
 0x38a   :  { %v7035_v14 = vpop.eup %7034  ;;  %v3863_v43 = vpop.f32.mrf.mxu2  ;;  %vm4352_vm1 = vcmp.eq.f32.partialorder %v4351_v55, 8.507059e+37 }
 0x38b   :  { %v3881_v53 = vpop.f32.mrf.mxu3  ;;  %v7037_v54 = vpop.eup %7036  ;;  %v4343_v51 = vmul.f32 %v7035_v14, %v4307_v21  ;;  %7038 = vpow2.f32 %v4294_v38  ;;  %vm4348_vm13 = vweird.f32 %v7035_v14 }
 0x38c   :  { %v4314_v45 = vadd.f32 1.0, %v7037_v54  ;;  %vm4349_vm15 = vmor %vm4347_vm14, %vm4348_vm13 }
 0x38d   :  { %v4344_v57 = vsub.f32 1.0, %v4343_v51  ;;  %v3894_v2 = vpop.f32.mrf.mxu0  ;;  %v3912_v61 = vpop.f32.mrf.mxu1 }
 0x38e   :  { %7040 = vrcp.f32 %v4314_v45  ;;  %v3895_v10 = vadd.f32 %v3894_v2, %v10396_v47  ;;  %v4458_v42 = vand.u32 2147483648, %v4314_v45  ;;  %v4456_v9 = vand.u32 2147483647, %v4314_v45 }
 0x38f   :  { %v4345_v37 = vmul.f32 %v7035_v14, %v4344_v57  ;;  %4215 = vmatmul.bf16.vlgmr.msra.gmra.mxu2 %v9571_v27  ;;  %6549 = vmatmul.msk.bf16.vlgmr.msra.gmra.mxu3 %vm1296_vm0, %v9573_v22  ;;  %vm4452_vm3 = vweird.f32 %v4314_v45 }
 0x390   :  { %v3913_v48 = vadd.f32 %v3912_v61, %v3895_v10  ;;  %v4459_v3 = vor.u32 1.1754944e-38, %v4458_v42  ;;  %vm4457_vm5 = vcmp.eq.f32.partialorder %v4456_v9, 8.507059e+37 }
 0x391   :  { %v7039_v50 = vpop.eup %7038  ;;  %v4346_v5 = vadd.f32 %v7035_v14, %v4345_v37 }
 0x392   :  { %v10402_v24 = vadd.f32 1.0, %v7039_v50  ;;  %v3928_v62 = vpop.f32.mrf.mxu2 }
 0x393   :  { %v3946_v36 = vpop.f32.mrf.mxu3  ;;  %v4350_v6 = vsel %vm4349_vm15, %v7035_v14, %v4346_v5  ;;  %v3929_v4 = vadd.f32 %v3928_v62, %v3911_v63 }
 0x394   :  { %v7041_v16 = vpop.eup %7040  ;;  %v4355_v26 = vsel %vm4352_vm1, %v4354_v58, %v4350_v6  ;;  %7042 = vrcp.f32 %v10402_v24  ;;  %v4563_v1 = vand.u32 2147483648, %v10402_v24  ;;  %v4561_v41 = vand.u32 2147483647, %v10402_v24 }
 0x395   :  { %4643 = vst [vmem:[#allocation2 + $0x8] sm:$0xff] %v4355_v26  ;;  %v4448_v27 = vmul.f32 %v7041_v16, %v4314_v45  ;;  %v3947_v22 = vadd.f32 %v3946_v36, %v3929_v4  ;;  %v3897_v33 = vpop.f32.mrf.mxu0  ;;  %v3915_v8 = vpop.f32.mrf.mxu1  ;;  %vm4453_vm2 = vweird.f32 %v7041_v16  ;;  %vm4557_vm7 = vweird.f32 %v10402_v24 }
 0x396   :  { %vm4454_vm4 = vmor %vm4452_vm3, %vm4453_vm2  ;;  %v4564_v28 = vor.u32 1.1754944e-38, %v4563_v1  ;;  %vm4562_vm9 = vcmp.eq.f32.partialorder %v4561_v41, 8.507059e+37 }
 0x397   :  { %v4449_v12 = vsub.f32 1.0, %v4448_v27  ;;  %v4245_v13 = vsub.f32 0.0, %v3947_v22 }
 0x398   :  { %4184 = vmatmul.bf16.gmra.mxu0 %v9628_v35  ;;  %4202 = vmatmul.bf16.gmra.mxu1 %v9630_v40  ;;  %v3898_v40 = vadd.f32 %v3897_v33, %v10396_v47 }
 0x399   :  { %v4450_v39 = vmul.f32 %v7041_v16, %v4449_v12  ;;  %v4268_v49 = vmul.f32 1.442695, %v4245_v13 }
 0x39a   :  { %v7043_v15 = vpop.eup %7042  ;;  %v3930_v56 = vpop.f32.mrf.mxu2  ;;  %v3916_v19 = vadd.f32 %v3915_v8, %v3898_v40 }
 0x39b   :  { %v3948_v0 = vpop.f32.mrf.mxu3  ;;  %v4451_v17 = vadd.f32 %v7041_v16, %v4450_v39  ;;  %v4553_v11 = vmul.f32 %v7043_v15, %v10402_v24  ;;  %7044 = vpow2.f32 %v4268_v49  ;;  %v3931_v23 = vadd.f32 %v3930_v56, %v3913_v48 }
 0x39c   :  { %vm4558_vm6 = vweird.f32 %v7043_v15 }
 0x39d   :  { %v4455_v18 = vsel %vm4454_vm4, %v7041_v16, %v4451_v17  ;;  %v4554_v35 = vsub.f32 1.0, %v4553_v11  ;;  %v3899_v31 = vpop.f32.mrf.mxu0  ;;  %v3917_v32 = vpop.f32.mrf.mxu1  ;;  %v3949_v44 = vadd.f32 %v3948_v0, %v3931_v23  ;;  %vm4559_vm8 = vmor %vm4557_vm7, %vm4558_vm6 }
 0x39e   :  { %v4460_v21 = vsel %vm4457_vm5, %v4459_v3, %v4455_v18 }
 0x39f   :  { %4650 = vst [vmem:[#allocation2 + $0x40] sm:$0xff] %v4460_v21  ;;  %v4555_v34 = vmul.f32 %v7043_v15, %v4554_v35  ;;  %4220 = vmatmul.bf16.gmra.mxu2 %v9664_v60  ;;  %6550 = vmatmul.msk.bf16.gmra.mxu3 %vm1296_vm0, %v9666_v29  ;;  %v4252_v20 = vsub.f32 0.0, %v3949_v44 }
 0x3a1   :  { %v7045_v52 = vpop.eup %7044  ;;  %v4556_v25 = vadd.f32 %v7043_v15, %v4555_v34  ;;  %v4282_v38 = vmul.f32 1.442695, %v4252_v20 }
 0x3a2   :  { %v4308_v46 = vadd.f32 1.0, %v7045_v52  ;;  %v3933_v47 = vpop.f32.mrf.mxu2 }
 0x3a3   :  { %v3951_v14 = vpop.f32.mrf.mxu3  ;;  %v4560_v43 = vsel %vm4559_vm8, %v7043_v15, %v4556_v25  ;;  %v3934_v53 = vadd.f32 %v3933_v47, %v3916_v19 }
 0x3a4   :  { %v4565_v54 = vsel %vm4562_vm9, %v4564_v28, %v4560_v43  ;;  %7046 = vrcp.f32 %v4308_v46  ;;  %v4368_v62 = vand.u32 2147483648, %v4308_v46  ;;  %v4366_v6 = vand.u32 2147483647, %v4308_v46 }
 0x3a5   :  { %4657 = vst [vmem:[#allocation2 + $0x78] sm:$0xff] %v4565_v54  ;;  %7048 = vpow2.f32 %v4282_v38  ;;  %v3952_v60 = vadd.f32 %v3951_v14, %v3934_v53  ;;  %v3964_v29 = vpop.f32.mrf.mxu0  ;;  %v3982_v51 = vpop.f32.mrf.mxu1  ;;  %vm4362_vm11 = vweird.f32 %v4308_v46 }
 0x3a6   :  { %v3965_v63 = vadd.f32 %v3964_v29, %v2822_v59  ;;  %v4369_v27 = vor.u32 1.1754944e-38, %v4368_v62  ;;  %vm4367_vm13 = vcmp.eq.f32.partialorder %v4366_v6, 8.507059e+37 }
 0x3a7   :  { %v4259_v45 = vsub.f32 0.0, %v3952_v60 }
 0x3a8   :  { %v3983_v26 = vadd.f32 %v3982_v51, %v3965_v63  ;;  %v2823_v63 = vperm.slane %v10190_v7, 4 }
 0x3a9   :  { %v4296_v57 = vmul.f32 1.442695, %v4259_v45 }
 0x3aa   :  { %v7047_v2 = vpop.eup %7046  ;;  %v3935_v61 = vpop.f32.mrf.mxu2 }
 0x3ab   :  { %v3953_v30 = vpop.f32.mrf.mxu3  ;;  %v7049_v37 = vpop.eup %7048  ;;  %v4358_v55 = vmul.f32 %v7047_v2, %v4308_v46  ;;  %7050 = vpow2.f32 %v4296_v57  ;;  %vm4363_vm10 = vweird.f32 %v7047_v2 }
 0x3ac   :  { %v4315_v50 = vadd.f32 1.0, %v7049_v37  ;;  %vm4364_vm12 = vmor %vm4362_vm11, %vm4363_vm10 }
 0x3ad   :  { %v4359_v5 = vsub.f32 1.0, %v4358_v55  ;;  %v3966_v58 = vpop.f32.mrf.mxu0  ;;  %v3984_v24 = vpop.f32.mrf.mxu1 }
 0x3ae   :  { %7052 = vrcp.f32 %v4315_v50  ;;  %v3967_v48 = vadd.f32 %v3966_v58, %v2822_v59  ;;  %v4473_v17 = vand.u32 2147483648, %v4315_v50  ;;  %v4471_v3 = vand.u32 2147483647, %v4315_v50 }
 0x3af   :  { %v4360_v36 = vmul.f32 %v7047_v2, %v4359_v5  ;;  %vm4467_vm15 = vweird.f32 %v4315_v50 }
 0x3b0   :  { %v3985_v35 = vadd.f32 %v3984_v24, %v3967_v48  ;;  %v4474_v1 = vor.u32 1.1754944e-38, %v4473_v17  ;;  %vm4472_vm2 = vcmp.eq.f32.partialorder %v4471_v3, 8.507059e+37 }
 0x3b1   :  { %v7051_v4 = vpop.eup %7050  ;;  %v4361_v16 = vadd.f32 %v7047_v2, %v4360_v36 }
 0x3b2   :  { %v4322_v22 = vadd.f32 1.0, %v7051_v4  ;;  %v4000_v33 = vpop.f32.mrf.mxu2 }
 0x3b3   :  { %v4018_v8 = vpop.f32.mrf.mxu3  ;;  %v4365_v10 = vsel %vm4364_vm12, %v7047_v2, %v4361_v16  ;;  %v4001_v12 = vadd.f32 %v4000_v33, %v3983_v26 }
 0x3b4   :  { %v7053_v13 = vpop.eup %7052  ;;  %v4370_v42 = vsel %vm4367_vm13, %v4369_v27, %v4365_v10  ;;  %7054 = vrcp.f32 %v4322_v22  ;;  %v4578_v28 = vand.u32 2147483648, %v4322_v22  ;;  %v4576_v47 = vand.u32 2147483647, %v4322_v22 }
 0x3b5   :  { %4644 = vst [vmem:[#allocation2 + $0x10] sm:$0xff] %v4370_v42  ;;  %v4463_v39 = vmul.f32 %v7053_v13, %v4315_v50  ;;  %v4019_v9 = vadd.f32 %v4018_v8, %v4001_v12  ;;  %v3969_v49 = vpop.f32.mrf.mxu0  ;;  %v3987_v15 = vpop.f32.mrf.mxu1  ;;  %vm4468_vm14 = vweird.f32 %v7053_v13  ;;  %vm4572_vm4 = vweird.f32 %v4322_v22 }
 0x3b6   :  { %vm4469_vm1 = vmor %vm4467_vm15, %vm4468_vm14  ;;  %v3970_v20 = vadd.f32 %v3969_v49, %v2822_v59  ;;  %v4579_v60 = vor.u32 1.1754944e-38, %v4578_v28  ;;  %vm4577_vm6 = vcmp.eq.f32.partialorder %v4576_v47, 8.507059e+37 }
 0x3b7   :  { %v4464_v56 = vsub.f32 1.0, %v4463_v39  ;;  %v4246_v0 = vsub.f32 0.0, %v4019_v9 }
 0x3b8   :  { %v3988_v54 = vadd.f32 %v3987_v15, %v3970_v20 }
 0x3b9   :  { %v4465_v11 = vmul.f32 %v7053_v13, %v4464_v56  ;;  %v4270_v23 = vmul.f32 1.442695, %v4246_v0 }
 0x3ba   :  { %v7055_v18 = vpop.eup %7054  ;;  %v4002_v40 = vpop.f32.mrf.mxu2 }
 0x3bb   :  { %v4020_v31 = vpop.f32.mrf.mxu3  ;;  %v4466_v32 = vadd.f32 %v7053_v13, %v4465_v11  ;;  %v4568_v21 = vmul.f32 %v7055_v18, %v4322_v22  ;;  %7056 = vpow2.f32 %v4270_v23  ;;  %v4003_v44 = vadd.f32 %v4002_v40, %v3985_v35 }
 0x3bc   :  { %vm4573_vm3 = vweird.f32 %v7055_v18 }
 0x3bd   :  { %v4470_v34 = vsel %vm4469_vm1, %v7053_v13, %v4466_v32  ;;  %v4569_v41 = vsub.f32 1.0, %v4568_v21  ;;  %v3971_v52 = vpop.f32.mrf.mxu0  ;;  %v3989_v25 = vpop.f32.mrf.mxu1  ;;  %v4021_v46 = vadd.f32 %v4020_v31, %v4003_v44  ;;  %vm4574_vm5 = vmor %vm4572_vm4, %vm4573_vm3 }
 0x3be   :  { %v4475_v19 = vsel %vm4472_vm2, %v4474_v1, %v4470_v34 }
 0x3bf   :  { %4651 = vst [vmem:[#allocation2 + $0x48] sm:$0xff] %v4475_v19  ;;  %v4570_v38 = vmul.f32 %v7055_v18, %v4569_v41  ;;  %v4253_v14 = vsub.f32 0.0, %v4021_v46 }
 0x3c1   :  { %v7057_v43 = vpop.eup %7056  ;;  %v4571_v53 = vadd.f32 %v7055_v18, %v4570_v38  ;;  %v4284_v51 = vmul.f32 1.442695, %v4253_v14 }
 0x3c2   :  { %v4309_v29 = vadd.f32 1.0, %v7057_v43  ;;  %v4005_v45 = vpop.f32.mrf.mxu2 }
 0x3c3   :  { %v4023_v57 = vpop.f32.mrf.mxu3  ;;  %v4575_v59 = vsel %vm4574_vm5, %v7055_v18, %v4571_v53  ;;  %v4006_v2 = vadd.f32 %v4005_v45, %v3988_v54 }
 0x3c4   :  { %v4580_v61 = vsel %vm4577_vm6, %v4579_v60, %v4575_v59  ;;  %7058 = vrcp.f32 %v4309_v29  ;;  %v4383_v33 = vand.u32 2147483648, %v4309_v29  ;;  %v4381_v10 = vand.u32 2147483647, %v4309_v29 }
 0x3c5   :  { %4658 = vst [vmem:[#allocation2 + $0x80] sm:$0xff] %v4580_v61  ;;  %7060 = vpow2.f32 %v4284_v51  ;;  %v4024_v30 = vadd.f32 %v4023_v57, %v4006_v2  ;;  %v4036_v37 = vpop.f32.mrf.mxu0  ;;  %v4054_v55 = vpop.f32.mrf.mxu1  ;;  %vm4377_vm8 = vweird.f32 %v4309_v29 }
 0x3c6   :  { %v4037_v26 = vadd.f32 %v4036_v37, %v2823_v63  ;;  %v4384_v42 = vor.u32 1.1754944e-38, %v4383_v33  ;;  %vm4382_vm10 = vcmp.eq.f32.partialorder %v4381_v10, 8.507059e+37 }
 0x3c7   :  { %v4260_v50 = vsub.f32 0.0, %v4024_v30 }
 0x3c8   :  { %v4055_v7 = vadd.f32 %v4054_v55, %v4037_v26 }
 0x3c9   :  { %v4298_v5 = vmul.f32 1.442695, %v4260_v50 }
 0x3ca   :  { %v7059_v58 = vpop.eup %7058  ;;  %v4007_v24 = vpop.f32.mrf.mxu2 }
 0x3cb   :  { %v4025_v62 = vpop.f32.mrf.mxu3  ;;  %v7061_v36 = vpop.eup %7060  ;;  %v4373_v6 = vmul.f32 %v7059_v58, %v4309_v29  ;;  %7062 = vpow2.f32 %v4298_v5  ;;  %vm4378_vm7 = vweird.f32 %v7059_v58 }
 0x3cc   :  { %v4316_v4 = vadd.f32 1.0, %v7061_v36  ;;  %vm4379_vm9 = vmor %vm4377_vm8, %vm4378_vm7 }
 0x3cd   :  { %v4374_v16 = vsub.f32 1.0, %v4373_v6  ;;  %v4038_v27 = vpop.f32.mrf.mxu0  ;;  %v4056_v22 = vpop.f32.mrf.mxu1 }
 0x3ce   :  { %7064 = vrcp.f32 %v4316_v4  ;;  %v4039_v18 = vadd.f32 %v4038_v27, %v2823_v63  ;;  %v4488_v31 = vand.u32 2147483648, %v4316_v4  ;;  %v4486_v21 = vand.u32 2147483647, %v4316_v4 }
 0x3cf   :  { %v4375_v8 = vmul.f32 %v7059_v58, %v4374_v16  ;;  %vm4482_vm12 = vweird.f32 %v4316_v4  ;;  %v10421_v16 = vld [vmem:[%s10440_s9] sm:$0x7f]  ;;  %s7132_s9 = smov [#allocation2]  }
 0x3d0   :  { %v4057_v34 = vadd.f32 %v4056_v22, %v4039_v18  ;;  %v4489_v19 = vor.u32 1.1754944e-38, %v4488_v31  ;;  %vm4487_vm14 = vcmp.eq.f32.partialorder %v4486_v21, 8.507059e+37  ;;  %v2824_v26 = vperm.slane %v10421_v16, 5  ;;  %s4669_s21 = sshll.u32 %s7132_s9, 4  ;;  %s4670_s21 = int_to_ptr.vmem [resolvable:$true] %s4669_s21 }
 0x3d1   :  { %v7063_v12 = vpop.eup %7062  ;;  %v4376_v13 = vadd.f32 %v7059_v58, %v4375_v8 }
 0x3d2   :  { %v4323_v39 = vadd.f32 1.0, %v7063_v12  ;;  %v4072_v9 = vpop.f32.mrf.mxu2 }
 0x3d3   :  { %v4090_v49 = vpop.f32.mrf.mxu3  ;;  %v4380_v15 = vsel %vm4379_vm9, %v7059_v58, %v4376_v13  ;;  %v4073_v48 = vadd.f32 %v4072_v9, %v4055_v7 }
 0x3d4   :  { %v7065_v56 = vpop.eup %7064  ;;  %v4385_v0 = vsel %vm4382_vm10, %v4384_v42, %v4380_v15  ;;  %7066 = vrcp.f32 %v4323_v39  ;;  %v4593_v54 = vand.u32 2147483648, %v4323_v39  ;;  %v4591_v51 = vand.u32 2147483647, %v4323_v39 }
 0x3d5   :  { %4645 = vst [vmem:[#allocation2 + $0x18] sm:$0xff] %v4385_v0  ;;  %v4478_v17 = vmul.f32 %v7065_v56, %v4316_v4  ;;  %v4091_v11 = vadd.f32 %v4090_v49, %v4073_v48  ;;  %v4041_v3 = vpop.f32.mrf.mxu0  ;;  %v4059_v23 = vpop.f32.mrf.mxu1  ;;  %vm4483_vm11 = vweird.f32 %v7065_v56  ;;  %vm4587_vm1 = vweird.f32 %v4323_v39 }
 0x3d6   :  { %vm4484_vm13 = vmor %vm4482_vm12, %vm4483_vm11  ;;  %v4042_v47 = vadd.f32 %v4041_v3, %v2823_v63  ;;  %v4594_v61 = vor.u32 1.1754944e-38, %v4593_v54  ;;  %vm4592_vm3 = vcmp.eq.f32.partialorder %v4591_v51, 8.507059e+37 }
 0x3d7   :  { %v4479_v35 = vsub.f32 1.0, %v4478_v17  ;;  %v4247_v40 = vsub.f32 0.0, %v4091_v11 }
 0x3d8   :  { %v4060_v2 = vadd.f32 %v4059_v23, %v4042_v47 }
 0x3d9   :  { %v4480_v32 = vmul.f32 %v7065_v56, %v4479_v35  ;;  %v4272_v1 = vmul.f32 1.442695, %v4247_v40 }
 0x3da   :  { %v7067_v44 = vpop.eup %7066  ;;  %v4074_v41 = vpop.f32.mrf.mxu2 }
 0x3db   :  { %v4092_v20 = vpop.f32.mrf.mxu3  ;;  %v4481_v52 = vadd.f32 %v7065_v56, %v4480_v32  ;;  %v4583_v25 = vmul.f32 %v7067_v44, %v4323_v39  ;;  %7068 = vpow2.f32 %v4272_v1  ;;  %v4075_v28 = vadd.f32 %v4074_v41, %v4057_v34 }
 0x3dc   :  { %vm4588_vm15 = vweird.f32 %v7067_v44 }
 0x3dd   :  { %v4485_v46 = vsel %vm4484_vm13, %v7065_v56, %v4481_v52  ;;  %v4584_v38 = vsub.f32 1.0, %v4583_v25  ;;  %v4043_v14 = vpop.f32.mrf.mxu0  ;;  %v4061_v43 = vpop.f32.mrf.mxu1  ;;  %v4093_v60 = vadd.f32 %v4092_v20, %v4075_v28  ;;  %vm4589_vm2 = vmor %vm4587_vm1, %vm4588_vm15 }
 0x3de   :  { %v4490_v53 = vsel %vm4487_vm14, %v4489_v19, %v4485_v46 }
 0x3df   :  { %4652 = vst [vmem:[#allocation2 + $0x50] sm:$0xff] %v4490_v53  ;;  %v4585_v29 = vmul.f32 %v7067_v44, %v4584_v38  ;;  %v4254_v45 = vsub.f32 0.0, %v4093_v60 }
 0x3e1   :  { %v7069_v57 = vpop.eup %7068  ;;  %v4586_v59 = vadd.f32 %v7067_v44, %v4585_v29  ;;  %v4286_v37 = vmul.f32 1.442695, %v4254_v45 }
 0x3e2   :  { %v4310_v30 = vadd.f32 1.0, %v7069_v57  ;;  %v4077_v55 = vpop.f32.mrf.mxu2 }
 0x3e3   :  { %v4095_v50 = vpop.f32.mrf.mxu3  ;;  %v4590_v5 = vsel %vm4589_vm2, %v7067_v44, %v4586_v59  ;;  %v4078_v63 = vadd.f32 %v4077_v55, %v4060_v2 }
 0x3e4   :  { %v4595_v58 = vsel %vm4592_vm3, %v4594_v61, %v4590_v5  ;;  %7070 = vrcp.f32 %v4310_v30  ;;  %v4398_v9 = vand.u32 2147483648, %v4310_v30  ;;  %v4396_v15 = vand.u32 2147483647, %v4310_v30 }
 0x3e5   :  { %4659 = vst [vmem:[#allocation2 + $0x88] sm:$0xff] %v4595_v58  ;;  %7072 = vpow2.f32 %v4286_v37  ;;  %v4096_v24 = vadd.f32 %v4095_v50, %v4078_v63  ;;  %v4108_v62 = vpop.f32.mrf.mxu0  ;;  %v4126_v36 = vpop.f32.mrf.mxu1  ;;  %vm4392_vm5 = vweird.f32 %v4310_v30 }
 0x3e6   :  { %v4109_v7 = vadd.f32 %v4108_v62, %v2824_v26  ;;  %v4399_v17 = vor.u32 1.1754944e-38, %v4398_v9  ;;  %vm4397_vm7 = vcmp.eq.f32.partialorder %v4396_v15, 8.507059e+37 }
 0x3e7   :  { %v4261_v6 = vsub.f32 0.0, %v4096_v24 }
 0x3e8   :  { %v4127_v0 = vadd.f32 %v4126_v36, %v4109_v7  ;;  %v2825_v7 = vperm.slane %v10421_v16, 6 }
 0x3e9   :  { %v4300_v4 = vmul.f32 1.442695, %v4261_v6 }
 0x3ea   :  { %v7071_v27 = vpop.eup %7070  ;;  %v4079_v22 = vpop.f32.mrf.mxu2 }
 0x3eb   :  { %v4097_v33 = vpop.f32.mrf.mxu3  ;;  %v7073_v8 = vpop.eup %7072  ;;  %v4388_v10 = vmul.f32 %v7071_v27, %v4310_v30  ;;  %7074 = vpow2.f32 %v4300_v4  ;;  %vm4393_vm4 = vweird.f32 %v7071_v27 }
 0x3ec   :  { %v4317_v12 = vadd.f32 1.0, %v7073_v8  ;;  %vm4394_vm6 = vmor %vm4392_vm5, %vm4393_vm4 }
 0x3ed   :  { %v4389_v13 = vsub.f32 1.0, %v4388_v10  ;;  %v4110_v42 = vpop.f32.mrf.mxu0  ;;  %v4128_v39 = vpop.f32.mrf.mxu1 }
 0x3ee   :  { %7076 = vrcp.f32 %v4317_v12  ;;  %v4111_v34 = vadd.f32 %v4110_v42, %v2824_v26  ;;  %v4503_v52 = vand.u32 2147483648, %v4317_v12  ;;  %v4501_v19 = vand.u32 2147483647, %v4317_v12 }
 0x3ef   :  { %v4390_v49 = vmul.f32 %v7071_v27, %v4389_v13  ;;  %vm4497_vm9 = vweird.f32 %v4317_v12 }
 0x3f0   :  { %v4129_v38 = vadd.f32 %v4128_v39, %v4111_v34  ;;  %v4504_v54 = vor.u32 1.1754944e-38, %v4503_v52  ;;  %vm4502_vm11 = vcmp.eq.f32.partialorder %v4501_v19, 8.507059e+37 }
 0x3f1   :  { %v7075_v48 = vpop.eup %7074  ;;  %v4391_v56 = vadd.f32 %v7071_v27, %v4390_v49 }
 0x3f2   :  { %v4324_v11 = vadd.f32 1.0, %v7075_v48  ;;  %v4144_v3 = vpop.f32.mrf.mxu2 }
 0x3f3   :  { %v4162_v23 = vpop.f32.mrf.mxu3  ;;  %v4395_v18 = vsel %vm4394_vm6, %v7071_v27, %v4391_v56  ;;  %v4145_v35 = vadd.f32 %v4144_v3, %v4127_v0 }
 0x3f4   :  { %v7077_v40 = vpop.eup %7076  ;;  %v4400_v31 = vsel %vm4397_vm7, %v4399_v17, %v4395_v18  ;;  %7078 = vrcp.f32 %v4324_v11  ;;  %v4608_v61 = vand.u32 2147483648, %v4324_v11  ;;  %v4606_v55 = vand.u32 2147483647, %v4324_v11 }
 0x3f5   :  { %4646 = vst [vmem:[#allocation2 + $0x20] sm:$0xff] %v4400_v31  ;;  %v4493_v32 = vmul.f32 %v7077_v40, %v4317_v12  ;;  %v4163_v21 = vadd.f32 %v4162_v23, %v4145_v35  ;;  %v4113_v1 = vpop.f32.mrf.mxu0  ;;  %v4131_v44 = vpop.f32.mrf.mxu1  ;;  %vm4498_vm8 = vweird.f32 %v7077_v40  ;;  %vm4602_vm13 = vweird.f32 %v4324_v11 }
 0x3f6   :  { %vm4499_vm10 = vmor %vm4497_vm9, %vm4498_vm8  ;;  %v4114_v45 = vadd.f32 %v4113_v1, %v2824_v26  ;;  %v4609_v24 = vor.u32 1.1754944e-38, %v4608_v61  ;;  %vm4607_vm15 = vcmp.eq.f32.partialorder %v4606_v55, 8.507059e+37 }
 0x3f7   :  { %v4494_v41 = vsub.f32 1.0, %v4493_v32  ;;  %v4248_v20 = vsub.f32 0.0, %v4163_v21 }
 0x3f8   :  { %v4132_v58 = vadd.f32 %v4131_v44, %v4114_v45 }
 0x3f9   :  { %v4495_v25 = vmul.f32 %v7077_v40, %v4494_v41  ;;  %v4274_v28 = vmul.f32 1.442695, %v4248_v20 }
 0x3fa   :  { %v7079_v46 = vpop.eup %7078  ;;  %v4146_v47 = vpop.f32.mrf.mxu2 }
 0x3fb   :  { %v4164_v14 = vpop.f32.mrf.mxu3  ;;  %v4496_v43 = vadd.f32 %v7077_v40, %v4495_v25  ;;  %v4598_v53 = vmul.f32 %v7079_v46, %v4324_v11  ;;  %7080 = vpow2.f32 %v4274_v28  ;;  %v4147_v60 = vadd.f32 %v4146_v47, %v4129_v38 }
 0x3fc   :  { %vm4603_vm12 = vweird.f32 %v7079_v46 }
 0x3fd   :  { %v4500_v29 = vsel %vm4499_vm10, %v7077_v40, %v4496_v43  ;;  %v4599_v51 = vsub.f32 1.0, %v4598_v53  ;;  %v4115_v57 = vpop.f32.mrf.mxu0  ;;  %v4133_v59 = vpop.f32.mrf.mxu1  ;;  %v4165_v30 = vadd.f32 %v4164_v14, %v4147_v60  ;;  %vm4604_vm14 = vmor %vm4602_vm13, %vm4603_vm12 }
 0x3fe   :  { %v4505_v2 = vsel %vm4502_vm11, %v4504_v54, %v4500_v29 }
 0x3ff   :  { %4653 = vst [vmem:[#allocation2 + $0x58] sm:$0xff] %v4505_v2  ;;  %v4600_v37 = vmul.f32 %v7079_v46, %v4599_v51  ;;  %v4255_v50 = vsub.f32 0.0, %v4165_v30 }
 0x401   :  { %v7081_v5 = vpop.eup %7080  ;;  %v4601_v63 = vadd.f32 %v7079_v46, %v4600_v37  ;;  %v4288_v36 = vmul.f32 1.442695, %v4255_v50 }
 0x402   :  { %v4311_v62 = vadd.f32 1.0, %v7081_v5  ;;  %v4149_v6 = vpop.f32.mrf.mxu2 }
 0x403   :  { %v4167_v4 = vpop.f32.mrf.mxu3  ;;  %v4605_v26 = vsel %vm4604_vm14, %v7079_v46, %v4601_v63  ;;  %v4150_v27 = vadd.f32 %v4149_v6, %v4132_v58 }
 0x404   :  { %v4610_v22 = vsel %vm4607_vm15, %v4609_v24, %v4605_v26  ;;  %7082 = vrcp.f32 %v4311_v62  ;;  %v4413_v3 = vand.u32 2147483648, %v4311_v62  ;;  %v4411_v18 = vand.u32 2147483647, %v4311_v62 }
 0x405   :  { %4660 = vst [vmem:[#allocation2 + $0x90] sm:$0xff] %v4610_v22  ;;  %7084 = vpow2.f32 %v4288_v36  ;;  %v4168_v33 = vadd.f32 %v4167_v4, %v4150_v27  ;;  %v4180_v8 = vpop.f32.mrf.mxu0  ;;  %v4198_v10 = vpop.f32.mrf.mxu1  ;;  %vm4407_vm2 = vweird.f32 %v4311_v62 }
 0x406   :  { %v4181_v0 = vadd.f32 %v4180_v8, %v2825_v7  ;;  %v4414_v31 = vor.u32 1.1754944e-38, %v4413_v3  ;;  %vm4412_vm4 = vcmp.eq.f32.partialorder %v4411_v18, 8.507059e+37 }
 0x407   :  { %v4262_v12 = vsub.f32 0.0, %v4168_v33 }
 0x408   :  { %v4199_v16 = vadd.f32 %v4198_v10, %v4181_v0 }
 0x409   :  { %v4302_v13 = vmul.f32 1.442695, %v4262_v12 }
 0x40a   :  { %v7083_v42 = vpop.eup %7082  ;;  %v4151_v39 = vpop.f32.mrf.mxu2 }
 0x40b   :  { %v4169_v9 = vpop.f32.mrf.mxu3  ;;  %v7085_v49 = vpop.eup %7084  ;;  %v4403_v15 = vmul.f32 %v7083_v42, %v4311_v62  ;;  %7086 = vpow2.f32 %v4302_v13  ;;  %vm4408_vm1 = vweird.f32 %v7083_v42 }
 0x40c   :  { %v4318_v48 = vadd.f32 1.0, %v7085_v49  ;;  %vm4409_vm3 = vmor %vm4407_vm2, %vm4408_vm1 }
 0x40d   :  { %v4404_v56 = vsub.f32 1.0, %v4403_v15  ;;  %v4182_v17 = vpop.f32.mrf.mxu0  ;;  %v4200_v11 = vpop.f32.mrf.mxu1 }
 0x40e   :  { %7088 = vrcp.f32 %v4318_v48  ;;  %v4183_v46 = vadd.f32 %v4182_v17, %v2825_v7  ;;  %v4518_v14 = vand.u32 2147483648, %v4318_v48  ;;  %v4516_v53 = vand.u32 2147483647, %v4318_v48 }
 0x40f   :  { %v4405_v23 = vmul.f32 %v7083_v42, %v4404_v56  ;;  %vm4512_vm6 = vweird.f32 %v4318_v48 }
 0x410   :  { %v4201_v29 = vadd.f32 %v4200_v11, %v4183_v46  ;;  %v4519_v2 = vor.u32 1.1754944e-38, %v4518_v14  ;;  %vm4517_vm8 = vcmp.eq.f32.partialorder %v4516_v53, 8.507059e+37 }
 0x411   :  { %v7087_v35 = vpop.eup %7086  ;;  %v4406_v40 = vadd.f32 %v7083_v42, %v4405_v23 }
 0x412   :  { %v4325_v32 = vadd.f32 1.0, %v7087_v35  ;;  %v4216_v21 = vpop.f32.mrf.mxu2 }
 0x413   :  { %v4234_v1 = vpop.f32.mrf.mxu3  ;;  %v4410_v44 = vsel %vm4409_vm3, %v7083_v42, %v4406_v40  ;;  %v4217_v34 = vadd.f32 %v4216_v21, %v4199_v16 }
 0x414   :  { %v7089_v41 = vpop.eup %7088  ;;  %v4415_v20 = vsel %vm4412_vm4, %v4414_v31, %v4410_v44  ;;  %7090 = vrcp.f32 %v4325_v32  ;;  %v4623_v58 = vand.u32 2147483648, %v4325_v32  ;;  %v4621_v36 = vand.u32 2147483647, %v4325_v32 }
 0x415   :  { %4647 = vst [vmem:[#allocation2 + $0x28] sm:$0xff] %v4415_v20  ;;  %v4508_v52 = vmul.f32 %v7089_v41, %v4318_v48  ;;  %v4235_v25 = vadd.f32 %v4234_v1, %v4217_v34  ;;  %v4185_v19 = vpop.f32.mrf.mxu0  ;;  %v4203_v28 = vpop.f32.mrf.mxu1  ;;  %vm4513_vm5 = vweird.f32 %v7089_v41  ;;  %vm4617_vm10 = vweird.f32 %v4325_v32 }
 0x416   :  { %vm4514_vm7 = vmor %vm4512_vm6, %vm4513_vm5  ;;  %v4186_v55 = vadd.f32 %v4185_v19, %v2825_v7  ;;  %v4624_v22 = vor.u32 1.1754944e-38, %v4623_v58  ;;  %vm4622_vm12 = vcmp.eq.f32.partialorder %v4621_v36, 8.507059e+37 }
 0x417   :  { %v4509_v38 = vsub.f32 1.0, %v4508_v52  ;;  %v4249_v47 = vsub.f32 0.0, %v4235_v25 }
 0x418   :  { %v4204_v27 = vadd.f32 %v4203_v28, %v4186_v55 }
 0x419   :  { %v4510_v43 = vmul.f32 %v7089_v41, %v4509_v38  ;;  %v4276_v54 = vmul.f32 1.442695, %v4249_v47 }
 0x41a   :  { %v7091_v60 = vpop.eup %7090  ;;  %v4218_v51 = vpop.f32.mrf.mxu2 }
 0x41b   :  { %v4236_v45 = vpop.f32.mrf.mxu3  ;;  %v4511_v57 = vadd.f32 %v7089_v41, %v4510_v43  ;;  %v4613_v59 = vmul.f32 %v7091_v60, %v4325_v32  ;;  %7092 = vpow2.f32 %v4276_v54  ;;  %v4219_v61 = vadd.f32 %v4218_v51, %v4201_v29 }
 0x41c   :  { %vm4618_vm9 = vweird.f32 %v7091_v60 }
 0x41d   :  { %v4515_v30 = vsel %vm4514_vm7, %v7089_v41, %v4511_v57  ;;  %v4614_v37 = vsub.f32 1.0, %v4613_v59  ;;  %v4187_v50 = vpop.f32.mrf.mxu0  ;;  %v4205_v5 = vpop.f32.mrf.mxu1  ;;  %v4237_v24 = vadd.f32 %v4236_v45, %v4219_v61  ;;  %vm4619_vm11 = vmor %vm4617_vm10, %vm4618_vm9 }
 0x41e   :  { %v4520_v63 = vsel %vm4517_vm8, %v4519_v2, %v4515_v30 }
 0x41f   :  { %4654 = vst [vmem:[#allocation2 + $0x60] sm:$0xff] %v4520_v63  ;;  %v4615_v62 = vmul.f32 %v7091_v60, %v4614_v37  ;;  %v4256_v6 = vsub.f32 0.0, %v4237_v24 }
 0x421   :  { %v7093_v4 = vpop.eup %7092  ;;  %v4616_v26 = vadd.f32 %v7091_v60, %v4615_v62  ;;  %v4290_v8 = vmul.f32 1.442695, %v4256_v6 }
 0x422   :  { %v4312_v33 = vadd.f32 1.0, %v7093_v4  ;;  %v4221_v10 = vpop.f32.mrf.mxu2 }
 0x423   :  { %v4239_v12 = vpop.f32.mrf.mxu3  ;;  %v4620_v13 = vsel %vm4619_vm11, %v7091_v60, %v4616_v26  ;;  %v4222_v7 = vadd.f32 %v4221_v10, %v4204_v27 }
 0x424   :  { %v4625_v42 = vsel %vm4622_vm12, %v4624_v22, %v4620_v13  ;;  %7094 = vrcp.f32 %v4312_v33  ;;  %v4428_v23 = vand.u32 2147483648, %v4312_v33  ;;  %v4426_v35 = vand.u32 2147483647, %v4312_v33 }
 0x425   :  { %4661 = vst [vmem:[#allocation2 + $0x98] sm:$0xff] %v4625_v42  ;;  %7096 = vpow2.f32 %v4290_v8  ;;  %v4240_v39 = vadd.f32 %v4239_v12, %v4222_v7  ;;  %vm4422_vm14 = vweird.f32 %v4312_v33 }
 0x426   :  { %v4429_v31 = vor.u32 1.1754944e-38, %v4428_v23  ;;  %vm4427_vm1 = vcmp.eq.f32.partialorder %v4426_v35, 8.507059e+37 }
 0x427   :  { %v4263_v9 = vsub.f32 0.0, %v4240_v39 }
 0x429   :  { %v4304_v49 = vmul.f32 1.442695, %v4263_v9 }
 0x42a   :  { %v7095_v15 = vpop.eup %7094  ;;  %v4223_v48 = vpop.f32.mrf.mxu2 }
 0x42b   :  { %v4241_v56 = vpop.f32.mrf.mxu3  ;;  %v7097_v0 = vpop.eup %7096  ;;  %v4418_v17 = vmul.f32 %v7095_v15, %v4312_v33  ;;  %7098 = vpow2.f32 %v4304_v49  ;;  %vm4423_vm13 = vweird.f32 %v7095_v15 }
 0x42c   :  { %v4319_v11 = vadd.f32 1.0, %v7097_v0  ;;  %vm4424_vm15 = vmor %vm4422_vm14, %vm4423_vm13 }
 0x42d   :  { %v4419_v3 = vsub.f32 1.0, %v4418_v17 }
 0x42e   :  { %7100 = vrcp.f32 %v4319_v11  ;;  %v4533_v20 = vand.u32 2147483648, %v4319_v11  ;;  %v4531_v25 = vand.u32 2147483647, %v4319_v11  ;;  %vm4527_vm3 = vweird.f32 %v4319_v11 }
 0x42f   :  { %v4420_v18 = vmul.f32 %v7095_v15, %v4419_v3 }
 0x430   :  { %v4534_v38 = vor.u32 1.1754944e-38, %v4533_v20  ;;  %vm4532_vm5 = vcmp.eq.f32.partialorder %v4531_v25, 8.507059e+37 }
 0x431   :  { %v7099_v40 = vpop.eup %7098  ;;  %v4421_v16 = vadd.f32 %v7095_v15, %v4420_v18 }
 0x432   :  { %v4326_v32 = vadd.f32 1.0, %v7099_v40 }
 0x433   :  { %v4425_v21 = vsel %vm4424_vm15, %v7095_v15, %v4421_v16 }
 0x434   :  { %v7101_v1 = vpop.eup %7100  ;;  %v4430_v44 = vsel %vm4427_vm1, %v4429_v31, %v4425_v21  ;;  %7102 = vrcp.f32 %v4326_v32  ;;  %v4638_v53 = vand.u32 2147483648, %v4326_v32  ;;  %v4636_v60 = vand.u32 2147483647, %v4326_v32 }
 0x435   :  { %4648 = vst.msk [vmem:[#allocation2 + $0x30] sm:$0xff] %vm1296_vm0, %v4430_v44  ;;  %v4523_v34 = vmul.f32 %v7101_v1, %v4319_v11  ;;  %vm4528_vm2 = vweird.f32 %v7101_v1  ;;  %vm4632_vm7 = vweird.f32 %v4326_v32 }
 0x436   :  { %vm4529_vm4 = vmor %vm4527_vm3, %vm4528_vm2  ;;  %v4639_v51 = vor.u32 1.1754944e-38, %v4638_v53  ;;  %vm4637_vm9 = vcmp.eq.f32.partialorder %v4636_v60, 8.507059e+37 }
 0x437   :  { %v4524_v41 = vsub.f32 1.0, %v4523_v34 }
 0x439   :  { %v4525_v52 = vmul.f32 %v7101_v1, %v4524_v41 }
 0x43a   :  { %v7103_v19 = vpop.eup %7102 }
 0x43b   :  { %v4526_v28 = vadd.f32 %v7101_v1, %v4525_v52  ;;  %v4628_v46 = vmul.f32 %v7103_v19, %v4326_v32  ;;  %vm4633_vm6 = vweird.f32 %v7103_v19 }
 0x43c   :  { %vm4634_vm8 = vmor %vm4632_vm7, %vm4633_vm6 }
 0x43d   :  { %v4530_v47 = vsel %vm4529_vm4, %v7101_v1, %v4526_v28  ;;  %v4629_v14 = vsub.f32 1.0, %v4628_v46 }
 0x43e   :  { %v4535_v43 = vsel %vm4532_vm5, %v4534_v38, %v4530_v47 }
 0x43f   :  { %4655 = vst.msk [vmem:[#allocation2 + $0x68] sm:$0xff] %vm1296_vm0, %v4535_v43  ;;  %v4630_v54 = vmul.f32 %v7103_v19, %v4629_v14 }
 0x441   :  { %v4631_v29 = vadd.f32 %v7103_v19, %v4630_v54 }
 0x443   :  { %v4635_v45 = vsel %vm4634_vm8, %v7103_v19, %v4631_v29 }
 0x444   :  { %v4640_v57 = vsel %vm4637_vm9, %v4639_v51, %v4635_v45 }
 0x445   :  { %4662 = vst.msk [vmem:[#allocation2 + $0xa0] sm:$0xff] %vm1296_vm0, %v4640_v57 }
 0x446   :  { %4677 = dma.vmem_to_hbm [thread:$0]  %s4670_s21, 2688, %s4672_s23, [#allocation3], %s7133_s24, %s7133_s24, %s7134_s2  }
 0x447   :  { %7130 = dma.done.wait [#allocation3], 2688  }
 0x448   :  { %7131 = vsyncadd [#allocation3], 4294964608 }
 0x449   :  { %4684 = vsyncpa [#allocation3], 1 }

</bundles_post_ra>
